<compile_context>
chip_gen: v7x
topology: tpu7x:2x2x1
jax: 0.10.0
libtpu: 0.0.40
codegen_flags: <defaults>
</compile_context>

<pallas_src>
import functools

import jax
import jax.numpy as jnp
from jax.experimental import pallas as pl
from jax.experimental.pallas import tpu as pltpu

# Hidden sizes fixed by the module definition (FcBlock stack + final Linear(50, 3)).
LAYER_SIZES = [500, 1000, 1000, 500, 50, 3]


def _round_up(x, m):
    return ((x + m - 1) // m) * m


def _fc_kernel(x_ref, w0, w1, w2, w3, w4, w5, b_ref, out_ref, *, out_pads):
    """Fused 6-layer MLP: 5 x (Linear + ReLU) followed by a plain Linear.

    Weights are bf16 (in, out) tiles; accumulation is f32. Biases are packed as
    rows of b_ref (f32), zero-padded to the padded output width of each layer.
    """
    def layer(h, w_ref, li, relu=True):
        width = out_pads[li]
        y = jnp.dot(h.astype(jnp.bfloat16), w_ref[...],
                    preferred_element_type=jnp.float32)
        y = y + b_ref[li, :width][None, :]
        return jnp.maximum(y, 0.0) if relu else y

    h = x_ref[...].astype(jnp.float32)
    h = layer(h, w0, 0)                 # FcBlock(state_size, 500)
    h = layer(h, w1, 1)                 # FcBlock(500, 1000)
    h = layer(h, w2, 2)                 # FcBlock(1000, 1000)
    h = layer(h, w3, 3)                 # FcBlock(1000, 500)
    h = layer(h, w4, 4)                 # FcBlock(500, 50)
    out_ref[...] = layer(h, w5, 5, relu=False).astype(out_ref.dtype)   # Linear(50, 3)


def force_estimator_fc_forward(x, params):
    """x: (B, state_size) float32.  params: list of (W, b) with W:(in,out), b:(1,out).

    Returns (B, 3) float32 predictions.
    """
    B, state_size = x.shape
    dims = [state_size] + LAYER_SIZES
    pads = [_round_up(d, 128) for d in dims]          # lane-friendly feature dims
    out_pads = tuple(pads[1:])
    max_w = max(out_pads)

    # Batch tiling: TB multiple of 8 (sublane); 256 rows per tile for big batches.
    TB = 256 if B >= 256 else _round_up(B, 8)
    B_pad = _round_up(B, TB)
    grid = (B_pad // TB,)

    # Zero-pad x into (B_pad, pads[0]).
    x_pad = jnp.zeros((B_pad, pads[0]), jnp.float32).at[:B, :state_size].set(x)

    # Pad + cast weights to bf16; pack biases (f32) into one (8, max_w) buffer.
    w_pad = []
    b_stack = jnp.zeros((8, max_w), jnp.float32)
    for i, (w, b) in enumerate(params):
        wp = jnp.zeros((pads[i], pads[i + 1]), jnp.bfloat16)
        wp = wp.at[:dims[i], :dims[i + 1]].set(w.astype(jnp.bfloat16))
        w_pad.append(wp)
        b_stack = b_stack.at[i, :dims[i + 1]].set(b.reshape(-1))

    in_specs = [pl.BlockSpec((TB, pads[0]), lambda i: (i, 0))]          # x tile
    in_specs += [pl.BlockSpec((pads[k], pads[k + 1]), lambda i: (0, 0)) # resident W
                 for k in range(6)]
    in_specs += [pl.BlockSpec((8, max_w), lambda i: (0, 0))]            # resident b

    out = pl.pallas_call(
        functools.partial(_fc_kernel, out_pads=out_pads),
        out_shape=jax.ShapeDtypeStruct((B_pad, pads[-1]), jnp.float32),
        grid=grid,
        in_specs=in_specs,
        out_specs=pl.BlockSpec((TB, pads[-1]), lambda i: (i, 0)),
        compiler_params=pltpu.CompilerParams(
            dimension_semantics=("parallel",),
            vmem_limit_bytes=32 * 1024 * 1024,
        ),
    )(x_pad, *w_pad, b_stack)

    return out[:B, :LAYER_SIZES[-1]]


def init_params(key, state_size):
    """Deterministic PyTorch-style Linear init: U(-1/sqrt(fan_in), 1/sqrt(fan_in))."""
    dims = [state_size] + LAYER_SIZES
    params = []
    for i in range(len(dims) - 1):
        key, kw, kb = jax.random.split(key, 3)
        fan_in = dims[i]
        bound = 1.0 / float(fan_in) ** 0.5
        w = jax.random.uniform(kw, (dims[i], dims[i + 1]), jnp.float32, -bound, bound)
        b = jax.random.uniform(kb, (1, dims[i + 1]), jnp.float32, -bound, bound)
        params.append((w, b))
    return params


def reference_forward(x, params):
    """Pure-JAX reference that mirrors the kernel's bf16-weight / f32-accum math."""
    h = x.astype(jnp.float32)
    for i, (w, b) in enumerate(params):
        h = jnp.dot(h.astype(jnp.bfloat16), w.astype(jnp.bfloat16),
                    preferred_element_type=jnp.float32) + b
        if i < len(params) - 1:
            h = jnp.maximum(h, 0.0)
    return h


if __name__ == "__main__":
    key = jax.random.PRNGKey(0)
    k_x, k_p = jax.random.split(key)

    batch = 2
    state_size = 32                       # constructor arg; small per instructions
    x = jax.random.normal(k_x, (batch, state_size), jnp.float32)

    params = init_params(k_p, state_size)

    pred = force_estimator_fc_forward(x, params)
    pred = jax.block_until_ready(pred)

    ref = reference_forward(x, params)
    assert pred.shape == (batch, 3)
    assert jnp.allclose(pred, ref, atol=1e-2, rtol=1e-2), "mismatch vs reference"

    print("KERNEL_OK")
</pallas_src>

<mosaic_0001>
module attributes {stable_mosaic.version = 11 : i64} {
  func.func @_fc_kernel(%arg0: i32, %arg1: memref<8x128xf32, #tpu.memory_space<vmem>>, %arg2: memref<128x512xbf16, #tpu.memory_space<vmem>>, %arg3: memref<512x1024xbf16, #tpu.memory_space<vmem>>, %arg4: memref<1024x1024xbf16, #tpu.memory_space<vmem>>, %arg5: memref<1024x512xbf16, #tpu.memory_space<vmem>>, %arg6: memref<512x128xbf16, #tpu.memory_space<vmem>>, %arg7: memref<128x128xbf16, #tpu.memory_space<vmem>>, %arg8: memref<8x1024xf32, #tpu.memory_space<vmem>>, %arg9: memref<8x128xf32, #tpu.memory_space<vmem>>) attributes {dimension_semantics = [#tpu.dimension_semantics<parallel>], iteration_bounds = array<i64: 1>, scalar_prefetch = 0 : i64, scratch_operands = 0 : i64, tpu.core_type = #tpu.core_type<tc>, window_params = [{transform_indices = @transform_0, window_bounds = array<i64: 8, 128>}, {pipeline_mode = #tpu.pipeline_mode<synchronous>, transform_indices = @transform_1, window_bounds = array<i64: 128, 512>}, {pipeline_mode = #tpu.pipeline_mode<synchronous>, transform_indices = @transform_2, window_bounds = array<i64: 512, 1024>}, {pipeline_mode = #tpu.pipeline_mode<synchronous>, transform_indices = @transform_3, window_bounds = array<i64: 1024, 1024>}, {pipeline_mode = #tpu.pipeline_mode<synchronous>, transform_indices = @transform_4, window_bounds = array<i64: 1024, 512>}, {pipeline_mode = #tpu.pipeline_mode<synchronous>, transform_indices = @transform_5, window_bounds = array<i64: 512, 128>}, {pipeline_mode = #tpu.pipeline_mode<synchronous>, transform_indices = @transform_6, window_bounds = array<i64: 128, 128>}, {pipeline_mode = #tpu.pipeline_mode<synchronous>, transform_indices = @transform_7, window_bounds = array<i64: 8, 1024>}, {transform_indices = @transform_8, window_bounds = array<i64: 8, 128>}]} {
    %c0 = arith.constant 0 : index
    %c0_0 = arith.constant 0 : index
    %0 = vector.load %arg1[%c0, %c0_0] : memref<8x128xf32, #tpu.memory_space<vmem>>, vector<8x128xf32>
    %1 = arith.truncf %0 : vector<8x128xf32> to vector<8x128xbf16>
    %c0_1 = arith.constant 0 : index
    %c0_2 = arith.constant 0 : index
    %2 = vector.load %arg2[%c0_1, %c0_2] : memref<128x512xbf16, #tpu.memory_space<vmem>>, vector<128x512xbf16>
    %cst = arith.constant dense<0.000000e+00> : vector<8x512xf32>
    %3 = tpu.matmul %1, %2, %cst {dimension_numbers = #tpu.dot_dimension_numbers<[1], [0], [0], [1], [0, 0, 1, 1], [], []>} : vector<8x128xbf16>, vector<128x512xbf16>, vector<8x512xf32> -> vector<8x512xf32>
    %c0_3 = arith.constant 0 : index
    %c0_4 = arith.constant 0 : index
    %4 = vector.load %arg8[%c0_3, %c0_4] : memref<8x1024xf32, #tpu.memory_space<vmem>>, vector<1x512xf32>
    %5 = vector.shape_cast %4 : vector<1x512xf32> to vector<512xf32>
    %6 = vector.shape_cast %5 : vector<512xf32> to vector<1x512xf32>
    %7 = vector.broadcast %6 : vector<1x512xf32> to vector<8x512xf32>
    %8 = arith.addf %3, %7 : vector<8x512xf32>
    %cst_5 = arith.constant 0.000000e+00 : f32
    %9 = vector.broadcast %cst_5 : f32 to vector<8x512xf32>
    %10 = arith.maximumf %8, %9 : vector<8x512xf32>
    %11 = arith.truncf %10 : vector<8x512xf32> to vector<8x512xbf16>
    %c0_6 = arith.constant 0 : index
    %c0_7 = arith.constant 0 : index
    %12 = vector.load %arg3[%c0_6, %c0_7] : memref<512x1024xbf16, #tpu.memory_space<vmem>>, vector<512x1024xbf16>
    %cst_8 = arith.constant dense<0.000000e+00> : vector<8x1024xf32>
    %13 = tpu.matmul %11, %12, %cst_8 {dimension_numbers = #tpu.dot_dimension_numbers<[1], [0], [0], [1], [0, 0, 1, 1], [], []>} : vector<8x512xbf16>, vector<512x1024xbf16>, vector<8x1024xf32> -> vector<8x1024xf32>
    %c1 = arith.constant 1 : index
    %c0_9 = arith.constant 0 : index
    %14 = vector.load %arg8[%c1, %c0_9] : memref<8x1024xf32, #tpu.memory_space<vmem>>, vector<1x1024xf32>
    %15 = vector.shape_cast %14 : vector<1x1024xf32> to vector<1024xf32>
    %16 = vector.shape_cast %15 : vector<1024xf32> to vector<1x1024xf32>
    %17 = vector.broadcast %16 : vector<1x1024xf32> to vector<8x1024xf32>
    %18 = arith.addf %13, %17 : vector<8x1024xf32>
    %cst_10 = arith.constant 0.000000e+00 : f32
    %19 = vector.broadcast %cst_10 : f32 to vector<8x1024xf32>
    %20 = arith.maximumf %18, %19 : vector<8x1024xf32>
    %21 = arith.truncf %20 : vector<8x1024xf32> to vector<8x1024xbf16>
    %c0_11 = arith.constant 0 : index
    %c0_12 = arith.constant 0 : index
    %22 = vector.load %arg4[%c0_11, %c0_12] : memref<1024x1024xbf16, #tpu.memory_space<vmem>>, vector<1024x1024xbf16>
    %cst_13 = arith.constant dense<0.000000e+00> : vector<8x1024xf32>
    %23 = tpu.matmul %21, %22, %cst_13 {dimension_numbers = #tpu.dot_dimension_numbers<[1], [0], [0], [1], [0, 0, 1, 1], [], []>} : vector<8x1024xbf16>, vector<1024x1024xbf16>, vector<8x1024xf32> -> vector<8x1024xf32>
    %c2 = arith.constant 2 : index
    %c0_14 = arith.constant 0 : index
    %24 = vector.load %arg8[%c2, %c0_14] : memref<8x1024xf32, #tpu.memory_space<vmem>>, vector<1x1024xf32>
    %25 = vector.shape_cast %24 : vector<1x1024xf32> to vector<1024xf32>
    %26 = vector.shape_cast %25 : vector<1024xf32> to vector<1x1024xf32>
    %27 = vector.broadcast %26 : vector<1x1024xf32> to vector<8x1024xf32>
    %28 = arith.addf %23, %27 : vector<8x1024xf32>
    %cst_15 = arith.constant 0.000000e+00 : f32
    %29 = vector.broadcast %cst_15 : f32 to vector<8x1024xf32>
    %30 = arith.maximumf %28, %29 : vector<8x1024xf32>
    %31 = arith.truncf %30 : vector<8x1024xf32> to vector<8x1024xbf16>
    %c0_16 = arith.constant 0 : index
    %c0_17 = arith.constant 0 : index
    %32 = vector.load %arg5[%c0_16, %c0_17] : memref<1024x512xbf16, #tpu.memory_space<vmem>>, vector<1024x512xbf16>
    %cst_18 = arith.constant dense<0.000000e+00> : vector<8x512xf32>
    %33 = tpu.matmul %31, %32, %cst_18 {dimension_numbers = #tpu.dot_dimension_numbers<[1], [0], [0], [1], [0, 0, 1, 1], [], []>} : vector<8x1024xbf16>, vector<1024x512xbf16>, vector<8x512xf32> -> vector<8x512xf32>
    %c3 = arith.constant 3 : index
    %c0_19 = arith.constant 0 : index
    %34 = vector.load %arg8[%c3, %c0_19] : memref<8x1024xf32, #tpu.memory_space<vmem>>, vector<1x512xf32>
    %35 = vector.shape_cast %34 : vector<1x512xf32> to vector<512xf32>
    %36 = vector.shape_cast %35 : vector<512xf32> to vector<1x512xf32>
    %37 = vector.broadcast %36 : vector<1x512xf32> to vector<8x512xf32>
    %38 = arith.addf %33, %37 : vector<8x512xf32>
    %cst_20 = arith.constant 0.000000e+00 : f32
    %39 = vector.broadcast %cst_20 : f32 to vector<8x512xf32>
    %40 = arith.maximumf %38, %39 : vector<8x512xf32>
    %41 = arith.truncf %40 : vector<8x512xf32> to vector<8x512xbf16>
    %c0_21 = arith.constant 0 : index
    %c0_22 = arith.constant 0 : index
    %42 = vector.load %arg6[%c0_21, %c0_22] : memref<512x128xbf16, #tpu.memory_space<vmem>>, vector<512x128xbf16>
    %cst_23 = arith.constant dense<0.000000e+00> : vector<8x128xf32>
    %43 = tpu.matmul %41, %42, %cst_23 {dimension_numbers = #tpu.dot_dimension_numbers<[1], [0], [0], [1], [0, 0, 1, 1], [], []>} : vector<8x512xbf16>, vector<512x128xbf16>, vector<8x128xf32> -> vector<8x128xf32>
    %c4 = arith.constant 4 : index
    %c0_24 = arith.constant 0 : index
    %44 = vector.load %arg8[%c4, %c0_24] : memref<8x1024xf32, #tpu.memory_space<vmem>>, vector<1x128xf32>
    %45 = vector.shape_cast %44 : vector<1x128xf32> to vector<128xf32>
    %46 = vector.shape_cast %45 : vector<128xf32> to vector<1x128xf32>
    %47 = vector.broadcast %46 : vector<1x128xf32> to vector<8x128xf32>
    %48 = arith.addf %43, %47 : vector<8x128xf32>
    %cst_25 = arith.constant 0.000000e+00 : f32
    %49 = vector.broadcast %cst_25 : f32 to vector<8x128xf32>
    %50 = arith.maximumf %48, %49 : vector<8x128xf32>
    %51 = arith.truncf %50 : vector<8x128xf32> to vector<8x128xbf16>
    %c0_26 = arith.constant 0 : index
    %c0_27 = arith.constant 0 : index
    %52 = vector.load %arg7[%c0_26, %c0_27] : memref<128x128xbf16, #tpu.memory_space<vmem>>, vector<128x128xbf16>
    %cst_28 = arith.constant dense<0.000000e+00> : vector<8x128xf32>
    %53 = tpu.matmul %51, %52, %cst_28 {dimension_numbers = #tpu.dot_dimension_numbers<[1], [0], [0], [1], [0, 0, 1, 1], [], []>} : vector<8x128xbf16>, vector<128x128xbf16>, vector<8x128xf32> -> vector<8x128xf32>
    %c5 = arith.constant 5 : index
    %c0_29 = arith.constant 0 : index
    %54 = vector.load %arg8[%c5, %c0_29] : memref<8x1024xf32, #tpu.memory_space<vmem>>, vector<1x128xf32>
    %55 = vector.shape_cast %54 : vector<1x128xf32> to vector<128xf32>
    %56 = vector.shape_cast %55 : vector<128xf32> to vector<1x128xf32>
    %57 = vector.broadcast %56 : vector<1x128xf32> to vector<8x128xf32>
    %58 = arith.addf %53, %57 : vector<8x128xf32>
    %c0_30 = arith.constant 0 : index
    %c0_31 = arith.constant 0 : index
    %59 = vector.load %arg9[%c0_30, %c0_31] : memref<8x128xf32, #tpu.memory_space<vmem>>, vector<8x128xf32>
    tpu.vector_store %arg9[%c0_30, %c0_31], %58 {strides = array<i32>} : memref<8x128xf32, #tpu.memory_space<vmem>>, vector<8x128xf32>,
    return
  }
  func.func @transform_0(%arg0: i32) -> (i32, i32) {
    %c0_i32 = arith.constant 0 : i32
    %c0_i32_0 = arith.constant 0 : i32
    return %arg0, %c0_i32 : i32, i32
  }
  func.func @transform_1(%arg0: i32) -> (i32, i32) {
    %c0_i32 = arith.constant 0 : i32
    %c0_i32_0 = arith.constant 0 : i32
    %c0_i32_1 = arith.constant 0 : i32
    return %c0_i32, %c0_i32_0 : i32, i32
  }
  func.func @transform_2(%arg0: i32) -> (i32, i32) {
    %c0_i32 = arith.constant 0 : i32
    %c0_i32_0 = arith.constant 0 : i32
    %c0_i32_1 = arith.constant 0 : i32
    return %c0_i32, %c0_i32_0 : i32, i32
  }
  func.func @transform_3(%arg0: i32) -> (i32, i32) {
    %c0_i32 = arith.constant 0 : i32
    %c0_i32_0 = arith.constant 0 : i32
    %c0_i32_1 = arith.constant 0 : i32
    return %c0_i32, %c0_i32_0 : i32, i32
  }
  func.func @transform_4(%arg0: i32) -> (i32, i32) {
    %c0_i32 = arith.constant 0 : i32
    %c0_i32_0 = arith.constant 0 : i32
    %c0_i32_1 = arith.constant 0 : i32
    return %c0_i32, %c0_i32_0 : i32, i32
  }
  func.func @transform_5(%arg0: i32) -> (i32, i32) {
    %c0_i32 = arith.constant 0 : i32
    %c0_i32_0 = arith.constant 0 : i32
    %c0_i32_1 = arith.constant 0 : i32
    return %c0_i32, %c0_i32_0 : i32, i32
  }
  func.func @transform_6(%arg0: i32) -> (i32, i32) {
    %c0_i32 = arith.constant 0 : i32
    %c0_i32_0 = arith.constant 0 : i32
    %c0_i32_1 = arith.constant 0 : i32
    return %c0_i32, %c0_i32_0 : i32, i32
  }
  func.func @transform_7(%arg0: i32) -> (i32, i32) {
    %c0_i32 = arith.constant 0 : i32
    %c0_i32_0 = arith.constant 0 : i32
    %c0_i32_1 = arith.constant 0 : i32
    return %c0_i32, %c0_i32_0 : i32, i32
  }
  func.func @transform_8(%arg0: i32) -> (i32, i32) {
    %c0_i32 = arith.constant 0 : i32
    %c0_i32_0 = arith.constant 0 : i32
    return %arg0, %c0_i32 : i32, i32
  }
}

</mosaic_0001>

<bundles_post_ra>
// kernel: tpu_custom_call.1
= control target key start
LH: loop header
LB: loop body
LE: loop exit
PB: predicated region body
PF: predicated region fallthrough
CT: control target
= control target key end

     0   :  { %13 = vsyncpa [#allocation3], 0  ;;  %s10853_s0 = inlined_call_operand.hbm [shape: f32[8,128], index: 0, kind: input, shape index: {}]   ;;  %s10854_s1 = inlined_call_operand.hbm [shape: bf16[128,512], index: 1, kind: input, shape index: {}]   ;;  %s10855_s2 = inlined_call_operand.hbm [shape: bf16[512,1024], index: 2, kind: input, shape index: {}]   ;;  %s10856_s3 = inlined_call_operand.hbm [shape: bf16[1024,1024], index: 3, kind: input, shape index: {}]   ;;  %s10857_s4 = inlined_call_operand.hbm [shape: bf16[1024,512], index: 4, kind: input, shape index: {}]   ;;  %s10858_s5 = inlined_call_operand.hbm [shape: bf16[512,128], index: 5, kind: input, shape index: {}]   ;;  %s10859_s6 = inlined_call_operand.hbm [shape: bf16[128,128], index: 6, kind: input, shape index: {}]   ;;  %s10860_s7 = inlined_call_operand.hbm [shape: f32[8,1024], index: 7, kind: input, shape index: {}]   ;;  %s10861_s8 = inlined_call_operand.hbm [shape: f32[8,128], index: 8, kind: output, shape index: {}]  }
   0x1   :  { %14 = vsyncpa [#allocation6], 0 }
   0x2   :  { %15 = vsyncpa [#allocation9], 0 }
   0x3   :  { %16 = vsyncpa [#allocation12], 0 }
   0x4   :  { %17 = vsyncpa [#allocation15], 0 }
   0x5   :  { %18 = vsyncpa [#allocation4], 0  ;;  %s10492_s27 = smov [#allocation5]   ;;  %s10282_s9 = scalar_lea.hbm %s10854_s1, 4096 }
   0x6   :  { %s34_s28 = sshll.u32 %s10492_s27, 4  ;;  %p10283_p0 = scmp.ne.s32.totalorder %s10854_s1, %s10282_s9  ;;  %s35_s28 = int_to_ptr.vmem [resolvable:$true] %s34_s28 }
   0x7   :  { %p10286_p1 = scmp.lt.u32.totalorder %s10282_s9, %s10854_s1 }
   0x9   :  { %p10288_p2 = pnand %p10286_p1, %p10283_p0 }
   0xb   :  { %10291 = shalt.err (!%p10288_p2)
}
   0xc   :  { %s10292_s14 = scalar_lea.vmem %s35_s28, 4096  ;;  %p10297_p4 = scmp.lt.s32.totalorder %s35_s28, %s35_s28 }
   0xd   :  { %p10293_p3 = scmp.ne.s32.totalorder %s35_s28, %s10292_s14  ;;  %p10298_p5 = scmp.lt.s32.totalorder %s10292_s14, %s10292_s14 }
   0xf   :  { %p10299_p6 = por %p10298_p5, %p10297_p4 }
  0x11   :  { %p10300_p7 = pnand %p10299_p6, %p10293_p3 }
  0x13   :  { %10303 = shalt.err (!%p10300_p7)
}
  0x14   :  { %s10493_s15 = smov 256   ;;  %s10494_s16 = smov 16  }
  0x15   :  { %40 = dma.hbm_to_vmem [thread:$0]  %s10854_s1, 4096, %s35_s28, [#allocation6], %s10493_s15, %s10493_s15, %s10494_s16  }
  0x16   :  { %s10495_s19 = smov [#allocation8]   ;;  %s10496_s21 = smov [#allocation11]  }
  0x17   :  { %s58_s20 = sshll.u32 %s10495_s19, 4  ;;  %s82_s22 = sshll.u32 %s10496_s21, 4  ;;  %s59_s20 = int_to_ptr.vmem [resolvable:$true] %s58_s20  ;;  %s83_s22 = int_to_ptr.vmem [resolvable:$true] %s82_s22 }
  0x18   :  { %s10304_s25 = scalar_lea.hbm %s10856_s3, 65536 }
  0x19   :  { %p10305_p8 = scmp.ne.s32.totalorder %s10856_s3, %s10304_s25  ;;  %p10308_p9 = scmp.lt.u32.totalorder %s10304_s25, %s10856_s3 }
  0x1b   :  { %p10310_p10 = pnand %p10308_p9, %p10305_p8 }
  0x1d   :  { %10313 = shalt.err (!%p10310_p10)
}
  0x1e   :  { %s10314_s1 = scalar_lea.vmem %s59_s20, 65536  ;;  %p10319_p12 = scmp.lt.s32.totalorder %s59_s20, %s59_s20 }
  0x1f   :  { %p10315_p11 = scmp.ne.s32.totalorder %s59_s20, %s10314_s1  ;;  %p10320_p13 = scmp.lt.s32.totalorder %s10314_s1, %s10314_s1 }
  0x21   :  { %p10321_p0 = por %p10320_p13, %p10319_p12 }
  0x23   :  { %p10322_p1 = pnand %p10321_p0, %p10315_p11 }
  0x25   :  { %10325 = shalt.err (!%p10322_p1)
}
  0x26   :  { %s10497_s28 = smov 512   ;;  %s10498_s9 = smov 32  }
  0x27   :  { %64 = dma.hbm_to_vmem [thread:$0]  %s10856_s3, 65536, %s59_s20, [#allocation9], %s10497_s28, %s10497_s28, %s10498_s9  }
  0x28   :  { %s10326_s14 = scalar_lea.hbm %s10858_s5, 4096 }
  0x29   :  { %p10327_p2 = scmp.ne.s32.totalorder %s10858_s5, %s10326_s14  ;;  %p10330_p3 = scmp.lt.u32.totalorder %s10326_s14, %s10858_s5 }
  0x2b   :  { %p10332_p4 = pnand %p10330_p3, %p10327_p2 }
  0x2d   :  { %10335 = shalt.err (!%p10332_p4)
}
  0x2e   :  { %s10336_s23 = scalar_lea.vmem %s83_s22, 4096  ;;  %p10341_p6 = scmp.lt.s32.totalorder %s83_s22, %s83_s22 }
  0x2f   :  { %p10337_p5 = scmp.ne.s32.totalorder %s83_s22, %s10336_s23  ;;  %p10342_p7 = scmp.lt.s32.totalorder %s10336_s23, %s10336_s23 }
  0x31   :  { %p10343_p8 = por %p10342_p7, %p10341_p6 }
  0x33   :  { %p10344_p9 = pnand %p10343_p8, %p10337_p5 }
  0x35   :  { %10347 = shalt.err (!%p10344_p9)
}
  0x36   :  { %s10499_s3 = smov 64   ;;  %s10500_s20 = smov 4  }
  0x37   :  { %88 = dma.hbm_to_vmem [thread:$0]  %s10858_s5, 4096, %s83_s22, [#allocation12], %s10499_s3, %s10499_s3, %s10500_s20  }
  0x38   :  { %s10501_s26 = smov [#allocation2]   ;;  %s10502_s29 = smov [#allocation7]  }
  0x39   :  { %s25_s27 = sshll.u32 %s10501_s26, 4  ;;  %s46_s30 = sshll.u32 %s10502_s29, 4  ;;  %s26_s27 = int_to_ptr.vmem [resolvable:$true] %s25_s27  ;;  %s47_s30 = int_to_ptr.vmem [resolvable:$true] %s46_s30 }
  0x3a   :  { %s10348_s11 = scalar_lea.hbm %s10853_s0, 128 }
  0x3b   :  { %p10349_p10 = scmp.ne.s32.totalorder %s10853_s0, %s10348_s11  ;;  %p10352_p11 = scmp.lt.u32.totalorder %s10348_s11, %s10853_s0 }
  0x3d   :  { %p10354_p12 = pnand %p10352_p11, %p10349_p10 }
  0x3f   :  { %10357 = shalt.err (!%p10354_p12)
}
  0x40   :  { %s10358_s5 = scalar_lea.vmem %s26_s27, 128  ;;  %p10363_p0 = scmp.lt.s32.totalorder %s26_s27, %s26_s27 }
  0x41   :  { %p10359_p13 = scmp.ne.s32.totalorder %s26_s27, %s10358_s5  ;;  %p10364_p1 = scmp.lt.s32.totalorder %s10358_s5, %s10358_s5 }
  0x43   :  { %p10365_p2 = por %p10364_p1, %p10363_p0 }
  0x45   :  { %p10366_p3 = pnand %p10365_p2, %p10359_p13 }
  0x47   :  { %10369 = shalt.err (!%p10366_p3)
}
  0x48   :  { %28 = dma.hbm_to_vmem [thread:$0]  %s10853_s0, 128, %s26_s27, [#allocation3]  }
  0x49   :  { %s10370_s23 = scalar_lea.hbm %s10855_s2, 32768 }
  0x4a   :  { %p10371_p4 = scmp.ne.s32.totalorder %s10855_s2, %s10370_s23  ;;  %p10374_p5 = scmp.lt.u32.totalorder %s10370_s23, %s10855_s2 }
  0x4c   :  { %p10376_p6 = pnand %p10374_p5, %p10371_p4 }
  0x4e   :  { %10379 = shalt.err (!%p10376_p6)
}
  0x4f   :  { %s10380_s1 = scalar_lea.vmem %s47_s30, 32768  ;;  %p10385_p8 = scmp.lt.s32.totalorder %s47_s30, %s47_s30 }
  0x50   :  { %p10381_p7 = scmp.ne.s32.totalorder %s47_s30, %s10380_s1  ;;  %p10386_p9 = scmp.lt.s32.totalorder %s10380_s1, %s10380_s1 }
  0x52   :  { %p10387_p10 = por %p10386_p9, %p10385_p8 }
  0x54   :  { %p10388_p11 = pnand %p10387_p10, %p10381_p7 }
  0x56   :  { %10391 = shalt.err (!%p10388_p11)
}
  0x57   :  { %52 = dma.hbm_to_vmem [thread:$0]  %s10855_s2, 32768, %s47_s30, [#allocation6], %s10497_s28, %s10497_s28, %s10498_s9  }
  0x58   :  { %s10503_s10 = smov [#allocation10]   ;;  %s10504_s12 = smov [#allocation13]  }
  0x59   :  { %s70_s11 = sshll.u32 %s10503_s10, 4  ;;  %s94_s13 = sshll.u32 %s10504_s12, 4  ;;  %s71_s11 = int_to_ptr.vmem [resolvable:$true] %s70_s11  ;;  %s95_s13 = int_to_ptr.vmem [resolvable:$true] %s94_s13 }
  0x5a   :  { %s10392_s5 = scalar_lea.hbm %s10857_s4, 32768 }
  0x5b   :  { %p10393_p12 = scmp.ne.s32.totalorder %s10857_s4, %s10392_s5  ;;  %p10396_p13 = scmp.lt.u32.totalorder %s10392_s5, %s10857_s4 }
  0x5d   :  { %p10398_p0 = pnand %p10396_p13, %p10393_p12 }
  0x5f   :  { %10401 = shalt.err (!%p10398_p0)
}
  0x60   :  { %s10402_s2 = scalar_lea.vmem %s71_s11, 32768  ;;  %p10407_p2 = scmp.lt.s32.totalorder %s71_s11, %s71_s11 }
  0x61   :  { %p10403_p1 = scmp.ne.s32.totalorder %s71_s11, %s10402_s2  ;;  %p10408_p3 = scmp.lt.s32.totalorder %s10402_s2, %s10402_s2 }
  0x63   :  { %p10409_p4 = por %p10408_p3, %p10407_p2 }
  0x65   :  { %p10410_p5 = pnand %p10409_p4, %p10403_p1 }
  0x67   :  { %10413 = shalt.err (!%p10410_p5)
}
  0x68   :  { %76 = dma.hbm_to_vmem [thread:$0]  %s10857_s4, 32768, %s71_s11, [#allocation9], %s10493_s15, %s10493_s15, %s10494_s16  }
  0x69   :  { %s10414_s24 = scalar_lea.hbm %s10859_s6, 1024 }
  0x6a   :  { %p10415_p6 = scmp.ne.s32.totalorder %s10859_s6, %s10414_s24  ;;  %p10418_p7 = scmp.lt.u32.totalorder %s10414_s24, %s10859_s6 }
  0x6c   :  { %p10420_p8 = pnand %p10418_p7, %p10415_p6 }
  0x6e   :  { %10423 = shalt.err (!%p10420_p8)
}
  0x6f   :  { %s10424_s0 = scalar_lea.vmem %s95_s13, 1024  ;;  %p10429_p10 = scmp.lt.s32.totalorder %s95_s13, %s95_s13 }
  0x70   :  { %p10425_p9 = scmp.ne.s32.totalorder %s95_s13, %s10424_s0  ;;  %p10430_p11 = scmp.lt.s32.totalorder %s10424_s0, %s10424_s0 }
  0x72   :  { %p10431_p12 = por %p10430_p11, %p10429_p10 }
  0x74   :  { %p10432_p13 = pnand %p10431_p12, %p10425_p9 }
  0x76   :  { %10435 = shalt.err (!%p10432_p13)
}
  0x77   :  { %100 = dma.hbm_to_vmem [thread:$0]  %s10859_s6, 1024, %s95_s13, [#allocation12], %s10499_s3, %s10499_s3, %s10500_s20  }
  0x78   :  { %s10505_s16 = smov [#allocation14]   ;;  %s10436_s12 = scalar_lea.hbm %s10860_s7, 1024 }
  0x79   :  { %s107_s27 = sshll.u32 %s10505_s16, 4  ;;  %p10437_p0 = scmp.ne.s32.totalorder %s10860_s7, %s10436_s12  ;;  %s108_s27 = int_to_ptr.vmem [resolvable:$true] %s107_s27 }
  0x7a   :  { %p10440_p1 = scmp.lt.u32.totalorder %s10436_s12, %s10860_s7 }
  0x7c   :  { %p10442_p2 = pnand %p10440_p1, %p10437_p0 }
  0x7e   :  { %10445 = shalt.err (!%p10442_p2)
}
  0x7f   :  { %s10446_s18 = scalar_lea.vmem %s108_s27, 1024  ;;  %p10451_p4 = scmp.lt.s32.totalorder %s108_s27, %s108_s27 }
  0x80   :  { %p10447_p3 = scmp.ne.s32.totalorder %s108_s27, %s10446_s18  ;;  %p10452_p5 = scmp.lt.s32.totalorder %s10446_s18, %s10446_s18 }
  0x82   :  { %p10453_p6 = por %p10452_p5, %p10451_p4 }
  0x84   :  { %p10454_p7 = pnand %p10453_p6, %p10447_p3 }
  0x86   :  { %10457 = shalt.err (!%p10454_p7)
}
  0x87   :  { %110 = dma.hbm_to_vmem [thread:$0]  %s10860_s7, 1024, %s108_s27, [#allocation15]  }
  0x88   :  { %10480 = dma.done.wait [#allocation3], 128  }
  0x89   :  { %10481 = vsyncadd [#allocation3], 4294967168 }
  0x8a   :  { %10482 = dma.done.wait [#allocation6], 36864  }
  0x8b   :  { %10483 = vsyncadd [#allocation6], 4294930432 }
  0x8c   :  { %10484 = dma.done.wait [#allocation9], 98304  }
  0x8d   :  { %10485 = vsyncadd [#allocation9], 4294868992 }
  0x8e   :  { %10486 = dma.done.wait [#allocation12], 5120  }
  0x8f   :  { %10487 = vsyncadd [#allocation12], 4294962176 }
  0x90   :  { %10488 = dma.done.wait [#allocation15], 1024  }
  0x91   :  { %10489 = vsyncadd [#allocation15], 4294966272  ;;  %v10506_v0 = vmov 0   ;;  %v9810_v1 = vld [vmem:[#allocation5 + $0x4] ss:$16 sps:$4 sm:$0xff]   ;;  %v136_v29 = vld [vmem:[#allocation2] sm:$0xff] }
  0x92   :  { %384 = vmatprep.mubr.bf16.mxu0 %v10506_v0  ;;  %425 = vmatprep.mubr.bf16.mxu1 %v10506_v0  ;;  %v9812_v2 = vld [vmem:[#allocation5] ss:$16 sps:$4 sm:$0xff]   ;;  %v9813_v3 = vld [vmem:[#allocation5 + $0x24] ss:$16 sps:$4 sm:$0xff]   ;;  %v9834_v10 = vld [vmem:[#allocation5 + $0xc] ss:$16 sps:$4 sm:$0xff]   ;;  %v137_v34 = vpack.c.bf16 %v136_v29, %v136_v29 }
  0x93   :  { %352 = vmatprep.subr.bf16.mxu0 %v9810_v1  ;;  %v9815_v4 = vld [vmem:[#allocation5 + $0x20] ss:$16 sps:$4 sm:$0xff]   ;;  %v9816_v5 = vld [vmem:[#allocation5 + $0x44] ss:$16 sps:$4 sm:$0xff]   ;;  %v9836_v11 = vld [vmem:[#allocation5 + $0x8] ss:$16 sps:$4 sm:$0xff]   ;;  %393 = vmatprep.subr.bf16.mxu1 %v9834_v10 }
  0x94   :  { %353 = vmatpush1.bf16.msra.mxu0 %v9812_v2  ;;  %v9818_v6 = vld [vmem:[#allocation5 + $0x40] ss:$16 sps:$4 sm:$0xff]   ;;  %v9819_v7 = vld [vmem:[#allocation5 + $0x64] ss:$16 sps:$4 sm:$0xff]   ;;  %v9837_v12 = vld [vmem:[#allocation5 + $0x2c] ss:$16 sps:$4 sm:$0xff]   ;;  %394 = vmatpush1.bf16.msra.mxu1 %v9836_v11 }
  0x95   :  { %354 = vmatprep.subr.bf16.mxu0 %v9813_v3  ;;  %v9821_v8 = vld [vmem:[#allocation5 + $0x60] ss:$16 sps:$4 sm:$0xff]   ;;  %v9822_v9 = vld [vmem:[#allocation5 + $0x84] ss:$16 sps:$4 sm:$0xff]   ;;  %v9839_v14 = vld [vmem:[#allocation5 + $0x28] ss:$16 sps:$4 sm:$0xff]   ;;  %395 = vmatprep.subr.bf16.mxu1 %v9837_v12 }
  0x96   :  { %v9824_v13 = vld [vmem:[#allocation5 + $0x80] ss:$16 sps:$4 sm:$0xff]   ;;  %v9840_v15 = vld [vmem:[#allocation5 + $0x4c] ss:$16 sps:$4 sm:$0xff]   ;;  %v9825_v16 = vld [vmem:[#allocation5 + $0xa4] ss:$16 sps:$4 sm:$0xff]  }
  0x97   :  { %v9827_v17 = vld [vmem:[#allocation5 + $0xa0] ss:$16 sps:$4 sm:$0xff]   ;;  %v9842_v18 = vld [vmem:[#allocation5 + $0x48] ss:$16 sps:$4 sm:$0xff]   ;;  %v9843_v19 = vld [vmem:[#allocation5 + $0x6c] ss:$16 sps:$4 sm:$0xff]  }
  0x98   :  { %355 = vmatpush1.bf16.msra.mxu0 %v9815_v4  ;;  %396 = vmatpush1.bf16.msra.mxu1 %v9839_v14  ;;  %v9828_v20 = vld [vmem:[#allocation5 + $0xc4] ss:$16 sps:$4 sm:$0xff]   ;;  %v9845_v21 = vld [vmem:[#allocation5 + $0x68] ss:$16 sps:$4 sm:$0xff]   ;;  %v9830_v22 = vld [vmem:[#allocation5 + $0xc0] ss:$16 sps:$4 sm:$0xff]  }
  0x99   :  { %356 = vmatprep.subr.bf16.mxu0 %v9816_v5  ;;  %397 = vmatprep.subr.bf16.mxu1 %v9840_v15  ;;  %v9846_v23 = vld [vmem:[#allocation5 + $0x8c] ss:$16 sps:$4 sm:$0xff]   ;;  %v9831_v24 = vld [vmem:[#allocation5 + $0xe4] ss:$16 sps:$4 sm:$0xff]   ;;  %v9848_v27 = vld [vmem:[#allocation5 + $0x88] ss:$16 sps:$4 sm:$0xff]  }
  0x9a   :  { %v442_v25 = vld [vmem:[#allocation7] sm:$0xff]  ;;  %v9849_v30 = vld [vmem:[#allocation5 + $0xac] ss:$16 sps:$4 sm:$0xff]   ;;  %v9851_v35 = vld [vmem:[#allocation5 + $0xa8] ss:$16 sps:$4 sm:$0xff]   ;;  %vm10508_vm0 = vmmov 0  }
  0x9b   :  { %v446_v26 = vld [vmem:[#allocation7 + $0x20] sm:$0xff]  ;;  %v9852_v36 = vld [vmem:[#allocation5 + $0xcc] ss:$16 sps:$4 sm:$0xff]   ;;  %v9854_v41 = vld [vmem:[#allocation5 + $0xc8] ss:$16 sps:$4 sm:$0xff]   ;;  %s10509_s7 = smov [#allocation16]  }
  0x9c   :  { %357 = vmatpush1.bf16.msra.mxu0 %v9818_v6  ;;  %398 = vmatpush1.bf16.msra.mxu1 %v9842_v18  ;;  %v9833_v28 = vld [vmem:[#allocation5 + $0xe0] ss:$16 sps:$4 sm:$0xff]   ;;  %v8548_v31 = vcombine.high %v442_v25, %v446_v26  ;;  %v8547_v37 = vcombine.low %v442_v25, %v446_v26  ;;  %v9855_v42 = vld [vmem:[#allocation5 + $0xec] ss:$16 sps:$4 sm:$0xff]   ;;  %v9857_v49 = vld [vmem:[#allocation5 + $0xe8] ss:$16 sps:$4 sm:$0xff]  }
  0x9d   :  { %358 = vmatprep.subr.bf16.mxu0 %v9819_v7  ;;  %399 = vmatprep.subr.bf16.mxu1 %v9843_v19  ;;  %v450_v32 = vld [vmem:[#allocation7 + $0x40] sm:$0xff]  ;;  %v443_v44 = vld [vmem:[#allocation7 + $0x8] sm:$0xff]  ;;  %s8502_s20 = sshll.u32 %s10509_s7, 4  ;;  %s8503_s20 = int_to_ptr.vmem [resolvable:$true] %s8502_s20 }
  0x9e   :  { %v454_v33 = vld [vmem:[#allocation7 + $0x60] sm:$0xff]  ;;  %v447_v45 = vld [vmem:[#allocation7 + $0x28] sm:$0xff]  ;;  %s10458_s13 = scalar_lea.vmem %s8503_s20, 128  ;;  %p10463_p9 = scmp.lt.s32.totalorder %s8503_s20, %s8503_s20 }
  0x9f   :  { %v8556_v38 = vcombine.high %v450_v32, %v454_v33  ;;  %v458_v39 = vld [vmem:[#allocation7 + $0x80] sm:$0xff]  ;;  %v8555_v43 = vcombine.low %v450_v32, %v454_v33  ;;  %v8550_v50 = vcombine.high %v443_v44, %v447_v45  ;;  %v451_v51 = vld [vmem:[#allocation7 + $0x48] sm:$0xff]  ;;  %v8549_v57 = vcombine.low %v443_v44, %v447_v45  ;;  %p10459_p8 = scmp.ne.s32.totalorder %s8503_s20, %s10458_s13  ;;  %p10464_p10 = scmp.lt.s32.totalorder %s10458_s13, %s10458_s13 }
  0xa0   :  { %359 = vmatpush1.bf16.msra.mxu0 %v9821_v8  ;;  %400 = vmatpush1.bf16.msra.mxu1 %v9845_v21  ;;  %v462_v40 = vld [vmem:[#allocation7 + $0xa0] sm:$0xff]  ;;  %v455_v52 = vld [vmem:[#allocation7 + $0x68] sm:$0xff] }
  0xa1   :  { %360 = vmatprep.subr.bf16.mxu0 %v9822_v9  ;;  %401 = vmatprep.subr.bf16.mxu1 %v9846_v23  ;;  %v8564_v46 = vcombine.high %v458_v39, %v462_v40  ;;  %v466_v47 = vld [vmem:[#allocation7 + $0xc0] sm:$0xff]  ;;  %v8563_v53 = vcombine.low %v458_v39, %v462_v40  ;;  %v459_v58 = vld [vmem:[#allocation7 + $0x88] sm:$0xff]  ;;  %v8558_v60 = vcombine.high %v451_v51, %v455_v52  ;;  %p10465_p11 = por %p10464_p10, %p10463_p9 }
  0xa2   :  { %v470_v48 = vld [vmem:[#allocation7 + $0xe0] sm:$0xff]  ;;  %v463_v59 = vld [vmem:[#allocation7 + $0xa8] sm:$0xff]  ;;  %v8557_v1 = vcombine.low %v451_v51, %v455_v52 }
  0xa3   :  { %v8572_v54 = vcombine.high %v466_v47, %v470_v48  ;;  %v474_v55 = vld [vmem:[#allocation7 + $0x100] sm:$0xff]  ;;  %v8571_v61 = vcombine.low %v466_v47, %v470_v48  ;;  %v467_v2 = vld [vmem:[#allocation7 + $0xc8] sm:$0xff]  ;;  %v8566_v4 = vcombine.high %v459_v58, %v463_v59  ;;  %v8565_v9 = vcombine.low %v459_v58, %v463_v59  ;;  %p10466_p12 = pnand %p10465_p11, %p10459_p8 }
  0xa4   :  { %361 = vmatpush1.bf16.msra.mxu0 %v9824_v13  ;;  %402 = vmatpush1.bf16.msra.mxu1 %v9848_v27  ;;  %v478_v56 = vld [vmem:[#allocation7 + $0x120] sm:$0xff]  ;;  %v471_v3 = vld [vmem:[#allocation7 + $0xe8] sm:$0xff] }
  0xa5   :  { %362 = vmatprep.subr.bf16.mxu0 %v9825_v16  ;;  %403 = vmatprep.subr.bf16.mxu1 %v9849_v30  ;;  %v482_v62 = vld [vmem:[#allocation7 + $0x140] sm:$0xff]  ;;  %v8580_v0 = vcombine.high %v474_v55, %v478_v56  ;;  %v8579_v5 = vcombine.low %v474_v55, %v478_v56  ;;  %v475_v10 = vld [vmem:[#allocation7 + $0x108] sm:$0xff]  ;;  %v8574_v12 = vcombine.high %v467_v2, %v471_v3 }
  0xa6   :  { %v486_v63 = vld [vmem:[#allocation7 + $0x160] sm:$0xff]  ;;  %v479_v11 = vld [vmem:[#allocation7 + $0x128] sm:$0xff] }
  0xa7   :  { %v490_v6 = vld [vmem:[#allocation7 + $0x180] sm:$0xff]  ;;  %v8588_v8 = vcombine.high %v482_v62, %v486_v63  ;;  %v8587_v13 = vcombine.low %v482_v62, %v486_v63  ;;  %v483_v18 = vld [vmem:[#allocation7 + $0x148] sm:$0xff]  ;;  %v8581_v25 = vcombine.low %v475_v10, %v479_v11 }
  0xa8   :  { %363 = vmatpush1.bf16.msra.mxu0 %v9827_v17  ;;  %404 = vmatpush1.bf16.msra.mxu1 %v9851_v35  ;;  %v494_v7 = vld [vmem:[#allocation7 + $0x1a0] sm:$0xff]  ;;  %v8573_v17 = vcombine.low %v467_v2, %v471_v3  ;;  %v487_v19 = vld [vmem:[#allocation7 + $0x168] sm:$0xff] }
  0xa9   :  { %364 = vmatprep.subr.bf16.mxu0 %v9828_v20  ;;  %405 = vmatprep.subr.bf16.mxu1 %v9852_v36  ;;  %v498_v14 = vld [vmem:[#allocation7 + $0x1c0] sm:$0xff]  ;;  %v8596_v16 = vcombine.high %v490_v6, %v494_v7  ;;  %v8582_v20 = vcombine.high %v475_v10, %v479_v11  ;;  %v8595_v21 = vcombine.low %v490_v6, %v494_v7  ;;  %v491_v26 = vld [vmem:[#allocation7 + $0x188] sm:$0xff] }
  0xaa   :  { %v502_v15 = vld [vmem:[#allocation7 + $0x1e0] sm:$0xff]  ;;  %v495_v27 = vld [vmem:[#allocation7 + $0x1a8] sm:$0xff]  ;;  %v8589_v33 = vcombine.low %v483_v18, %v487_v19 }
  0xab   :  { %v510_v23 = vld [vmem:[#allocation7 + $0x220] sm:$0xff]  ;;  %v8603_v29 = vcombine.low %v498_v14, %v502_v15  ;;  %v503_v35 = vld [vmem:[#allocation7 + $0x1e8] sm:$0xff]  ;;  %v8598_v36 = vcombine.high %v491_v26, %v495_v27 }
  0xac   :  { %365 = vmatpush1.bf16.msra.mxu0 %v9830_v22  ;;  %406 = vmatpush1.bf16.msra.mxu1 %v9854_v41  ;;  %v506_v22 = vld [vmem:[#allocation7 + $0x200] sm:$0xff]  ;;  %v8597_v41 = vcombine.low %v491_v26, %v495_v27  ;;  %v519_v51 = vld [vmem:[#allocation7 + $0x268] sm:$0xff] }
  0xad   :  { %366 = vmatprep.subr.bf16.mxu0 %v9831_v24  ;;  %407 = vmatprep.subr.bf16.mxu1 %v9855_v42  ;;  %v8604_v24 = vcombine.high %v498_v14, %v502_v15  ;;  %v514_v30 = vld [vmem:[#allocation7 + $0x240] sm:$0xff]  ;;  %v8612_v32 = vcombine.high %v506_v22, %v510_v23  ;;  %v507_v42 = vld [vmem:[#allocation7 + $0x208] sm:$0xff] }
  0xae   :  { %v526_v39 = vld [vmem:[#allocation7 + $0x2a0] sm:$0xff]  ;;  %v523_v58 = vld [vmem:[#allocation7 + $0x288] sm:$0xff] }
  0xaf   :  { %v534_v47 = vld [vmem:[#allocation7 + $0x2e0] sm:$0xff]  ;;  %v527_v59 = vld [vmem:[#allocation7 + $0x2a8] sm:$0xff] }
  0xb0   :  { %367 = vmatpush1.bf16.msra.mxu0 %v9833_v28  ;;  %408 = vmatpush1.bf16.msra.mxu1 %v9857_v49  ;;  %v8590_v28 = vcombine.high %v483_v18, %v487_v19  ;;  %v542_v55 = vld [vmem:[#allocation7 + $0x320] sm:$0xff]  ;;  %v531_v2 = vld [vmem:[#allocation7 + $0x2c8] sm:$0xff]  ;;  %v8629_v7 = vcombine.low %v523_v58, %v527_v59 }
  0xb1   :  { %2023 = vmatprep.subr.bf16.mxu0 %v8548_v31  ;;  %2105 = vmatprep.subr.bf16.mxu1 %v8550_v50  ;;  %v518_v31 = vld [vmem:[#allocation7 + $0x260] sm:$0xff]  ;;  %v515_v50 = vld [vmem:[#allocation7 + $0x248] sm:$0xff] }
  0xb2   :  { %v8620_v40 = vcombine.high %v514_v30, %v518_v31  ;;  %v8619_v45 = vcombine.low %v514_v30, %v518_v31  ;;  %v546_v62 = vld [vmem:[#allocation7 + $0x340] sm:$0xff]  ;;  %v535_v3 = vld [vmem:[#allocation7 + $0x2e8] sm:$0xff] }
  0xb3   :  { %385 = vmatmul.mubr.bf16.vlgmr.msra.gmra.mrb[0].mxu0 %v137_v34  ;;  %426 = vmatmul.mubr.bf16.vlgmr.msra.gmra.mrb[0].mxu1 %v137_v34  ;;  %v499_v34 = vld [vmem:[#allocation7 + $0x1c8] sm:$0xff]  ;;  %v550_v63 = vld [vmem:[#allocation7 + $0x360] sm:$0xff]  ;;  %v8638_v10 = vcombine.high %v531_v2, %v535_v3 }
  0xb4   :  { %2024 = vmatpush1.bf16.msra.mxu0 %v8547_v37  ;;  %2106 = vmatpush1.bf16.msra.mxu1 %v8549_v57  ;;  %v8611_v37 = vcombine.low %v506_v22, %v510_v23  ;;  %v8606_v44 = vcombine.high %v499_v34, %v503_v35  ;;  %v8605_v49 = vcombine.low %v499_v34, %v503_v35  ;;  %v551_v14 = vld [vmem:[#allocation7 + $0x368] sm:$0xff]  ;;  %v554_v19 = vld [vmem:[#allocation7 + $0x380] sm:$0xff] }
  0xb5   :  { %2025 = vmatprep.subr.bf16.mxu0 %v8556_v38  ;;  %2107 = vmatprep.subr.bf16.mxu1 %v8558_v60  ;;  %v522_v38 = vld [vmem:[#allocation7 + $0x280] sm:$0xff]  ;;  %v8622_v60 = vcombine.high %v515_v50, %v519_v51  ;;  %v8652_v6 = vcombine.high %v546_v62, %v550_v63  ;;  %v8651_v11 = vcombine.low %v546_v62, %v550_v63  ;;  %v559_v23 = vld [vmem:[#allocation7 + $0x3a8] sm:$0xff] }
  0xb6   :  { %v8628_v48 = vcombine.high %v522_v38, %v526_v39  ;;  %v562_v27 = vld [vmem:[#allocation7 + $0x3c0] sm:$0xff]  ;;  %v567_v31 = vld [vmem:[#allocation7 + $0x3e8] sm:$0xff] }
  0xb7   :  { %v570_v35 = vld [vmem:[#allocation7 + $0x400] sm:$0xff] }
  0xb8   :  { %2026 = vmatpush1.bf16.msra.mxu0 %v8555_v43  ;;  %2108 = vmatpush1.bf16.msra.mxu1 %v8557_v1  ;;  %v511_v43 = vld [vmem:[#allocation7 + $0x228] sm:$0xff]  ;;  %v8621_v1 = vcombine.low %v515_v50, %v519_v51 }
  0xb9   :  { %2027 = vmatprep.subr.bf16.mxu0 %v8564_v46  ;;  %2109 = vmatprep.subr.bf16.mxu1 %v8566_v4  ;;  %v530_v46 = vld [vmem:[#allocation7 + $0x2c0] sm:$0xff]  ;;  %v8614_v52 = vcombine.high %v507_v42, %v511_v43  ;;  %v8613_v57 = vcombine.low %v507_v42, %v511_v43  ;;  %v8630_v4 = vcombine.high %v523_v58, %v527_v59  ;;  %v172_v43 = vlaneseq }
  0xba   :  { %v8636_v56 = vcombine.high %v530_v46, %v534_v47  ;;  %v582_v59 = vld [vmem:[#allocation7 + $0x460] sm:$0xff] }
  0xbc   :  { %2028 = vmatpush1.bf16.msra.mxu0 %v8563_v53  ;;  %2110 = vmatpush1.bf16.msra.mxu1 %v8565_v9  ;;  %v8627_v53 = vcombine.low %v522_v38, %v526_v39  ;;  %v543_v9 = vld [vmem:[#allocation7 + $0x328] sm:$0xff] }
  0xbd   :  { %2029 = vmatprep.subr.bf16.mxu0 %v8572_v54  ;;  %2111 = vmatprep.subr.bf16.mxu1 %v8574_v12  ;;  %v538_v54 = vld [vmem:[#allocation7 + $0x300] sm:$0xff]  ;;  %v8637_v12 = vcombine.low %v531_v2, %v535_v3  ;;  %v575_v39 = vld [vmem:[#allocation7 + $0x428] sm:$0xff] }
  0xbe   :  { %v586_v3 = vld [vmem:[#allocation7 + $0x480] sm:$0xff] }
  0xc0   :  { %2030 = vmatpush1.bf16.msra.mxu0 %v8571_v61  ;;  %2112 = vmatpush1.bf16.msra.mxu1 %v8573_v17  ;;  %v8635_v61 = vcombine.low %v530_v46, %v534_v47  ;;  %v10674_v46 = vld [vmem:[#allocation14] ss:$8 sm:$0xf] }
  0xc1   :  { %2031 = vmatprep.subr.bf16.mxu0 %v8580_v0  ;;  %2113 = vmatprep.subr.bf16.mxu1 %v8582_v20  ;;  %v8644_v0 = vcombine.high %v538_v54, %v542_v55  ;;  %v558_v20 = vld [vmem:[#allocation7 + $0x3a0] sm:$0xff] }
  0xc2   :  { %v8660_v22 = vcombine.high %v554_v19, %v558_v20 }
  0xc4   :  { %2032 = vmatpush1.bf16.msra.mxu0 %v8579_v5  ;;  %2114 = vmatpush1.bf16.msra.mxu1 %v8581_v25  ;;  %v8643_v5 = vcombine.low %v538_v54, %v542_v55 }
  0xc5   :  { %2033 = vmatprep.subr.bf16.mxu0 %v8588_v8  ;;  %2115 = vmatprep.subr.bf16.mxu1 %v8590_v28  ;;  %v539_v8 = vld [vmem:[#allocation7 + $0x308] sm:$0xff]  ;;  %v566_v28 = vld [vmem:[#allocation7 + $0x3e0] sm:$0xff] }
  0xc6   :  { %v8646_v15 = vcombine.high %v539_v8, %v543_v9  ;;  %v8668_v30 = vcombine.high %v562_v27, %v566_v28 }
  0xc8   :  { %2034 = vmatpush1.bf16.msra.mxu0 %v8587_v13  ;;  %2116 = vmatpush1.bf16.msra.mxu1 %v8589_v33  ;;  %v547_v13 = vld [vmem:[#allocation7 + $0x348] sm:$0xff] }
  0xc9   :  { %2035 = vmatprep.subr.bf16.mxu0 %v8596_v16  ;;  %2117 = vmatprep.subr.bf16.mxu1 %v8598_v36  ;;  %v8645_v16 = vcombine.low %v539_v8, %v543_v9  ;;  %v8654_v17 = vcombine.high %v547_v13, %v551_v14  ;;  %v8653_v18 = vcombine.low %v547_v13, %v551_v14  ;;  %v574_v36 = vld [vmem:[#allocation7 + $0x420] sm:$0xff] }
  0xca   :  { %v8676_v38 = vcombine.high %v570_v35, %v574_v36  ;;  %v598_v14 = vld [vmem:[#allocation7 + $0x4e0] sm:$0xff] }
  0xcc   :  { %2036 = vmatpush1.bf16.msra.mxu0 %v8595_v21  ;;  %2118 = vmatpush1.bf16.msra.mxu1 %v8597_v41  ;;  %v555_v21 = vld [vmem:[#allocation7 + $0x388] sm:$0xff] }
  0xcd   :  { %2037 = vmatprep.subr.bf16.mxu0 %v8604_v24  ;;  %2119 = vmatprep.subr.bf16.mxu1 %v8606_v44  ;;  %v8659_v24 = vcombine.low %v554_v19, %v558_v20  ;;  %v8661_v25 = vcombine.low %v555_v21, %v559_v23  ;;  %v8662_v26 = vcombine.high %v555_v21, %v559_v23  ;;  %v10669_v44 = vshrl.u32 %v172_v43, 7  ;;  %v618_v43 = vld [vmem:[#allocation7 + $0x580] sm:$0xff] }
  0xcf   :  { %v10677_v47 = vsub.s32 1, %v10669_v44  ;;  %v10684_v62 = vsub.s32 3, %v10669_v44 }
  0xd0   :  { %2038 = vmatpush1.bf16.msra.mxu0 %v8603_v29  ;;  %2120 = vmatpush1.bf16.msra.mxu1 %v8605_v49  ;;  %v563_v29 = vld [vmem:[#allocation7 + $0x3c8] sm:$0xff] }
  0xd1   :  { %2039 = vmatprep.subr.bf16.mxu0 %v8612_v32  ;;  %2121 = vmatprep.subr.bf16.mxu1 %v8614_v52  ;;  %v8667_v32 = vcombine.low %v562_v27, %v566_v28  ;;  %v8669_v33 = vcombine.low %v563_v29, %v567_v31  ;;  %v8670_v34 = vcombine.high %v563_v29, %v567_v31  ;;  %v606_v27 = vld [vmem:[#allocation7 + $0x520] sm:$0xff]  ;;  %v603_v28 = vld [vmem:[#allocation7 + $0x508] sm:$0xff] }
  0xd2   :  { %v179_v49 = vrot.slane %v10674_v46, %v10677_v47  ;;  %v607_v29 = vld [vmem:[#allocation7 + $0x528] sm:$0xff] }
  0xd4   :  { %2040 = vmatpush1.bf16.msra.mxu0 %v8611_v37  ;;  %2122 = vmatpush1.bf16.msra.mxu1 %v8613_v57  ;;  %v571_v37 = vld [vmem:[#allocation7 + $0x408] sm:$0xff]  ;;  %v578_v57 = vld [vmem:[#allocation7 + $0x440] sm:$0xff] }
  0xd5   :  { %2041 = vmatprep.subr.bf16.mxu0 %v8620_v40  ;;  %2123 = vmatprep.subr.bf16.mxu1 %v8622_v60  ;;  %v8675_v40 = vcombine.low %v570_v35, %v574_v36  ;;  %v8677_v41 = vcombine.low %v571_v37, %v575_v39  ;;  %v8678_v42 = vcombine.high %v571_v37, %v575_v39  ;;  %v579_v60 = vld [vmem:[#allocation7 + $0x448] sm:$0xff]  ;;  %v610_v35 = vld [vmem:[#allocation7 + $0x540] sm:$0xff] }
  0xd6   :  { %v8683_v8 = vcombine.low %v578_v57, %v582_v59  ;;  %v614_v36 = vld [vmem:[#allocation7 + $0x560] sm:$0xff]  ;;  %v611_v37 = vld [vmem:[#allocation7 + $0x548] sm:$0xff] }
  0xd8   :  { %2042 = vmatpush1.bf16.msra.mxu0 %v8619_v45  ;;  %2124 = vmatpush1.bf16.msra.mxu1 %v8621_v1  ;;  %v10672_v45 = vsub.s32 0, %v10669_v44  ;;  %v8684_v1 = vcombine.high %v578_v57, %v582_v59  ;;  %v627_v57 = vld [vmem:[#allocation7 + $0x5c8] sm:$0xff] }
  0xd9   :  { %2043 = vmatprep.subr.bf16.mxu0 %v8628_v48  ;;  %2125 = vmatprep.subr.bf16.mxu1 %v8630_v4  ;;  %v590_v4 = vld [vmem:[#allocation7 + $0x4a0] sm:$0xff] }
  0xda   :  { %v175_v48 = vrot.slane %v10674_v46, %v10672_v45  ;;  %v8691_v20 = vcombine.low %v586_v3, %v590_v4 }
  0xdc   :  { %2044 = vmatpush1.bf16.msra.mxu0 %v8627_v53  ;;  %2126 = vmatpush1.bf16.msra.mxu1 %v8629_v7  ;;  %v187_v7 = vrot.slane %v10674_v46, %v10684_v62 }
  0xdd   :  { %2045 = vmatprep.subr.bf16.mxu0 %v8636_v56  ;;  %2127 = vmatprep.subr.bf16.mxu1 %v8638_v10  ;;  %v8692_v10 = vcombine.high %v586_v3, %v590_v4  ;;  %v638_v3 = vld [vmem:[#allocation7 + $0x620] sm:$0xff]  ;;  %v635_v4 = vld [vmem:[#allocation7 + $0x608] sm:$0xff] }
  0xe0   :  { %2046 = vmatpush1.bf16.msra.mxu0 %v8635_v61  ;;  %2128 = vmatpush1.bf16.msra.mxu1 %v8637_v12  ;;  %v583_v61 = vld [vmem:[#allocation7 + $0x468] sm:$0xff]  ;;  %v594_v12 = vld [vmem:[#allocation7 + $0x4c0] sm:$0xff] }
  0xe1   :  { %2047 = vmatprep.subr.bf16.mxu0 %v8644_v0  ;;  %2129 = vmatprep.subr.bf16.mxu1 %v8646_v15  ;;  %v8686_v2 = vcombine.high %v579_v60, %v583_v61  ;;  %v8685_v9 = vcombine.low %v579_v60, %v583_v61  ;;  %v595_v15 = vld [vmem:[#allocation7 + $0x4c8] sm:$0xff]  ;;  %v8700_v23 = vcombine.high %v594_v12, %v598_v14 }
  0xe2   :  { %v8699_v31 = vcombine.low %v594_v12, %v598_v14  ;;  %v643_v12 = vld [vmem:[#allocation7 + $0x648] sm:$0xff] }
  0xe3   :  { %v647_v14 = vld [vmem:[#allocation7 + $0x668] sm:$0xff] }
  0xe4   :  { %2048 = vmatpush1.bf16.msra.mxu0 %v8643_v5  ;;  %2130 = vmatpush1.bf16.msra.mxu1 %v8645_v16  ;;  %v587_v5 = vld [vmem:[#allocation7 + $0x488] sm:$0xff] }
  0xe5   :  { %2049 = vmatprep.subr.bf16.mxu0 %v8652_v6  ;;  %2131 = vmatprep.subr.bf16.mxu1 %v8654_v17  ;;  %v591_v6 = vld [vmem:[#allocation7 + $0x4a8] sm:$0xff] }
  0xe6   :  { %v599_v16 = vld [vmem:[#allocation7 + $0x4e8] sm:$0xff]  ;;  %v8693_v21 = vcombine.low %v587_v5, %v591_v6 }
  0xe8   :  { %2050 = vmatpush1.bf16.msra.mxu0 %v8651_v11  ;;  %2132 = vmatpush1.bf16.msra.mxu1 %v8653_v18  ;;  %v8694_v11 = vcombine.high %v587_v5, %v591_v6  ;;  %v639_v5 = vld [vmem:[#allocation7 + $0x628] sm:$0xff] }
  0xe9   :  { %2051 = vmatprep.subr.bf16.mxu0 %v8660_v22  ;;  %2133 = vmatprep.subr.bf16.mxu1 %v8662_v26 }
  0xec   :  { %2052 = vmatpush1.bf16.msra.mxu0 %v8659_v24  ;;  %2134 = vmatpush1.bf16.msra.mxu1 %v8661_v25  ;;  %v8702_v24 = vcombine.high %v595_v15, %v599_v16  ;;  %v602_v25 = vld [vmem:[#allocation7 + $0x500] sm:$0xff] }
  0xed   :  { %2053 = vmatprep.subr.bf16.mxu0 %v8668_v30  ;;  %2135 = vmatprep.subr.bf16.mxu1 %v8670_v34  ;;  %v8710_v34 = vcombine.high %v603_v28, %v607_v29  ;;  %v8707_v39 = vcombine.low %v602_v25, %v606_v27 }
  0xf0   :  { %2054 = vmatpush1.bf16.msra.mxu0 %v8667_v32  ;;  %2136 = vmatpush1.bf16.msra.mxu1 %v8669_v33  ;;  %v8701_v32 = vcombine.low %v595_v15, %v599_v16  ;;  %v8708_v33 = vcombine.high %v602_v25, %v606_v27  ;;  %v8741_v16 = vcombine.low %v635_v4, %v639_v5  ;;  %v658_v27 = vld [vmem:[#allocation7 + $0x6c0] sm:$0xff] }
  0xf1   :  { %2064 = vmatprep.subr.bf16.mxu0 %v8676_v38  ;;  %2146 = vmatprep.subr.bf16.mxu1 %v8678_v42  ;;  %v615_v38 = vld [vmem:[#allocation7 + $0x568] sm:$0xff] }
  0xf2   :  { %v8718_v42 = vcombine.high %v611_v37, %v615_v38 }
 0x186   :  { %v386_v50 = vpop.f32.mrb[0].mxu0  ;;  %v10696_v13 = vpop.f32.mrb[0].mxu1 }
 0x187   :  { %v387_v51 = vadd.f32 %v386_v50, %v175_v48  ;;  %v388_v52 = vpop.f32.mrb[1].mxu0  ;;  %v429_v17 = vpop.f32.mrb[1].mxu1  ;;  %v622_v48 = vld [vmem:[#allocation7 + $0x5a0] sm:$0xff]  ;;  %v623_v50 = vld [vmem:[#allocation7 + $0x5a8] sm:$0xff] }
 0x188   :  { %v389_v53 = vadd.f32 %v388_v52, %v179_v49  ;;  %v390_v54 = vpop.f32.mrb[2].mxu0  ;;  %v430_v18 = vadd.f32 %v429_v17, %v187_v7  ;;  %v431_v19 = vpop.f32.mrb[2].mxu1  ;;  %v619_v49 = vld [vmem:[#allocation7 + $0x588] sm:$0xff]  ;;  %v8717_v52 = vcombine.low %v611_v37, %v615_v38  ;;  %v8723_v59 = vcombine.low %v618_v43, %v622_v48  ;;  %v670_v37 = vld [vmem:[#allocation7 + $0x720] sm:$0xff] }
 0x189   :  { %v434_v55 = vmax.f32 %v387_v51, 0.0  ;;  %v391_v56 = vpop.f32.mrb[3].mxu0  ;;  %v432_v22 = vpop.f32.mrb[3].mxu1  ;;  %v8715_v51 = vcombine.low %v610_v35, %v614_v36  ;;  %v8726_v54 = vcombine.high %v619_v49, %v623_v50  ;;  %v8725_v60 = vcombine.low %v619_v49, %v623_v50  ;;  %v650_v19 = vld [vmem:[#allocation7 + $0x680] sm:$0xff]  ;;  %v667_v38 = vld [vmem:[#allocation7 + $0x708] sm:$0xff] }
 0x18a   :  { %v435_v58 = vmax.f32 %v389_v53, 0.0  ;;  %v437_v26 = vmax.f32 %v430_v18, 0.0  ;;  %v8724_v53 = vcombine.high %v618_v43, %v622_v48  ;;  %v630_v56 = vld [vmem:[#allocation7 + $0x5e0] sm:$0xff]  ;;  %v8750_v18 = vcombine.high %v643_v12, %v647_v14  ;;  %v655_v22 = vld [vmem:[#allocation7 + $0x6a8] sm:$0xff] }
 0x18b   :  { %v10688_v0 = vpack.c.bf16 %v434_v55, %v434_v55  ;;  %v626_v55 = vld [vmem:[#allocation7 + $0x5c0] sm:$0xff]  ;;  %v675_v50 = vld [vmem:[#allocation7 + $0x748] sm:$0xff] }
 0x18c   :  { %v10686_v63 = vpack.c.bf16 %v435_v58, %v435_v58  ;;  %v10698_v30 = vpack.c.bf16 %v437_v26, %v437_v26  ;;  %v631_v58 = vld [vmem:[#allocation7 + $0x5e8] sm:$0xff]  ;;  %v8732_v61 = vcombine.high %v626_v55, %v630_v56  ;;  %v8731_v6 = vcombine.low %v626_v55, %v630_v56  ;;  %v674_v48 = vld [vmem:[#allocation7 + $0x740] sm:$0xff] }
 0x18d   :  { %v8733_v7 = vcombine.low %v627_v57, %v631_v58  ;;  %v678_v49 = vld [vmem:[#allocation7 + $0x760] sm:$0xff] }
 0x18e   :  { %2055 = vmatprep.mubr.bf16.mxu0 %v10686_v63  ;;  %2137 = vmatprep.mubr.bf16.mxu1 %v10686_v63  ;;  %v8780_v55 = vcombine.high %v674_v48, %v678_v49 }
 0x18f   :  { %2056 = vmatmul.mubr.bf16.vlgmr.msra.gmra.mrb[4].mxu0 %v10688_v0  ;;  %2138 = vmatmul.mubr.bf16.vlgmr.msra.gmra.mrb[4].mxu1 %v10688_v0 }
 0x190   :  { %2065 = vmatpush1.bf16.msra.mxu0 %v8675_v40  ;;  %2147 = vmatpush1.bf16.msra.mxu1 %v8677_v41  ;;  %v8709_v40 = vcombine.low %v603_v28, %v607_v29  ;;  %v8716_v41 = vcombine.high %v610_v35, %v614_v36  ;;  %v662_v28 = vld [vmem:[#allocation7 + $0x6e0] sm:$0xff]  ;;  %v659_v29 = vld [vmem:[#allocation7 + $0x6c8] sm:$0xff] }
 0x191   :  { %2066 = vmatprep.subr.bf16.mxu0 %v8684_v1  ;;  %2148 = vmatprep.subr.bf16.mxu1 %v8686_v2  ;;  %v8734_v1 = vcombine.high %v627_v57, %v631_v58  ;;  %v634_v2 = vld [vmem:[#allocation7 + $0x600] sm:$0xff] }
 0x192   :  { %2096 = vmatprep.mubr.bf16.mxu0 %v10698_v30  ;;  %2178 = vmatprep.mubr.bf16.mxu1 %v10698_v30  ;;  %v8739_v15 = vcombine.low %v634_v2, %v638_v3  ;;  %v666_v36 = vld [vmem:[#allocation7 + $0x700] sm:$0xff] }
 0x193   :  { %v682_v57 = vld [vmem:[#allocation7 + $0x780] sm:$0xff] }
 0x194   :  { %2067 = vmatpush1.bf16.msra.mxu0 %v8683_v8  ;;  %2149 = vmatpush1.bf16.msra.mxu1 %v8685_v9  ;;  %v8740_v8 = vcombine.high %v634_v2, %v638_v3  ;;  %v8742_v9 = vcombine.high %v635_v4, %v639_v5  ;;  %v686_v58 = vld [vmem:[#allocation7 + $0x7a0] sm:$0xff] }
 0x195   :  { %2068 = vmatprep.subr.bf16.mxu0 %v8692_v10  ;;  %2150 = vmatprep.subr.bf16.mxu1 %v8694_v11  ;;  %v642_v10 = vld [vmem:[#allocation7 + $0x640] sm:$0xff]  ;;  %v8788_v3 = vcombine.high %v682_v57, %v686_v58 }
 0x196   :  { %v646_v11 = vld [vmem:[#allocation7 + $0x660] sm:$0xff] }
 0x197   :  { %v8748_v17 = vcombine.high %v642_v10, %v646_v11  ;;  %v690_v5 = vld [vmem:[#allocation7 + $0x7c0] sm:$0xff] }
 0x198   :  { %2069 = vmatpush1.bf16.msra.mxu0 %v8691_v20  ;;  %2151 = vmatpush1.bf16.msra.mxu1 %v8693_v21  ;;  %v654_v20 = vld [vmem:[#allocation7 + $0x6a0] sm:$0xff]  ;;  %v651_v21 = vld [vmem:[#allocation7 + $0x688] sm:$0xff] }
 0x199   :  { %2070 = vmatprep.subr.bf16.mxu0 %v8700_v23  ;;  %2152 = vmatprep.subr.bf16.mxu1 %v8702_v24  ;;  %v8747_v23 = vcombine.low %v642_v10, %v646_v11  ;;  %v8749_v24 = vcombine.low %v643_v12, %v647_v14  ;;  %v8756_v25 = vcombine.high %v650_v19, %v654_v20 }
 0x19a   :  { %v8758_v26 = vcombine.high %v651_v21, %v655_v22 }
 0x19c   :  { %2071 = vmatpush1.bf16.msra.mxu0 %v8699_v31  ;;  %2153 = vmatpush1.bf16.msra.mxu1 %v8701_v32  ;;  %v663_v31 = vld [vmem:[#allocation7 + $0x6e8] sm:$0xff]  ;;  %v8755_v32 = vcombine.low %v650_v19, %v654_v20 }
 0x19d   :  { %2072 = vmatprep.subr.bf16.mxu0 %v8708_v33  ;;  %2154 = vmatprep.subr.bf16.mxu1 %v8710_v34  ;;  %v8757_v33 = vcombine.low %v651_v21, %v655_v22  ;;  %v8764_v34 = vcombine.high %v658_v27, %v662_v28  ;;  %v8766_v35 = vcombine.high %v659_v29, %v663_v31 }
 0x1a0   :  { %2073 = vmatpush1.bf16.msra.mxu0 %v8707_v39  ;;  %2155 = vmatpush1.bf16.msra.mxu1 %v8709_v40  ;;  %v671_v39 = vld [vmem:[#allocation7 + $0x728] sm:$0xff]  ;;  %v8763_v40 = vcombine.low %v658_v27, %v662_v28 }
 0x1a1   :  { %2074 = vmatprep.subr.bf16.mxu0 %v8716_v41  ;;  %2156 = vmatprep.subr.bf16.mxu1 %v8718_v42  ;;  %v8765_v41 = vcombine.low %v659_v29, %v663_v31  ;;  %v8772_v42 = vcombine.high %v666_v36, %v670_v37  ;;  %v8774_v43 = vcombine.high %v667_v38, %v671_v39 }
 0x1a4   :  { %2075 = vmatpush1.bf16.msra.mxu0 %v8715_v51  ;;  %2157 = vmatpush1.bf16.msra.mxu1 %v8717_v52  ;;  %v679_v51 = vld [vmem:[#allocation7 + $0x768] sm:$0xff]  ;;  %v8771_v52 = vcombine.low %v666_v36, %v670_v37 }
 0x1a5   :  { %2076 = vmatprep.subr.bf16.mxu0 %v8724_v53  ;;  %2158 = vmatprep.subr.bf16.mxu1 %v8726_v54  ;;  %v8773_v53 = vcombine.low %v667_v38, %v671_v39  ;;  %v10703_v54 = vsub.s32 2, %v10669_v44  ;;  %v8782_v56 = vcombine.high %v675_v50, %v679_v51 }
 0x1a7   :  { %v183_v2 = vrot.slane %v10674_v46, %v10703_v54  ;;  %v448_v46 = vld [vmem:[#allocation7 + $0x30] sm:$0xff] }
 0x1a8   :  { %2077 = vmatpush1.bf16.msra.mxu0 %v8723_v59  ;;  %2159 = vmatpush1.bf16.msra.mxu1 %v8725_v60  ;;  %v683_v59 = vld [vmem:[#allocation7 + $0x788] sm:$0xff] }
 0x1a9   :  { %2078 = vmatprep.subr.bf16.mxu0 %v8732_v61  ;;  %2160 = vmatprep.subr.bf16.mxu1 %v8734_v1  ;;  %v687_v60 = vld [vmem:[#allocation7 + $0x7a8] sm:$0xff]  ;;  %v8779_v61 = vcombine.low %v674_v48, %v678_v49  ;;  %v8781_v1 = vcombine.low %v675_v50, %v679_v51  ;;  %v428_v11 = vadd.f32 %v10696_v13, %v183_v2  ;;  %v453_v13 = vld [vmem:[#allocation7 + $0x58] sm:$0xff] }
 0x1aa   :  { %v8790_v4 = vcombine.high %v683_v59, %v687_v60  ;;  %v8789_v10 = vcombine.low %v683_v59, %v687_v60  ;;  %v484_v60 = vld [vmem:[#allocation7 + $0x150] sm:$0xff]  ;;  %v489_v2 = vld [vmem:[#allocation7 + $0x178] sm:$0xff] }
 0x1ab   :  { %v436_v20 = vmax.f32 %v428_v11, 0.0 }
 0x1ac   :  { %2079 = vmatpush1.bf16.msra.mxu0 %v8731_v6  ;;  %2161 = vmatpush1.bf16.msra.mxu1 %v8733_v7  ;;  %v694_v6 = vld [vmem:[#allocation7 + $0x7e0] sm:$0xff]  ;;  %v691_v7 = vld [vmem:[#allocation7 + $0x7c8] sm:$0xff] }
 0x1ad   :  { %2080 = vmatprep.subr.bf16.mxu0 %v8740_v8  ;;  %2162 = vmatprep.subr.bf16.mxu1 %v8742_v9  ;;  %v695_v8 = vld [vmem:[#allocation7 + $0x7e8] sm:$0xff]  ;;  %v8787_v9 = vcombine.low %v682_v57, %v686_v58  ;;  %v8796_v12 = vcombine.high %v690_v5, %v694_v6  ;;  %v10708_v27 = vpack.c.bf16 %v436_v20, %v436_v20 }
 0x1ae   :  { %v8798_v14 = vcombine.high %v691_v7, %v695_v8  ;;  %v8797_v19 = vcombine.low %v691_v7, %v695_v8  ;;  %v492_v7 = vld [vmem:[#allocation7 + $0x190] sm:$0xff] }
 0x1af   :  { %v496_v8 = vld [vmem:[#allocation7 + $0x1b0] sm:$0xff] }
 0x1b0   :  { %2081 = vmatpush1.bf16.msra.mxu0 %v8739_v15  ;;  %2163 = vmatpush1.bf16.msra.mxu1 %v8741_v16  ;;  %v444_v15 = vld [vmem:[#allocation7 + $0x10] sm:$0xff]  ;;  %v445_v16 = vld [vmem:[#allocation7 + $0x18] sm:$0xff] }
 0x1b1   :  { %2082 = vmatprep.subr.bf16.mxu0 %v8748_v17  ;;  %2164 = vmatprep.subr.bf16.mxu1 %v8750_v18  ;;  %v449_v17 = vld [vmem:[#allocation7 + $0x38] sm:$0xff]  ;;  %v8795_v18 = vcombine.low %v690_v5, %v694_v6  ;;  %v8552_v21 = vcombine.high %v444_v15, %v448_v46 }
 0x1b2   :  { %v8554_v22 = vcombine.high %v445_v16, %v449_v17  ;;  %v8553_v28 = vcombine.low %v445_v16, %v449_v17  ;;  %v504_v16 = vld [vmem:[#allocation7 + $0x1f0] sm:$0xff]  ;;  %v501_v17 = vld [vmem:[#allocation7 + $0x1d8] sm:$0xff] }
 0x1b4   :  { %2083 = vmatpush1.bf16.msra.mxu0 %v8747_v23  ;;  %2165 = vmatpush1.bf16.msra.mxu1 %v8749_v24  ;;  %v452_v23 = vld [vmem:[#allocation7 + $0x50] sm:$0xff] }
 0x1b5   :  { %2084 = vmatprep.subr.bf16.mxu0 %v8756_v25  ;;  %2166 = vmatprep.subr.bf16.mxu1 %v8758_v26  ;;  %v456_v24 = vld [vmem:[#allocation7 + $0x70] sm:$0xff]  ;;  %v457_v25 = vld [vmem:[#allocation7 + $0x78] sm:$0xff]  ;;  %v8551_v26 = vcombine.low %v444_v15, %v448_v46 }
 0x1b6   :  { %v8560_v29 = vcombine.high %v452_v23, %v456_v24  ;;  %v8562_v31 = vcombine.high %v453_v13, %v457_v25  ;;  %v8559_v36 = vcombine.low %v452_v23, %v456_v24  ;;  %v8561_v37 = vcombine.low %v453_v13, %v457_v25  ;;  %v500_v46 = vld [vmem:[#allocation7 + $0x1d0] sm:$0xff]  ;;  %v509_v13 = vld [vmem:[#allocation7 + $0x218] sm:$0xff] }
 0x1b7   :  { %v508_v23 = vld [vmem:[#allocation7 + $0x210] sm:$0xff]  ;;  %v513_v25 = vld [vmem:[#allocation7 + $0x238] sm:$0xff] }
 0x1b8   :  { %2085 = vmatpush1.bf16.msra.mxu0 %v8755_v32  ;;  %2167 = vmatpush1.bf16.msra.mxu1 %v8757_v33  ;;  %v460_v32 = vld [vmem:[#allocation7 + $0x90] sm:$0xff] }
 0x1b9   :  { %2086 = vmatprep.subr.bf16.mxu0 %v8764_v34  ;;  %2168 = vmatprep.subr.bf16.mxu1 %v8766_v35  ;;  %v464_v33 = vld [vmem:[#allocation7 + $0xb0] sm:$0xff]  ;;  %v461_v34 = vld [vmem:[#allocation7 + $0x98] sm:$0xff] }
 0x1ba   :  { %v465_v35 = vld [vmem:[#allocation7 + $0xb8] sm:$0xff]  ;;  %v8568_v38 = vcombine.high %v460_v32, %v464_v33  ;;  %v8567_v48 = vcombine.low %v460_v32, %v464_v33  ;;  %v512_v24 = vld [vmem:[#allocation7 + $0x230] sm:$0xff] }
 0x1bb   :  { %v8570_v39 = vcombine.high %v461_v34, %v465_v35  ;;  %v8569_v49 = vcombine.low %v461_v34, %v465_v35  ;;  %v516_v32 = vld [vmem:[#allocation7 + $0x250] sm:$0xff]  ;;  %v517_v34 = vld [vmem:[#allocation7 + $0x258] sm:$0xff] }
 0x1bc   :  { %2087 = vmatpush1.bf16.msra.mxu0 %v8763_v40  ;;  %2169 = vmatpush1.bf16.msra.mxu1 %v8765_v41  ;;  %v468_v40 = vld [vmem:[#allocation7 + $0xd0] sm:$0xff]  ;;  %v521_v35 = vld [vmem:[#allocation7 + $0x278] sm:$0xff] }
 0x1bd   :  { %2088 = vmatprep.subr.bf16.mxu0 %v8772_v42  ;;  %2170 = vmatprep.subr.bf16.mxu1 %v8774_v43  ;;  %v472_v41 = vld [vmem:[#allocation7 + $0xf0] sm:$0xff]  ;;  %v469_v42 = vld [vmem:[#allocation7 + $0xd8] sm:$0xff] }
 0x1be   :  { %v473_v43 = vld [vmem:[#allocation7 + $0xf8] sm:$0xff]  ;;  %v8576_v50 = vcombine.high %v468_v40, %v472_v41  ;;  %v520_v33 = vld [vmem:[#allocation7 + $0x270] sm:$0xff] }
 0x1bf   :  { %v8578_v51 = vcombine.high %v469_v42, %v473_v43  ;;  %v8577_v57 = vcombine.low %v469_v42, %v473_v43  ;;  %v525_v42 = vld [vmem:[#allocation7 + $0x298] sm:$0xff] }
 0x1c0   :  { %2089 = vmatpush1.bf16.msra.mxu0 %v8771_v52  ;;  %2171 = vmatpush1.bf16.msra.mxu1 %v8773_v53  ;;  %v476_v52 = vld [vmem:[#allocation7 + $0x110] sm:$0xff]  ;;  %v529_v43 = vld [vmem:[#allocation7 + $0x2b8] sm:$0xff] }
 0x1c1   :  { %2090 = vmatprep.subr.bf16.mxu0 %v8780_v55  ;;  %2172 = vmatprep.subr.bf16.mxu1 %v8782_v56  ;;  %v480_v53 = vld [vmem:[#allocation7 + $0x130] sm:$0xff]  ;;  %v481_v55 = vld [vmem:[#allocation7 + $0x138] sm:$0xff]  ;;  %v8575_v56 = vcombine.low %v468_v40, %v472_v41 }
 0x1c2   :  { %v8584_v58 = vcombine.high %v476_v52, %v480_v53  ;;  %v524_v40 = vld [vmem:[#allocation7 + $0x290] sm:$0xff] }
 0x1c3   :  { %v528_v41 = vld [vmem:[#allocation7 + $0x2b0] sm:$0xff] }
 0x1c4   :  { %2091 = vmatpush1.bf16.msra.mxu0 %v8779_v61  ;;  %2173 = vmatpush1.bf16.msra.mxu1 %v8781_v1  ;;  %v488_v61 = vld [vmem:[#allocation7 + $0x170] sm:$0xff]  ;;  %v485_v1 = vld [vmem:[#allocation7 + $0x158] sm:$0xff] }
 0x1c5   :  { %2092 = vmatprep.subr.bf16.mxu0 %v8788_v3  ;;  %2174 = vmatprep.subr.bf16.mxu1 %v8790_v4  ;;  %v8583_v3 = vcombine.low %v476_v52, %v480_v53  ;;  %v8592_v5 = vcombine.high %v484_v60, %v488_v61  ;;  %v8594_v6 = vcombine.high %v485_v1, %v489_v2  ;;  %v532_v52 = vld [vmem:[#allocation7 + $0x2d0] sm:$0xff] }
 0x1c6   :  { %v8591_v11 = vcombine.low %v484_v60, %v488_v61  ;;  %v536_v53 = vld [vmem:[#allocation7 + $0x2f0] sm:$0xff] }
 0x1c7   :  { %v540_v60 = vld [vmem:[#allocation7 + $0x310] sm:$0xff] }
 0x1c8   :  { %2093 = vmatpush1.bf16.msra.mxu0 %v8787_v9  ;;  %2175 = vmatpush1.bf16.msra.mxu1 %v8789_v10  ;;  %v493_v9 = vld [vmem:[#allocation7 + $0x198] sm:$0xff]  ;;  %v544_v61 = vld [vmem:[#allocation7 + $0x330] sm:$0xff] }
 0x1c9   :  { %2094 = vmatprep.subr.bf16.mxu0 %v8796_v12  ;;  %2176 = vmatprep.subr.bf16.mxu1 %v8798_v14  ;;  %v497_v10 = vld [vmem:[#allocation7 + $0x1b8] sm:$0xff]  ;;  %v8593_v12 = vcombine.low %v485_v1, %v489_v2  ;;  %v8600_v14 = vcombine.high %v492_v7, %v496_v8 }
 0x1ca   :  { %v8602_v15 = vcombine.high %v493_v9, %v497_v10  ;;  %v8601_v20 = vcombine.low %v493_v9, %v497_v10  ;;  %v541_v1 = vld [vmem:[#allocation7 + $0x318] sm:$0xff] }
 0x1cb   :  { %v545_v2 = vld [vmem:[#allocation7 + $0x338] sm:$0xff] }
 0x1cc   :  { %2095 = vmatpush1.bf16.msra.mxu0 %v8795_v18  ;;  %2177 = vmatpush1.bf16.msra.mxu1 %v8797_v19  ;;  %v505_v18 = vld [vmem:[#allocation7 + $0x1f8] sm:$0xff]  ;;  %v8599_v19 = vcombine.low %v492_v7, %v496_v8  ;;  %v548_v7 = vld [vmem:[#allocation7 + $0x350] sm:$0xff] }
 0x1cd   :  { %2187 = vmatprep.subr.bf16.mxu0 %v8552_v21  ;;  %2269 = vmatprep.subr.bf16.mxu1 %v8554_v22  ;;  %v8608_v21 = vcombine.high %v500_v46, %v504_v16  ;;  %v8610_v22 = vcombine.high %v501_v17, %v505_v18  ;;  %v552_v8 = vld [vmem:[#allocation7 + $0x370] sm:$0xff]  ;;  %v549_v9 = vld [vmem:[#allocation7 + $0x358] sm:$0xff] }
 0x1ce   :  { %v553_v10 = vld [vmem:[#allocation7 + $0x378] sm:$0xff] }
 0x1cf   :  { %2097 = vmatmul.mubr.bf16.vlgmr.msra.gmra.mrb[4].mxu0 %v10708_v27  ;;  %2179 = vmatmul.mubr.bf16.vlgmr.msra.gmra.mrb[4].mxu1 %v10708_v27 }
 0x1d0   :  { %2188 = vmatpush1.bf16.msra.mxu0 %v8551_v26  ;;  %2219 = vmatprep.mubr.bf16.mxu0 %v10686_v63  ;;  %v8607_v26 = vcombine.low %v500_v46, %v504_v16  ;;  %v556_v46 = vld [vmem:[#allocation7 + $0x390] sm:$0xff] }
 0x1d1   :  { %2270 = vmatpush1.bf16.msra.mxu1 %v8553_v28  ;;  %2301 = vmatprep.mubr.bf16.mxu1 %v10686_v63  ;;  %v477_v63 = vld [vmem:[#allocation7 + $0x118] sm:$0xff]  ;;  %v8609_v28 = vcombine.low %v501_v17, %v505_v18  ;;  %v560_v16 = vld [vmem:[#allocation7 + $0x3b0] sm:$0xff] }
 0x1d2   :  { %2189 = vmatprep.subr.bf16.mxu0 %v8560_v29  ;;  %2271 = vmatprep.subr.bf16.mxu1 %v8562_v31  ;;  %v8586_v59 = vcombine.high %v477_v63, %v481_v55  ;;  %v8585_v4 = vcombine.low %v477_v63, %v481_v55  ;;  %v8616_v29 = vcombine.high %v508_v23, %v512_v24  ;;  %v533_v63 = vld [vmem:[#allocation7 + $0x2d8] sm:$0xff] }
 0x1d3   :  { %v8618_v31 = vcombine.high %v509_v13, %v513_v25  ;;  %v537_v55 = vld [vmem:[#allocation7 + $0x2f8] sm:$0xff] }
 0x1d4   :  { %2190 = vmatpush1.bf16.msra.mxu0 %v8559_v36  ;;  %v8615_v36 = vcombine.low %v508_v23, %v512_v24  ;;  %v557_v17 = vld [vmem:[#allocation7 + $0x398] sm:$0xff]  ;;  %v564_v23 = vld [vmem:[#allocation7 + $0x3d0] sm:$0xff] }
 0x1d5   :  { %2272 = vmatpush1.bf16.msra.mxu1 %v8561_v37  ;;  %2191 = vmatprep.subr.bf16.mxu0 %v8568_v38  ;;  %v8617_v37 = vcombine.low %v509_v13, %v513_v25  ;;  %v8624_v38 = vcombine.high %v516_v32, %v520_v33  ;;  %v561_v18 = vld [vmem:[#allocation7 + $0x3b8] sm:$0xff]  ;;  %v568_v24 = vld [vmem:[#allocation7 + $0x3f0] sm:$0xff] }
 0x1d6   :  { %2273 = vmatprep.subr.bf16.mxu1 %v8570_v39  ;;  %v8626_v39 = vcombine.high %v517_v34, %v521_v35  ;;  %v565_v13 = vld [vmem:[#allocation7 + $0x3d8] sm:$0xff] }
 0x1d7   :  { %v569_v25 = vld [vmem:[#allocation7 + $0x3f8] sm:$0xff] }
 0x1d8   :  { %2192 = vmatpush1.bf16.msra.mxu0 %v8567_v48  ;;  %v8623_v48 = vcombine.low %v516_v32, %v520_v33  ;;  %v572_v32 = vld [vmem:[#allocation7 + $0x410] sm:$0xff] }
 0x1d9   :  { %2274 = vmatpush1.bf16.msra.mxu1 %v8569_v49  ;;  %2193 = vmatprep.subr.bf16.mxu0 %v8576_v50  ;;  %v8625_v49 = vcombine.low %v517_v34, %v521_v35  ;;  %v8632_v50 = vcombine.high %v524_v40, %v528_v41  ;;  %v576_v33 = vld [vmem:[#allocation7 + $0x430] sm:$0xff]  ;;  %v573_v34 = vld [vmem:[#allocation7 + $0x418] sm:$0xff] }
 0x1da   :  { %2275 = vmatprep.subr.bf16.mxu1 %v8578_v51  ;;  %v8634_v51 = vcombine.high %v525_v42, %v529_v43  ;;  %v577_v35 = vld [vmem:[#allocation7 + $0x438] sm:$0xff] }
 0x1dc   :  { %2194 = vmatpush1.bf16.msra.mxu0 %v8575_v56  ;;  %v8631_v56 = vcombine.low %v524_v40, %v528_v41  ;;  %v580_v40 = vld [vmem:[#allocation7 + $0x450] sm:$0xff] }
 0x1dd   :  { %2276 = vmatpush1.bf16.msra.mxu1 %v8577_v57  ;;  %2195 = vmatprep.subr.bf16.mxu0 %v8584_v58  ;;  %v8633_v57 = vcombine.low %v525_v42, %v529_v43  ;;  %v8640_v58 = vcombine.high %v532_v52, %v536_v53  ;;  %v584_v41 = vld [vmem:[#allocation7 + $0x470] sm:$0xff]  ;;  %v8679_v42 = vcombine.low %v572_v32, %v576_v33  ;;  %v581_v43 = vld [vmem:[#allocation7 + $0x458] sm:$0xff] }
 0x1de   :  { %2277 = vmatprep.subr.bf16.mxu1 %v8586_v59  ;;  %v8642_v59 = vcombine.high %v533_v63, %v537_v55 }
 0x1e0   :  { %2196 = vmatpush1.bf16.msra.mxu0 %v8583_v3  ;;  %v8639_v3 = vcombine.low %v532_v52, %v536_v53  ;;  %v592_v52 = vld [vmem:[#allocation7 + $0x4b0] sm:$0xff] }
 0x1e1   :  { %2278 = vmatpush1.bf16.msra.mxu1 %v8585_v4  ;;  %2197 = vmatprep.subr.bf16.mxu0 %v8592_v5  ;;  %v8641_v4 = vcombine.low %v533_v63, %v537_v55  ;;  %v8648_v5 = vcombine.high %v540_v60, %v544_v61  ;;  %v589_v63 = vld [vmem:[#allocation7 + $0x498] sm:$0xff] }
 0x1e2   :  { %2279 = vmatprep.subr.bf16.mxu1 %v8594_v6  ;;  %v8650_v6 = vcombine.high %v541_v1, %v545_v2  ;;  %v593_v55 = vld [vmem:[#allocation7 + $0x4b8] sm:$0xff] }
 0x1e4   :  { %2198 = vmatpush1.bf16.msra.mxu0 %v8591_v11  ;;  %v8647_v11 = vcombine.low %v540_v60, %v544_v61  ;;  %v596_v60 = vld [vmem:[#allocation7 + $0x4d0] sm:$0xff] }
 0x1e5   :  { %2280 = vmatpush1.bf16.msra.mxu1 %v8593_v12  ;;  %2199 = vmatprep.subr.bf16.mxu0 %v8600_v14  ;;  %v8649_v12 = vcombine.low %v541_v1, %v545_v2  ;;  %v8656_v14 = vcombine.high %v548_v7, %v552_v8  ;;  %v600_v61 = vld [vmem:[#allocation7 + $0x4f0] sm:$0xff]  ;;  %v597_v1 = vld [vmem:[#allocation7 + $0x4d8] sm:$0xff] }
 0x1e6   :  { %2281 = vmatprep.subr.bf16.mxu1 %v8602_v15  ;;  %v8658_v15 = vcombine.high %v549_v9, %v553_v10  ;;  %v601_v2 = vld [vmem:[#allocation7 + $0x4f8] sm:$0xff] }
 0x1e8   :  { %2200 = vmatpush1.bf16.msra.mxu0 %v8599_v19  ;;  %v8655_v19 = vcombine.low %v548_v7, %v552_v8  ;;  %v608_v7 = vld [vmem:[#allocation7 + $0x530] sm:$0xff]  ;;  %v605_v8 = vld [vmem:[#allocation7 + $0x518] sm:$0xff] }
 0x1e9   :  { %2282 = vmatpush1.bf16.msra.mxu1 %v8601_v20  ;;  %2201 = vmatprep.subr.bf16.mxu0 %v8608_v21  ;;  %v8657_v20 = vcombine.low %v549_v9, %v553_v10  ;;  %v8664_v21 = vcombine.high %v556_v46, %v560_v16  ;;  %v609_v9 = vld [vmem:[#allocation7 + $0x538] sm:$0xff]  ;;  %v8705_v10 = vcombine.low %v597_v1, %v601_v2 }
 0x1ea   :  { %2283 = vmatprep.subr.bf16.mxu1 %v8610_v22  ;;  %v8666_v22 = vcombine.high %v557_v17, %v561_v18 }
 0x1ec   :  { %2202 = vmatpush1.bf16.msra.mxu0 %v8607_v26  ;;  %v8663_v26 = vcombine.low %v556_v46, %v560_v16  ;;  %v613_v46 = vld [vmem:[#allocation7 + $0x558] sm:$0xff] }
 0x1ed   :  { %2284 = vmatpush1.bf16.msra.mxu1 %v8609_v28  ;;  %2203 = vmatprep.subr.bf16.mxu0 %v8616_v29  ;;  %v8665_v28 = vcombine.low %v557_v17, %v561_v18  ;;  %v8672_v29 = vcombine.high %v564_v23, %v568_v24  ;;  %v617_v16 = vld [vmem:[#allocation7 + $0x578] sm:$0xff]  ;;  %v8713_v18 = vcombine.low %v605_v8, %v609_v9 }
 0x1ee   :  { %2285 = vmatprep.subr.bf16.mxu1 %v8618_v31  ;;  %v8674_v31 = vcombine.high %v565_v13, %v569_v25 }
 0x1f0   :  { %2204 = vmatpush1.bf16.msra.mxu0 %v8615_v36  ;;  %v8671_v36 = vcombine.low %v564_v23, %v568_v24  ;;  %v621_v23 = vld [vmem:[#allocation7 + $0x598] sm:$0xff] }
 0x1f1   :  { %2286 = vmatpush1.bf16.msra.mxu1 %v8617_v37  ;;  %2205 = vmatprep.subr.bf16.mxu0 %v8624_v38  ;;  %v8673_v37 = vcombine.low %v565_v13, %v569_v25  ;;  %v8680_v38 = vcombine.high %v572_v32, %v576_v33  ;;  %v625_v24 = vld [vmem:[#allocation7 + $0x5b8] sm:$0xff]  ;;  %v8721_v25 = vcombine.low %v613_v46, %v617_v16 }
 0x1f2   :  { %2287 = vmatprep.subr.bf16.mxu1 %v8626_v39  ;;  %v8682_v39 = vcombine.high %v573_v34, %v577_v35  ;;  %v629_v32 = vld [vmem:[#allocation7 + $0x5d8] sm:$0xff] }
 0x1f3   :  { %v633_v33 = vld [vmem:[#allocation7 + $0x5f8] sm:$0xff] }
 0x1f4   :  { %2206 = vmatpush1.bf16.msra.mxu0 %v8623_v48  ;;  %v585_v48 = vld [vmem:[#allocation7 + $0x478] sm:$0xff] }
 0x1f5   :  { %2288 = vmatpush1.bf16.msra.mxu1 %v8625_v49  ;;  %2207 = vmatprep.subr.bf16.mxu0 %v8632_v50  ;;  %v8681_v49 = vcombine.low %v573_v34, %v577_v35  ;;  %v8688_v50 = vcombine.high %v580_v40, %v584_v41  ;;  %v8690_v53 = vcombine.high %v581_v43, %v585_v48 }
 0x1f6   :  { %2289 = vmatprep.subr.bf16.mxu1 %v8634_v51  ;;  %v588_v51 = vld [vmem:[#allocation7 + $0x490] sm:$0xff]  ;;  %v8729_v35 = vcombine.low %v621_v23, %v625_v24 }
 0x1f8   :  { %2208 = vmatpush1.bf16.msra.mxu0 %v8631_v56  ;;  %v8687_v56 = vcombine.low %v580_v40, %v584_v41  ;;  %v637_v40 = vld [vmem:[#allocation7 + $0x618] sm:$0xff] }
 0x1f9   :  { %2290 = vmatpush1.bf16.msra.mxu1 %v8633_v57  ;;  %2209 = vmatprep.subr.bf16.mxu0 %v8640_v58  ;;  %v8689_v57 = vcombine.low %v581_v43, %v585_v48  ;;  %v8696_v58 = vcombine.high %v588_v51, %v592_v52  ;;  %v641_v41 = vld [vmem:[#allocation7 + $0x638] sm:$0xff]  ;;  %v8737_v43 = vcombine.low %v629_v32, %v633_v33 }
 0x1fa   :  { %2291 = vmatprep.subr.bf16.mxu1 %v8642_v59  ;;  %v8698_v59 = vcombine.high %v589_v63, %v593_v55 }
 0x1fc   :  { %2210 = vmatpush1.bf16.msra.mxu0 %v8639_v3  ;;  %v8695_v3 = vcombine.low %v588_v51, %v592_v52  ;;  %v648_v51 = vld [vmem:[#allocation7 + $0x670] sm:$0xff]  ;;  %v645_v52 = vld [vmem:[#allocation7 + $0x658] sm:$0xff] }
 0x1fd   :  { %2292 = vmatpush1.bf16.msra.mxu1 %v8641_v4  ;;  %2211 = vmatprep.subr.bf16.mxu0 %v8648_v5  ;;  %v8704_v4 = vcombine.high %v596_v60, %v600_v61  ;;  %v8706_v5 = vcombine.high %v597_v1, %v601_v2 }
 0x1fe   :  { %2293 = vmatprep.subr.bf16.mxu1 %v8650_v6  ;;  %v604_v6 = vld [vmem:[#allocation7 + $0x510] sm:$0xff] }
 0x1ff   :  { %v8711_v17 = vcombine.low %v604_v6, %v608_v7 }
 0x200   :  { %2212 = vmatpush1.bf16.msra.mxu0 %v8647_v11  ;;  %v8712_v11 = vcombine.high %v604_v6, %v608_v7  ;;  %v661_v6 = vld [vmem:[#allocation7 + $0x6d8] sm:$0xff] }
 0x201   :  { %2294 = vmatpush1.bf16.msra.mxu1 %v8649_v12  ;;  %2213 = vmatprep.subr.bf16.mxu0 %v8656_v14  ;;  %v8714_v12 = vcombine.high %v605_v8, %v609_v9  ;;  %v612_v14 = vld [vmem:[#allocation7 + $0x550] sm:$0xff]  ;;  %v665_v7 = vld [vmem:[#allocation7 + $0x6f8] sm:$0xff] }
 0x202   :  { %2295 = vmatprep.subr.bf16.mxu1 %v8658_v15  ;;  %v616_v15 = vld [vmem:[#allocation7 + $0x570] sm:$0xff] }
 0x203   :  { %v8719_v13 = vcombine.low %v612_v14, %v616_v15 }
 0x204   :  { %2214 = vmatpush1.bf16.msra.mxu0 %v8655_v19  ;;  %v8720_v19 = vcombine.high %v612_v14, %v616_v15  ;;  %v669_v14 = vld [vmem:[#allocation7 + $0x718] sm:$0xff] }
 0x205   :  { %2296 = vmatpush1.bf16.msra.mxu1 %v8657_v20  ;;  %2215 = vmatprep.subr.bf16.mxu0 %v8664_v21  ;;  %v8722_v20 = vcombine.high %v613_v46, %v617_v16  ;;  %v620_v21 = vld [vmem:[#allocation7 + $0x590] sm:$0xff]  ;;  %v673_v15 = vld [vmem:[#allocation7 + $0x738] sm:$0xff]  ;;  %v8769_v16 = vcombine.low %v661_v6, %v665_v7 }
 0x206   :  { %2297 = vmatprep.subr.bf16.mxu1 %v8666_v22  ;;  %v624_v22 = vld [vmem:[#allocation7 + $0x5b0] sm:$0xff] }
 0x207   :  { %v8727_v34 = vcombine.low %v620_v21, %v624_v22 }
 0x208   :  { %2216 = vmatpush1.bf16.msra.mxu0 %v8663_v26  ;;  %v8728_v26 = vcombine.high %v620_v21, %v624_v22  ;;  %v677_v21 = vld [vmem:[#allocation7 + $0x758] sm:$0xff] }
 0x209   :  { %2298 = vmatpush1.bf16.msra.mxu1 %v8665_v28  ;;  %2217 = vmatprep.subr.bf16.mxu0 %v8672_v29  ;;  %v8730_v28 = vcombine.high %v621_v23, %v625_v24  ;;  %v628_v29 = vld [vmem:[#allocation7 + $0x5d0] sm:$0xff]  ;;  %v681_v22 = vld [vmem:[#allocation7 + $0x778] sm:$0xff]  ;;  %v8777_v24 = vcombine.low %v669_v14, %v673_v15 }
 0x20a   :  { %2299 = vmatprep.subr.bf16.mxu1 %v8674_v31  ;;  %v632_v31 = vld [vmem:[#allocation7 + $0x5f0] sm:$0xff] }
 0x20c   :  { %2218 = vmatpush1.bf16.msra.mxu0 %v8671_v36  ;;  %v8736_v36 = vcombine.high %v628_v29, %v632_v31 }
 0x20d   :  { %2300 = vmatpush1.bf16.msra.mxu1 %v8673_v37  ;;  %2228 = vmatprep.subr.bf16.mxu0 %v8680_v38  ;;  %v8738_v37 = vcombine.high %v629_v32, %v633_v33  ;;  %v636_v38 = vld [vmem:[#allocation7 + $0x610] sm:$0xff]  ;;  %v8785_v33 = vcombine.low %v677_v21, %v681_v22 }
 0x20e   :  { %2310 = vmatprep.subr.bf16.mxu1 %v8682_v39  ;;  %v640_v39 = vld [vmem:[#allocation7 + $0x630] sm:$0xff] }
 0x20f   :  { %2220 = vmatmul.mubr.bf16.vlgmr.msra.gmra.mrb[8].mxu0 %v10688_v0  ;;  %v8744_v48 = vcombine.high %v636_v38, %v640_v39 }
 0x210   :  { %2302 = vmatmul.mubr.bf16.vlgmr.msra.gmra.mrb[8].mxu1 %v10688_v0  ;;  %2229 = vmatpush1.bf16.msra.mxu0 %v8679_v42  ;;  %v8697_v0 = vcombine.low %v589_v63, %v593_v55  ;;  %v8735_v42 = vcombine.low %v628_v29, %v632_v31  ;;  %v8743_v63 = vcombine.low %v636_v38, %v640_v39  ;;  %v685_v29 = vld [vmem:[#allocation7 + $0x798] sm:$0xff] }
 0x211   :  { %2260 = vmatprep.mubr.bf16.mxu0 %v10698_v30  ;;  %2311 = vmatpush1.bf16.msra.mxu1 %v8681_v49  ;;  %v8746_v49 = vcombine.high %v637_v40, %v641_v41  ;;  %v8745_v55 = vcombine.low %v637_v40, %v641_v41  ;;  %v689_v31 = vld [vmem:[#allocation7 + $0x7b8] sm:$0xff] }
 0x212   :  { %2342 = vmatprep.mubr.bf16.mxu1 %v10698_v30  ;;  %2230 = vmatprep.subr.bf16.mxu0 %v8688_v50  ;;  %v8703_v30 = vcombine.low %v596_v60, %v600_v61  ;;  %v644_v50 = vld [vmem:[#allocation7 + $0x650] sm:$0xff]  ;;  %v653_v60 = vld [vmem:[#allocation7 + $0x698] sm:$0xff]  ;;  %v8793_v41 = vcombine.low %v685_v29, %v689_v31 }
 0x213   :  { %2312 = vmatprep.subr.bf16.mxu1 %v8690_v53  ;;  %v649_v53 = vld [vmem:[#allocation7 + $0x678] sm:$0xff]  ;;  %v8751_v1 = vcombine.low %v644_v50, %v648_v51 }
 0x214   :  { %2231 = vmatpush1.bf16.msra.mxu0 %v8687_v56  ;;  %v8752_v56 = vcombine.high %v644_v50, %v648_v51  ;;  %v657_v61 = vld [vmem:[#allocation7 + $0x6b8] sm:$0xff]  ;;  %v8753_v2 = vcombine.low %v645_v52, %v649_v53  ;;  %v2368_v50 = vld [vmem:[#allocation8 + $0x8] sm:$0xff] }
 0x215   :  { %2313 = vmatpush1.bf16.msra.mxu1 %v8689_v57  ;;  %2232 = vmatprep.subr.bf16.mxu0 %v8696_v58  ;;  %v8754_v57 = vcombine.high %v645_v52, %v649_v53  ;;  %v652_v58 = vld [vmem:[#allocation7 + $0x690] sm:$0xff]  ;;  %v8761_v9 = vcombine.low %v653_v60, %v657_v61  ;;  %v693_v38 = vld [vmem:[#allocation7 + $0x7d8] sm:$0xff]  ;;  %v2372_v51 = vld [vmem:[#allocation8 + $0x28] sm:$0xff] }
 0x216   :  { %2314 = vmatprep.subr.bf16.mxu1 %v8698_v59  ;;  %v656_v59 = vld [vmem:[#allocation7 + $0x6b0] sm:$0xff]  ;;  %v697_v39 = vld [vmem:[#allocation7 + $0x7f8] sm:$0xff] }
 0x217   :  { %v8759_v8 = vcombine.low %v652_v58, %v656_v59  ;;  %v8801_v53 = vcombine.low %v693_v38, %v697_v39 }
 0x218   :  { %2233 = vmatpush1.bf16.msra.mxu0 %v8695_v3  ;;  %v8760_v3 = vcombine.high %v652_v58, %v656_v59  ;;  %v2376_v58 = vld [vmem:[#allocation8 + $0x48] sm:$0xff] }
 0x219   :  { %2315 = vmatpush1.bf16.msra.mxu1 %v8697_v0  ;;  %2234 = vmatprep.subr.bf16.mxu0 %v8704_v4  ;;  %v8762_v0 = vcombine.high %v653_v60, %v657_v61  ;;  %v660_v4 = vld [vmem:[#allocation7 + $0x6d0] sm:$0xff]  ;;  %v2380_v59 = vld [vmem:[#allocation8 + $0x68] sm:$0xff]  ;;  %v8805_v61 = vcombine.low %v2368_v50, %v2372_v51 }
 0x21a   :  { %2316 = vmatprep.subr.bf16.mxu1 %v8706_v5  ;;  %v664_v5 = vld [vmem:[#allocation7 + $0x6f0] sm:$0xff] }
 0x21b   :  { %v8767_v46 = vcombine.low %v660_v4, %v664_v5 }
 0x21c   :  { %2235 = vmatpush1.bf16.msra.mxu0 %v8703_v30  ;;  %v8768_v30 = vcombine.high %v660_v4, %v664_v5  ;;  %v2384_v4 = vld [vmem:[#allocation8 + $0x88] sm:$0xff] }
 0x21d   :  { %2317 = vmatpush1.bf16.msra.mxu1 %v8705_v10  ;;  %2236 = vmatprep.subr.bf16.mxu0 %v8712_v11  ;;  %v8770_v10 = vcombine.high %v661_v6, %v665_v7  ;;  %v668_v11 = vld [vmem:[#allocation7 + $0x710] sm:$0xff]  ;;  %v2388_v5 = vld [vmem:[#allocation8 + $0xa8] sm:$0xff]  ;;  %v8813_v7 = vcombine.low %v2376_v58, %v2380_v59 }
 0x21e   :  { %2318 = vmatprep.subr.bf16.mxu1 %v8714_v12  ;;  %v672_v12 = vld [vmem:[#allocation7 + $0x730] sm:$0xff] }
 0x21f   :  { %v8775_v23 = vcombine.low %v668_v11, %v672_v12 }
 0x220   :  { %2237 = vmatpush1.bf16.msra.mxu0 %v8711_v17  ;;  %v8776_v17 = vcombine.high %v668_v11, %v672_v12  ;;  %v2392_v11 = vld [vmem:[#allocation8 + $0xc8] sm:$0xff] }
 0x221   :  { %2319 = vmatpush1.bf16.msra.mxu1 %v8713_v18  ;;  %2238 = vmatprep.subr.bf16.mxu0 %v8720_v19  ;;  %v8778_v18 = vcombine.high %v669_v14, %v673_v15  ;;  %v676_v19 = vld [vmem:[#allocation7 + $0x750] sm:$0xff]  ;;  %v2396_v12 = vld [vmem:[#allocation8 + $0xe8] sm:$0xff]  ;;  %v8821_v15 = vcombine.low %v2384_v4, %v2388_v5 }
 0x222   :  { %2320 = vmatprep.subr.bf16.mxu1 %v8722_v20  ;;  %v680_v20 = vld [vmem:[#allocation7 + $0x770] sm:$0xff] }
 0x223   :  { %v8783_v32 = vcombine.low %v676_v19, %v680_v20 }
 0x224   :  { %2239 = vmatpush1.bf16.msra.mxu0 %v8719_v13  ;;  %v8784_v13 = vcombine.high %v676_v19, %v680_v20  ;;  %v2404_v19 = vld [vmem:[#allocation8 + $0x128] sm:$0xff] }
 0x225   :  { %2321 = vmatpush1.bf16.msra.mxu1 %v8721_v25  ;;  %2240 = vmatprep.subr.bf16.mxu0 %v8728_v26  ;;  %v8786_v25 = vcombine.high %v677_v21, %v681_v22  ;;  %v684_v26 = vld [vmem:[#allocation7 + $0x790] sm:$0xff]  ;;  %v8829_v21 = vcombine.low %v2392_v11, %v2396_v12 }
 0x226   :  { %2322 = vmatprep.subr.bf16.mxu1 %v8730_v28  ;;  %v688_v28 = vld [vmem:[#allocation7 + $0x7b0] sm:$0xff] }
 0x227   :  { %v8791_v40 = vcombine.low %v684_v26, %v688_v28 }
 0x228   :  { %2241 = vmatpush1.bf16.msra.mxu0 %v8727_v34  ;;  %v8792_v34 = vcombine.high %v684_v26, %v688_v28  ;;  %v2412_v26 = vld [vmem:[#allocation8 + $0x168] sm:$0xff] }
 0x229   :  { %2323 = vmatpush1.bf16.msra.mxu1 %v8729_v35  ;;  %2242 = vmatprep.subr.bf16.mxu0 %v8736_v36  ;;  %v8794_v35 = vcombine.high %v685_v29, %v689_v31  ;;  %v692_v36 = vld [vmem:[#allocation7 + $0x7d0] sm:$0xff] }
 0x22a   :  { %2324 = vmatprep.subr.bf16.mxu1 %v8738_v37  ;;  %v696_v37 = vld [vmem:[#allocation7 + $0x7f0] sm:$0xff] }
 0x22b   :  { %v8799_v52 = vcombine.low %v692_v36, %v696_v37 }
 0x22c   :  { %2243 = vmatpush1.bf16.msra.mxu0 %v8735_v42  ;;  %v8800_v42 = vcombine.high %v692_v36, %v696_v37  ;;  %v2420_v36 = vld [vmem:[#allocation8 + $0x1a8] sm:$0xff] }
 0x22d   :  { %2325 = vmatpush1.bf16.msra.mxu1 %v8737_v43  ;;  %2244 = vmatprep.subr.bf16.mxu0 %v8744_v48  ;;  %v8802_v43 = vcombine.high %v693_v38, %v697_v39  ;;  %v2367_v48 = vld [vmem:[#allocation8] sm:$0xff] }
 0x22e   :  { %2326 = vmatprep.subr.bf16.mxu1 %v8746_v49  ;;  %v2371_v49 = vld [vmem:[#allocation8 + $0x20] sm:$0xff] }
 0x22f   :  { %v8803_v60 = vcombine.low %v2367_v48, %v2371_v49 }
 0x230   :  { %2245 = vmatpush1.bf16.msra.mxu0 %v8743_v63  ;;  %v8804_v63 = vcombine.high %v2367_v48, %v2371_v49  ;;  %v2428_v48 = vld [vmem:[#allocation8 + $0x1e8] sm:$0xff] }
 0x231   :  { %2327 = vmatpush1.bf16.msra.mxu1 %v8745_v55  ;;  %2246 = vmatprep.subr.bf16.mxu0 %v8752_v56  ;;  %v8806_v55 = vcombine.high %v2368_v50, %v2372_v51  ;;  %v2375_v56 = vld [vmem:[#allocation8 + $0x40] sm:$0xff] }
 0x232   :  { %2328 = vmatprep.subr.bf16.mxu1 %v8754_v57  ;;  %v2379_v57 = vld [vmem:[#allocation8 + $0x60] sm:$0xff] }
 0x233   :  { %v8811_v6 = vcombine.low %v2375_v56, %v2379_v57 }
 0x234   :  { %2247 = vmatpush1.bf16.msra.mxu0 %v8751_v1  ;;  %v8812_v1 = vcombine.high %v2375_v56, %v2379_v57  ;;  %v2436_v56 = vld [vmem:[#allocation8 + $0x228] sm:$0xff] }
 0x235   :  { %2329 = vmatpush1.bf16.msra.mxu1 %v8753_v2  ;;  %2248 = vmatprep.subr.bf16.mxu0 %v8760_v3  ;;  %v8814_v2 = vcombine.high %v2376_v58, %v2380_v59  ;;  %v2383_v3 = vld [vmem:[#allocation8 + $0x80] sm:$0xff] }
 0x236   :  { %2330 = vmatprep.subr.bf16.mxu1 %v8762_v0  ;;  %v2387_v0 = vld [vmem:[#allocation8 + $0xa0] sm:$0xff] }
 0x237   :  { %v8819_v14 = vcombine.low %v2383_v3, %v2387_v0 }
 0x238   :  { %2249 = vmatpush1.bf16.msra.mxu0 %v8759_v8  ;;  %v8820_v8 = vcombine.high %v2383_v3, %v2387_v0  ;;  %v2444_v3 = vld [vmem:[#allocation8 + $0x268] sm:$0xff] }
 0x239   :  { %2331 = vmatpush1.bf16.msra.mxu1 %v8761_v9  ;;  %2250 = vmatprep.subr.bf16.mxu0 %v8768_v30  ;;  %v8822_v9 = vcombine.high %v2384_v4, %v2388_v5  ;;  %v2391_v30 = vld [vmem:[#allocation8 + $0xc0] sm:$0xff] }
 0x23a   :  { %2332 = vmatprep.subr.bf16.mxu1 %v8770_v10  ;;  %v2395_v10 = vld [vmem:[#allocation8 + $0xe0] sm:$0xff] }
 0x23b   :  { %v8827_v20 = vcombine.low %v2391_v30, %v2395_v10 }
 0x23c   :  { %2251 = vmatpush1.bf16.msra.mxu0 %v8767_v46  ;;  %v8828_v46 = vcombine.high %v2391_v30, %v2395_v10  ;;  %v2452_v30 = vld [vmem:[#allocation8 + $0x2a8] sm:$0xff] }
 0x23d   :  { %2333 = vmatpush1.bf16.msra.mxu1 %v8769_v16  ;;  %2252 = vmatprep.subr.bf16.mxu0 %v8776_v17  ;;  %v2399_v16 = vld [vmem:[#allocation8 + $0x100] sm:$0xff] }
 0x23e   :  { %2334 = vmatprep.subr.bf16.mxu1 %v8778_v18  ;;  %v2403_v17 = vld [vmem:[#allocation8 + $0x120] sm:$0xff]  ;;  %v2400_v18 = vld [vmem:[#allocation8 + $0x108] sm:$0xff] }
 0x23f   :  { %v8836_v22 = vcombine.high %v2399_v16, %v2403_v17  ;;  %v8835_v28 = vcombine.low %v2399_v16, %v2403_v17  ;;  %v8837_v29 = vcombine.low %v2400_v18, %v2404_v19  ;;  %v2460_v16 = vld [vmem:[#allocation8 + $0x2e8] sm:$0xff] }
 0x240   :  { %2253 = vmatpush1.bf16.msra.mxu0 %v8775_v23  ;;  %v8838_v23 = vcombine.high %v2400_v18, %v2404_v19 }
 0x241   :  { %2335 = vmatpush1.bf16.msra.mxu1 %v8777_v24  ;;  %2254 = vmatprep.subr.bf16.mxu0 %v8784_v13  ;;  %v2407_v24 = vld [vmem:[#allocation8 + $0x140] sm:$0xff] }
 0x242   :  { %2336 = vmatprep.subr.bf16.mxu1 %v8786_v25  ;;  %v2411_v13 = vld [vmem:[#allocation8 + $0x160] sm:$0xff]  ;;  %v2408_v25 = vld [vmem:[#allocation8 + $0x148] sm:$0xff] }
 0x243   :  { %v8844_v31 = vcombine.high %v2407_v24, %v2411_v13  ;;  %v8843_v37 = vcombine.low %v2407_v24, %v2411_v13  ;;  %v8845_v38 = vcombine.low %v2408_v25, %v2412_v26  ;;  %v2468_v24 = vld [vmem:[#allocation8 + $0x328] sm:$0xff] }
 0x244   :  { %2255 = vmatpush1.bf16.msra.mxu0 %v8783_v32  ;;  %v8846_v32 = vcombine.high %v2408_v25, %v2412_v26 }
 0x245   :  { %2337 = vmatpush1.bf16.msra.mxu1 %v8785_v33  ;;  %2256 = vmatprep.subr.bf16.mxu0 %v8792_v34  ;;  %v2415_v33 = vld [vmem:[#allocation8 + $0x180] sm:$0xff] }
 0x246   :  { %2338 = vmatprep.subr.bf16.mxu1 %v8794_v35  ;;  %v2419_v34 = vld [vmem:[#allocation8 + $0x1a0] sm:$0xff]  ;;  %v2416_v35 = vld [vmem:[#allocation8 + $0x188] sm:$0xff] }
 0x247   :  { %v8852_v39 = vcombine.high %v2415_v33, %v2419_v34  ;;  %v8851_v49 = vcombine.low %v2415_v33, %v2419_v34  ;;  %v8853_v50 = vcombine.low %v2416_v35, %v2420_v36  ;;  %v2476_v33 = vld [vmem:[#allocation8 + $0x368] sm:$0xff] }
 0x248   :  { %2257 = vmatpush1.bf16.msra.mxu0 %v8791_v40  ;;  %v8854_v40 = vcombine.high %v2416_v35, %v2420_v36 }
 0x249   :  { %2339 = vmatpush1.bf16.msra.mxu1 %v8793_v41  ;;  %2258 = vmatprep.subr.bf16.mxu0 %v8800_v42  ;;  %v2423_v41 = vld [vmem:[#allocation8 + $0x1c0] sm:$0xff] }
 0x24a   :  { %2340 = vmatprep.subr.bf16.mxu1 %v8802_v43  ;;  %v2427_v42 = vld [vmem:[#allocation8 + $0x1e0] sm:$0xff]  ;;  %v2424_v43 = vld [vmem:[#allocation8 + $0x1c8] sm:$0xff] }
 0x24b   :  { %v8860_v51 = vcombine.high %v2423_v41, %v2427_v42  ;;  %v8859_v57 = vcombine.low %v2423_v41, %v2427_v42  ;;  %v8861_v58 = vcombine.low %v2424_v43, %v2428_v48  ;;  %v2484_v41 = vld [vmem:[#allocation8 + $0x3a8] sm:$0xff] }
 0x24c   :  { %2259 = vmatpush1.bf16.msra.mxu0 %v8799_v52  ;;  %v8862_v52 = vcombine.high %v2424_v43, %v2428_v48 }
 0x24d   :  { %2341 = vmatpush1.bf16.msra.mxu1 %v8801_v53  ;;  %5484 = vmatprep.subr.bf16.mxu0 %v8804_v63  ;;  %v2431_v53 = vld [vmem:[#allocation8 + $0x200] sm:$0xff] }
 0x24e   :  { %5648 = vmatprep.subr.bf16.mxu1 %v8806_v55  ;;  %v2435_v63 = vld [vmem:[#allocation8 + $0x220] sm:$0xff]  ;;  %v2432_v55 = vld [vmem:[#allocation8 + $0x208] sm:$0xff] }
 0x24f   :  { %2261 = vmatmul.mubr.bf16.vlgmr.msra.gmra.mrb[8].mxu0 %v10708_v27  ;;  %v8868_v59 = vcombine.high %v2431_v53, %v2435_v63  ;;  %v8867_v0 = vcombine.low %v2431_v53, %v2435_v63  ;;  %v8869_v4 = vcombine.low %v2432_v55, %v2436_v56  ;;  %v2492_v53 = vld [vmem:[#allocation8 + $0x3e8] sm:$0xff] }
 0x250   :  { %2343 = vmatmul.mubr.bf16.vlgmr.msra.gmra.mrb[8].mxu1 %v10708_v27  ;;  %5485 = vmatpush1.bf16.msra.mxu0 %v8803_v60  ;;  %v8830_v27 = vcombine.high %v2392_v11, %v2396_v12  ;;  %v8870_v60 = vcombine.high %v2432_v55, %v2436_v56 }
 0x251   :  { %5649 = vmatpush1.bf16.msra.mxu1 %v8805_v61  ;;  %5486 = vmatprep.subr.bf16.mxu0 %v8812_v1  ;;  %v2439_v61 = vld [vmem:[#allocation8 + $0x240] sm:$0xff] }
 0x252   :  { %5650 = vmatprep.subr.bf16.mxu1 %v8814_v2  ;;  %v2443_v1 = vld [vmem:[#allocation8 + $0x260] sm:$0xff]  ;;  %v2440_v2 = vld [vmem:[#allocation8 + $0x248] sm:$0xff] }
 0x253   :  { %v8876_v5 = vcombine.high %v2439_v61, %v2443_v1  ;;  %v8875_v10 = vcombine.low %v2439_v61, %v2443_v1  ;;  %v8877_v11 = vcombine.low %v2440_v2, %v2444_v3  ;;  %v2500_v61 = vld [vmem:[#allocation8 + $0x428] sm:$0xff] }
 0x254   :  { %5487 = vmatpush1.bf16.msra.mxu0 %v8811_v6  ;;  %v8878_v6 = vcombine.high %v2440_v2, %v2444_v3 }
 0x255   :  { %5651 = vmatpush1.bf16.msra.mxu1 %v8813_v7  ;;  %5488 = vmatprep.subr.bf16.mxu0 %v8820_v8  ;;  %v2447_v7 = vld [vmem:[#allocation8 + $0x280] sm:$0xff] }
 0x256   :  { %5652 = vmatprep.subr.bf16.mxu1 %v8822_v9  ;;  %v2451_v8 = vld [vmem:[#allocation8 + $0x2a0] sm:$0xff]  ;;  %v2448_v9 = vld [vmem:[#allocation8 + $0x288] sm:$0xff] }
 0x257   :  { %v8884_v12 = vcombine.high %v2447_v7, %v2451_v8  ;;  %v8883_v17 = vcombine.low %v2447_v7, %v2451_v8  ;;  %v8885_v18 = vcombine.low %v2448_v9, %v2452_v30 }
 0x258   :  { %5489 = vmatpush1.bf16.msra.mxu0 %v8819_v14  ;;  %v8886_v14 = vcombine.high %v2448_v9, %v2452_v30 }
 0x259   :  { %5653 = vmatpush1.bf16.msra.mxu1 %v8821_v15  ;;  %5490 = vmatprep.subr.bf16.mxu0 %v8828_v46  ;;  %v2455_v15 = vld [vmem:[#allocation8 + $0x2c0] sm:$0xff] }
 0x25a   :  { %5654 = vmatprep.subr.bf16.mxu1 %v8830_v27  ;;  %v2459_v46 = vld [vmem:[#allocation8 + $0x2e0] sm:$0xff]  ;;  %v2456_v27 = vld [vmem:[#allocation8 + $0x2c8] sm:$0xff] }
 0x25b   :  { %v8892_v19 = vcombine.high %v2455_v15, %v2459_v46  ;;  %v8891_v13 = vcombine.low %v2455_v15, %v2459_v46  ;;  %v8893_v25 = vcombine.low %v2456_v27, %v2460_v16 }
 0x25c   :  { %5491 = vmatpush1.bf16.msra.mxu0 %v8827_v20  ;;  %v8894_v20 = vcombine.high %v2456_v27, %v2460_v16 }
 0x25d   :  { %5655 = vmatpush1.bf16.msra.mxu1 %v8829_v21  ;;  %5492 = vmatprep.subr.bf16.mxu0 %v8836_v22  ;;  %v2463_v21 = vld [vmem:[#allocation8 + $0x300] sm:$0xff] }
 0x25e   :  { %5656 = vmatprep.subr.bf16.mxu1 %v8838_v23  ;;  %v2467_v22 = vld [vmem:[#allocation8 + $0x320] sm:$0xff]  ;;  %v2464_v23 = vld [vmem:[#allocation8 + $0x308] sm:$0xff] }
 0x25f   :  { %v8900_v26 = vcombine.high %v2463_v21, %v2467_v22  ;;  %v8899_v34 = vcombine.low %v2463_v21, %v2467_v22  ;;  %v8901_v35 = vcombine.low %v2464_v23, %v2468_v24  ;;  %v2503_v21 = vld [vmem:[#allocation8 + $0x440] sm:$0xff] }
 0x260   :  { %5493 = vmatpush1.bf16.msra.mxu0 %v8835_v28  ;;  %v8902_v28 = vcombine.high %v2464_v23, %v2468_v24  ;;  %v2507_v23 = vld [vmem:[#allocation8 + $0x460] sm:$0xff]  ;;  %v2504_v24 = vld [vmem:[#allocation8 + $0x448] sm:$0xff] }
 0x261   :  { %5657 = vmatpush1.bf16.msra.mxu1 %v8837_v29  ;;  %5494 = vmatprep.subr.bf16.mxu0 %v8844_v31  ;;  %v2471_v29 = vld [vmem:[#allocation8 + $0x340] sm:$0xff] }
 0x262   :  { %5658 = vmatprep.subr.bf16.mxu1 %v8846_v32  ;;  %v2475_v31 = vld [vmem:[#allocation8 + $0x360] sm:$0xff]  ;;  %v2472_v32 = vld [vmem:[#allocation8 + $0x348] sm:$0xff] }
 0x263   :  { %v8908_v36 = vcombine.high %v2471_v29, %v2475_v31  ;;  %v8907_v42 = vcombine.low %v2471_v29, %v2475_v31  ;;  %v8909_v43 = vcombine.low %v2472_v32, %v2476_v33  ;;  %v2511_v31 = vld [vmem:[#allocation8 + $0x480] sm:$0xff] }
 0x264   :  { %5495 = vmatpush1.bf16.msra.mxu0 %v8843_v37  ;;  %v8910_v37 = vcombine.high %v2472_v32, %v2476_v33  ;;  %v8940_v32 = vcombine.high %v2503_v21, %v2507_v23 }
 0x265   :  { %5659 = vmatpush1.bf16.msra.mxu1 %v8845_v38  ;;  %5496 = vmatprep.subr.bf16.mxu0 %v8852_v39  ;;  %v2479_v38 = vld [vmem:[#allocation8 + $0x380] sm:$0xff] }
 0x266   :  { %5660 = vmatprep.subr.bf16.mxu1 %v8854_v40  ;;  %v2483_v39 = vld [vmem:[#allocation8 + $0x3a0] sm:$0xff]  ;;  %v2480_v40 = vld [vmem:[#allocation8 + $0x388] sm:$0xff] }
 0x267   :  { %v8916_v48 = vcombine.high %v2479_v38, %v2483_v39  ;;  %v8915_v63 = vcombine.low %v2479_v38, %v2483_v39  ;;  %v8917_v55 = vcombine.low %v2480_v40, %v2484_v41  ;;  %v8939_v38 = vcombine.low %v2503_v21, %v2507_v23 }
 0x268   :  { %5497 = vmatpush1.bf16.msra.mxu0 %v8851_v49  ;;  %v8918_v49 = vcombine.high %v2480_v40, %v2484_v41 }
 0x269   :  { %5661 = vmatpush1.bf16.msra.mxu1 %v8853_v50  ;;  %5498 = vmatprep.subr.bf16.mxu0 %v8860_v51  ;;  %v2487_v50 = vld [vmem:[#allocation8 + $0x3c0] sm:$0xff] }
 0x26a   :  { %5662 = vmatprep.subr.bf16.mxu1 %v8862_v52  ;;  %v2491_v51 = vld [vmem:[#allocation8 + $0x3e0] sm:$0xff]  ;;  %v2488_v52 = vld [vmem:[#allocation8 + $0x3c8] sm:$0xff] }
 0x26b   :  { %v8924_v56 = vcombine.high %v2487_v50, %v2491_v51  ;;  %v8923_v1 = vcombine.low %v2487_v50, %v2491_v51  ;;  %v8925_v2 = vcombine.low %v2488_v52, %v2492_v53 }
 0x26c   :  { %5499 = vmatpush1.bf16.msra.mxu0 %v8859_v57  ;;  %v8926_v57 = vcombine.high %v2488_v52, %v2492_v53 }
 0x26d   :  { %5663 = vmatpush1.bf16.msra.mxu1 %v8861_v58  ;;  %5500 = vmatprep.subr.bf16.mxu0 %v8868_v59  ;;  %v2495_v58 = vld [vmem:[#allocation8 + $0x400] sm:$0xff] }
 0x26e   :  { %5664 = vmatprep.subr.bf16.mxu1 %v8870_v60  ;;  %v2499_v59 = vld [vmem:[#allocation8 + $0x420] sm:$0xff]  ;;  %v2496_v60 = vld [vmem:[#allocation8 + $0x408] sm:$0xff] }
 0x26f   :  { %v8932_v3 = vcombine.high %v2495_v58, %v2499_v59 }
 0x270   :  { %5501 = vmatpush1.bf16.msra.mxu0 %v8867_v0  ;;  %v8934_v0 = vcombine.high %v2496_v60, %v2500_v61 }
 0x271   :  { %5665 = vmatpush1.bf16.msra.mxu1 %v8869_v4  ;;  %5502 = vmatprep.subr.bf16.mxu0 %v8876_v5  ;;  %v699_v4 = vld [vmem:[#allocation14 + $0x1] ss:$8 sm:$0xf] }
 0x272   :  { %5666 = vmatprep.subr.bf16.mxu1 %v8878_v6  ;;  %v700_v5 = vld [vmem:[#allocation14 + $0x1] ss:$8 sm:$0xf0] }
 0x273   :  { %v10720_v6 = vor.u32 %v700_v5, %v699_v4 }
 0x274   :  { %5503 = vmatpush1.bf16.msra.mxu0 %v8875_v10 }
 0x275   :  { %5667 = vmatpush1.bf16.msra.mxu1 %v8877_v11  ;;  %5504 = vmatprep.subr.bf16.mxu0 %v8884_v12  ;;  %v706_v7 = vrot.slane %v10720_v6, %v10672_v45  ;;  %v710_v8 = vrot.slane %v10720_v6, %v10677_v47  ;;  %v718_v9 = vrot.slane %v10720_v6, %v10684_v62 }
 0x276   :  { %5668 = vmatprep.subr.bf16.mxu1 %v8886_v14 }
 0x278   :  { %5505 = vmatpush1.bf16.msra.mxu0 %v8883_v17 }
 0x279   :  { %5669 = vmatpush1.bf16.msra.mxu1 %v8885_v18  ;;  %5506 = vmatprep.subr.bf16.mxu0 %v8892_v19 }
 0x27a   :  { %5670 = vmatprep.subr.bf16.mxu1 %v8894_v20 }
 0x27c   :  { %5507 = vmatpush1.bf16.msra.mxu0 %v8891_v13  ;;  %v2508_v13 = vld [vmem:[#allocation8 + $0x468] sm:$0xff] }
 0x27d   :  { %5671 = vmatpush1.bf16.msra.mxu1 %v8893_v25  ;;  %5508 = vmatprep.subr.bf16.mxu0 %v8900_v26  ;;  %v8931_v26 = vcombine.low %v2495_v58, %v2499_v59  ;;  %v8942_v33 = vcombine.high %v2504_v24, %v2508_v13  ;;  %v8941_v39 = vcombine.low %v2504_v24, %v2508_v13  ;;  %v2559_v24 = vld [vmem:[#allocation8 + $0x600] sm:$0xff] }
 0x27e   :  { %5672 = vmatprep.subr.bf16.mxu1 %v8902_v28  ;;  %v8933_v28 = vcombine.low %v2496_v60, %v2500_v61  ;;  %v2563_v13 = vld [vmem:[#allocation8 + $0x620] sm:$0xff] }
 0x280   :  { %5509 = vmatpush1.bf16.msra.mxu0 %v8899_v34  ;;  %v2515_v34 = vld [vmem:[#allocation8 + $0x4a0] sm:$0xff] }
 0x281   :  { %5673 = vmatpush1.bf16.msra.mxu1 %v8901_v35  ;;  %5510 = vmatprep.subr.bf16.mxu0 %v8908_v36  ;;  %v2512_v35 = vld [vmem:[#allocation8 + $0x488] sm:$0xff]  ;;  %v8948_v40 = vcombine.high %v2511_v31, %v2515_v34  ;;  %v8947_v50 = vcombine.low %v2511_v31, %v2515_v34 }
 0x282   :  { %5674 = vmatprep.subr.bf16.mxu1 %v8910_v37  ;;  %v2516_v36 = vld [vmem:[#allocation8 + $0x4a8] sm:$0xff] }
 0x283   :  { %v8950_v41 = vcombine.high %v2512_v35, %v2516_v36  ;;  %v8949_v51 = vcombine.low %v2512_v35, %v2516_v36  ;;  %v2567_v35 = vld [vmem:[#allocation8 + $0x640] sm:$0xff] }
 0x284   :  { %5511 = vmatpush1.bf16.msra.mxu0 %v8907_v42  ;;  %v2519_v42 = vld [vmem:[#allocation8 + $0x4c0] sm:$0xff] }
 0x285   :  { %5675 = vmatpush1.bf16.msra.mxu1 %v8909_v43  ;;  %5512 = vmatprep.subr.bf16.mxu0 %v8916_v48  ;;  %v2523_v43 = vld [vmem:[#allocation8 + $0x4e0] sm:$0xff]  ;;  %v2520_v48 = vld [vmem:[#allocation8 + $0x4c8] sm:$0xff] }
 0x286   :  { %5676 = vmatprep.subr.bf16.mxu1 %v8918_v49  ;;  %v2524_v49 = vld [vmem:[#allocation8 + $0x4e8] sm:$0xff]  ;;  %v8956_v52 = vcombine.high %v2519_v42, %v2523_v43  ;;  %v8955_v58 = vcombine.low %v2519_v42, %v2523_v43  ;;  %v2571_v36 = vld [vmem:[#allocation8 + $0x660] sm:$0xff] }
 0x287   :  { %v8958_v53 = vcombine.high %v2520_v48, %v2524_v49  ;;  %v8957_v59 = vcombine.low %v2520_v48, %v2524_v49  ;;  %v9004_v42 = vcombine.high %v2567_v35, %v2571_v36  ;;  %v2575_v48 = vld [vmem:[#allocation8 + $0x680] sm:$0xff] }
 0x288   :  { %5513 = vmatpush1.bf16.msra.mxu0 %v8915_v63  ;;  %v2527_v63 = vld [vmem:[#allocation8 + $0x500] sm:$0xff] }
 0x289   :  { %5677 = vmatpush1.bf16.msra.mxu1 %v8917_v55  ;;  %5514 = vmatprep.subr.bf16.mxu0 %v8924_v56  ;;  %v2531_v55 = vld [vmem:[#allocation8 + $0x520] sm:$0xff]  ;;  %v2528_v56 = vld [vmem:[#allocation8 + $0x508] sm:$0xff] }
 0x28a   :  { %5678 = vmatprep.subr.bf16.mxu1 %v8926_v57  ;;  %v2532_v57 = vld [vmem:[#allocation8 + $0x528] sm:$0xff]  ;;  %v8964_v60 = vcombine.high %v2527_v63, %v2531_v55  ;;  %v8963_v4 = vcombine.low %v2527_v63, %v2531_v55  ;;  %v2579_v49 = vld [vmem:[#allocation8 + $0x6a0] sm:$0xff] }
 0x28b   :  { %v8966_v61 = vcombine.high %v2528_v56, %v2532_v57  ;;  %v8965_v5 = vcombine.low %v2528_v56, %v2532_v57  ;;  %v9012_v63 = vcombine.high %v2575_v48, %v2579_v49  ;;  %v2583_v56 = vld [vmem:[#allocation8 + $0x6c0] sm:$0xff] }
 0x28c   :  { %5515 = vmatpush1.bf16.msra.mxu0 %v8923_v1  ;;  %v2535_v1 = vld [vmem:[#allocation8 + $0x540] sm:$0xff] }
 0x28d   :  { %5679 = vmatpush1.bf16.msra.mxu1 %v8925_v2  ;;  %5525 = vmatprep.subr.bf16.mxu0 %v8932_v3  ;;  %v2539_v2 = vld [vmem:[#allocation8 + $0x560] sm:$0xff]  ;;  %v2536_v3 = vld [vmem:[#allocation8 + $0x548] sm:$0xff] }
 0x28e   :  { %5689 = vmatprep.subr.bf16.mxu1 %v8934_v0  ;;  %v2540_v0 = vld [vmem:[#allocation8 + $0x568] sm:$0xff]  ;;  %v2587_v57 = vld [vmem:[#allocation8 + $0x6e0] sm:$0xff] }
 0x2a2   :  { %v2098_v30 = vpop.f32.mrb[4].mxu0  ;;  %v10728_v10 = vpop.f32.mrb[4].mxu1 }
 0x2a3   :  { %v9684_v11 = vadd.f32 %v2098_v30, %v706_v7  ;;  %v2100_v12 = vpop.f32.mrb[5].mxu0  ;;  %v2182_v14 = vpop.f32.mrb[5].mxu1  ;;  %v8972_v7 = vcombine.high %v2535_v1, %v2539_v2  ;;  %v2547_v30 = vld [vmem:[#allocation8 + $0x5a0] sm:$0xff] }
 0x2a4   :  { %v9685_v15 = vadd.f32 %v2100_v12, %v710_v8  ;;  %v9687_v46 = vadd.f32 %v2182_v14, %v718_v9  ;;  %v2102_v27 = vpop.f32.mrb[6].mxu0  ;;  %v2184_v16 = vpop.f32.mrb[6].mxu1  ;;  %v8974_v8 = vcombine.high %v2536_v3, %v2540_v0  ;;  %v2543_v9 = vld [vmem:[#allocation8 + $0x580] sm:$0xff]  ;;  %v2548_v12 = vld [vmem:[#allocation8 + $0x5a8] sm:$0xff]  ;;  %v8971_v14 = vcombine.low %v2535_v1, %v2539_v2 }
 0x2a5   :  { %v2351_v17 = vmax.f32 %v9684_v11, 0.0  ;;  %v2103_v18 = vpop.f32.mrb[7].mxu0  ;;  %v2185_v19 = vpop.f32.mrb[7].mxu1  ;;  %v2544_v11 = vld [vmem:[#allocation8 + $0x588] sm:$0xff]  ;;  %v2551_v16 = vld [vmem:[#allocation8 + $0x5c0] sm:$0xff]  ;;  %v9020_v1 = vcombine.high %v2583_v56, %v2587_v57 }
 0x2a6   :  { %v2352_v20 = vmax.f32 %v9685_v15, 0.0  ;;  %v2354_v22 = vmax.f32 %v9687_v46, 0.0  ;;  %v8973_v15 = vcombine.low %v2536_v3, %v2540_v0  ;;  %v8980_v46 = vcombine.high %v2543_v9, %v2547_v30  ;;  %v2552_v18 = vld [vmem:[#allocation8 + $0x5c8] sm:$0xff]  ;;  %v2591_v3 = vld [vmem:[#allocation8 + $0x700] sm:$0xff] }
 0x2a7   :  { %v10732_v29 = vpack.c.bf16 %v2351_v17, %v2351_v17  ;;  %v8982_v27 = vcombine.high %v2544_v11, %v2548_v12  ;;  %v2555_v17 = vld [vmem:[#allocation8 + $0x5e0] sm:$0xff]  ;;  %v2556_v19 = vld [vmem:[#allocation8 + $0x5e8] sm:$0xff]  ;;  %v8981_v21 = vcombine.low %v2544_v11, %v2548_v12 }
 0x2a8   :  { %v10730_v25 = vpack.c.bf16 %v2352_v20, %v2352_v20  ;;  %v10736_v37 = vpack.c.bf16 %v2354_v22, %v2354_v22  ;;  %v8979_v20 = vcombine.low %v2543_v9, %v2547_v30  ;;  %v8988_v22 = vcombine.high %v2551_v16, %v2555_v17  ;;  %v2595_v0 = vld [vmem:[#allocation8 + $0x720] sm:$0xff] }
 0x2a9   :  { %v8990_v23 = vcombine.high %v2552_v18, %v2556_v19  ;;  %v8987_v31 = vcombine.low %v2551_v16, %v2555_v17  ;;  %v9028_v9 = vcombine.high %v2591_v3, %v2595_v0  ;;  %v2599_v11 = vld [vmem:[#allocation8 + $0x740] sm:$0xff] }
 0x2aa   :  { %5516 = vmatprep.mubr.bf16.mxu0 %v10730_v25  ;;  %5680 = vmatprep.mubr.bf16.mxu1 %v10730_v25  ;;  %v2603_v12 = vld [vmem:[#allocation8 + $0x760] sm:$0xff] }
 0x2ab   :  { %5517 = vmatmul.mubr.bf16.vlgmr.msra.gmra.mrb[12].mxu0 %v10732_v29  ;;  %5681 = vmatmul.mubr.bf16.vlgmr.msra.gmra.mrb[12].mxu1 %v10732_v29  ;;  %v9036_v16 = vcombine.high %v2599_v11, %v2603_v12 }
 0x2ac   :  { %5526 = vmatpush1.bf16.msra.mxu0 %v8931_v26  ;;  %5690 = vmatpush1.bf16.msra.mxu1 %v8933_v28  ;;  %v2560_v26 = vld [vmem:[#allocation8 + $0x608] sm:$0xff] }
 0x2ad   :  { %5557 = vmatprep.mubr.bf16.mxu0 %v10736_v37  ;;  %5721 = vmatprep.mubr.bf16.mxu1 %v10736_v37  ;;  %v2564_v28 = vld [vmem:[#allocation8 + $0x628] sm:$0xff] }
 0x2ae   :  { %5527 = vmatprep.subr.bf16.mxu0 %v8940_v32  ;;  %5691 = vmatprep.subr.bf16.mxu1 %v8942_v33  ;;  %v8989_v32 = vcombine.low %v2552_v18, %v2556_v19  ;;  %v8996_v33 = vcombine.high %v2559_v24, %v2563_v13  ;;  %v8998_v34 = vcombine.high %v2560_v26, %v2564_v28  ;;  %v2607_v18 = vld [vmem:[#allocation8 + $0x780] sm:$0xff] }
 0x2af   :  { %v2611_v19 = vld [vmem:[#allocation8 + $0x7a0] sm:$0xff] }
 0x2b0   :  { %5528 = vmatpush1.bf16.msra.mxu0 %v8939_v38  ;;  %5692 = vmatpush1.bf16.msra.mxu1 %v8941_v39  ;;  %v2568_v38 = vld [vmem:[#allocation8 + $0x648] sm:$0xff] }
 0x2b1   :  { %5529 = vmatprep.subr.bf16.mxu0 %v8948_v40  ;;  %5693 = vmatprep.subr.bf16.mxu1 %v8950_v41  ;;  %v2572_v39 = vld [vmem:[#allocation8 + $0x668] sm:$0xff]  ;;  %v8995_v40 = vcombine.low %v2559_v24, %v2563_v13  ;;  %v8997_v41 = vcombine.low %v2560_v26, %v2564_v28  ;;  %v714_v24 = vrot.slane %v10720_v6, %v10703_v54  ;;  %v2615_v28 = vld [vmem:[#allocation8 + $0x7c0] sm:$0xff] }
 0x2b2   :  { %v9006_v43 = vcombine.high %v2568_v38, %v2572_v39  ;;  %v9044_v13 = vcombine.high %v2607_v18, %v2611_v19 }
 0x2b4   :  { %5530 = vmatpush1.bf16.msra.mxu0 %v8947_v50  ;;  %5694 = vmatpush1.bf16.msra.mxu1 %v8949_v51  ;;  %v2576_v50 = vld [vmem:[#allocation8 + $0x688] sm:$0xff] }
 0x2b5   :  { %5531 = vmatprep.subr.bf16.mxu0 %v8956_v52  ;;  %5695 = vmatprep.subr.bf16.mxu1 %v8958_v53  ;;  %v2580_v51 = vld [vmem:[#allocation8 + $0x6a8] sm:$0xff]  ;;  %v9003_v52 = vcombine.low %v2567_v35, %v2571_v36  ;;  %v9005_v53 = vcombine.low %v2568_v38, %v2572_v39  ;;  %v9686_v36 = vadd.f32 %v10728_v10, %v714_v24  ;;  %v2667_v24 = vld [vmem:[#allocation8 + $0x960] sm:$0xff] }
 0x2b6   :  { %v9014_v55 = vcombine.high %v2576_v50, %v2580_v51  ;;  %v2632_v10 = vld [vmem:[#allocation8 + $0x848] sm:$0xff] }
 0x2b8   :  { %5532 = vmatpush1.bf16.msra.mxu0 %v8955_v58  ;;  %5696 = vmatpush1.bf16.msra.mxu1 %v8957_v59  ;;  %v2584_v58 = vld [vmem:[#allocation8 + $0x6c8] sm:$0xff] }
 0x2b9   :  { %5533 = vmatprep.subr.bf16.mxu0 %v8964_v60  ;;  %5697 = vmatprep.subr.bf16.mxu1 %v8966_v61  ;;  %v2588_v59 = vld [vmem:[#allocation8 + $0x6e8] sm:$0xff]  ;;  %v9011_v60 = vcombine.low %v2575_v48, %v2579_v49  ;;  %v9013_v61 = vcombine.low %v2576_v50, %v2580_v51  ;;  %v2353_v50 = vmax.f32 %v9686_v36, 0.0 }
 0x2ba   :  { %v9022_v2 = vcombine.high %v2584_v58, %v2588_v59  ;;  %v2672_v36 = vld [vmem:[#allocation8 + $0x988] sm:$0xff] }
 0x2bc   :  { %5534 = vmatpush1.bf16.msra.mxu0 %v8963_v4  ;;  %5698 = vmatpush1.bf16.msra.mxu1 %v8965_v5  ;;  %v2592_v4 = vld [vmem:[#allocation8 + $0x708] sm:$0xff] }
 0x2bd   :  { %5535 = vmatprep.subr.bf16.mxu0 %v8972_v7  ;;  %5699 = vmatprep.subr.bf16.mxu1 %v8974_v8  ;;  %v2596_v5 = vld [vmem:[#allocation8 + $0x728] sm:$0xff]  ;;  %v9019_v7 = vcombine.low %v2583_v56, %v2587_v57  ;;  %v9021_v8 = vcombine.low %v2584_v58, %v2588_v59  ;;  %v10745_v58 = vpack.c.bf16 %v2353_v50, %v2353_v50 }
 0x2be   :  { %v9030_v30 = vcombine.high %v2592_v4, %v2596_v5  ;;  %v2684_v50 = vld [vmem:[#allocation8 + $0x9e8] sm:$0xff] }
 0x2c0   :  { %5536 = vmatpush1.bf16.msra.mxu0 %v8971_v14  ;;  %5700 = vmatpush1.bf16.msra.mxu1 %v8973_v15  ;;  %v2600_v14 = vld [vmem:[#allocation8 + $0x748] sm:$0xff] }
 0x2c1   :  { %5537 = vmatprep.subr.bf16.mxu0 %v8980_v46  ;;  %5701 = vmatprep.subr.bf16.mxu1 %v8982_v27  ;;  %v2604_v15 = vld [vmem:[#allocation8 + $0x768] sm:$0xff]  ;;  %v9027_v46 = vcombine.low %v2591_v3, %v2595_v0  ;;  %v9029_v27 = vcombine.low %v2592_v4, %v2596_v5 }
 0x2c2   :  { %v9038_v17 = vcombine.high %v2600_v14, %v2604_v15  ;;  %v2644_v3 = vld [vmem:[#allocation8 + $0x8a8] sm:$0xff] }
 0x2c4   :  { %5538 = vmatpush1.bf16.msra.mxu0 %v8979_v20  ;;  %5702 = vmatpush1.bf16.msra.mxu1 %v8981_v21  ;;  %v2608_v20 = vld [vmem:[#allocation8 + $0x788] sm:$0xff] }
 0x2c5   :  { %5539 = vmatprep.subr.bf16.mxu0 %v8988_v22  ;;  %5703 = vmatprep.subr.bf16.mxu1 %v8990_v23  ;;  %v2612_v21 = vld [vmem:[#allocation8 + $0x7a8] sm:$0xff]  ;;  %v9035_v22 = vcombine.low %v2599_v11, %v2603_v12  ;;  %v9037_v23 = vcombine.low %v2600_v14, %v2604_v15 }
 0x2c6   :  { %v9046_v26 = vcombine.high %v2608_v20, %v2612_v21  ;;  %v9045_v35 = vcombine.low %v2608_v20, %v2612_v21  ;;  %v2652_v11 = vld [vmem:[#allocation8 + $0x8e8] sm:$0xff] }
 0x2c8   :  { %5540 = vmatpush1.bf16.msra.mxu0 %v8987_v31  ;;  %5704 = vmatpush1.bf16.msra.mxu1 %v8989_v32  ;;  %v2619_v31 = vld [vmem:[#allocation8 + $0x7e0] sm:$0xff]  ;;  %v2616_v32 = vld [vmem:[#allocation8 + $0x7c8] sm:$0xff] }
 0x2c9   :  { %5541 = vmatprep.subr.bf16.mxu0 %v8996_v33  ;;  %5705 = vmatprep.subr.bf16.mxu1 %v8998_v34  ;;  %v2620_v33 = vld [vmem:[#allocation8 + $0x7e8] sm:$0xff]  ;;  %v9043_v34 = vcombine.low %v2607_v18, %v2611_v19  ;;  %v9052_v38 = vcombine.high %v2615_v28, %v2619_v31  ;;  %v9051_v48 = vcombine.low %v2615_v28, %v2619_v31 }
 0x2ca   :  { %v9054_v39 = vcombine.high %v2616_v32, %v2620_v33  ;;  %v9053_v49 = vcombine.low %v2616_v32, %v2620_v33  ;;  %v2660_v18 = vld [vmem:[#allocation8 + $0x928] sm:$0xff] }
 0x2cc   :  { %5542 = vmatpush1.bf16.msra.mxu0 %v8995_v40  ;;  %5706 = vmatpush1.bf16.msra.mxu1 %v8997_v41  ;;  %v2623_v40 = vld [vmem:[#allocation8 + $0x800] sm:$0xff] }
 0x2cd   :  { %5543 = vmatprep.subr.bf16.mxu0 %v9004_v42  ;;  %5707 = vmatprep.subr.bf16.mxu1 %v9006_v43  ;;  %v2627_v41 = vld [vmem:[#allocation8 + $0x820] sm:$0xff]  ;;  %v2624_v42 = vld [vmem:[#allocation8 + $0x808] sm:$0xff] }
 0x2ce   :  { %v2628_v43 = vld [vmem:[#allocation8 + $0x828] sm:$0xff]  ;;  %v9060_v51 = vcombine.high %v2623_v40, %v2627_v41  ;;  %v9059_v56 = vcombine.low %v2623_v40, %v2627_v41 }
 0x2cf   :  { %v9061_v57 = vcombine.low %v2624_v42, %v2628_v43 }
 0x2d0   :  { %5544 = vmatpush1.bf16.msra.mxu0 %v9003_v52  ;;  %5708 = vmatpush1.bf16.msra.mxu1 %v9005_v53  ;;  %v9062_v52 = vcombine.high %v2624_v42, %v2628_v43  ;;  %v2631_v53 = vld [vmem:[#allocation8 + $0x840] sm:$0xff] }
 0x2d1   :  { %5545 = vmatprep.subr.bf16.mxu0 %v9012_v63  ;;  %5709 = vmatprep.subr.bf16.mxu1 %v9014_v55  ;;  %v2635_v63 = vld [vmem:[#allocation8 + $0x860] sm:$0xff]  ;;  %v2636_v55 = vld [vmem:[#allocation8 + $0x868] sm:$0xff] }
 0x2d2   :  { %v9068_v59 = vcombine.high %v2631_v53, %v2635_v63  ;;  %v9067_v0 = vcombine.low %v2631_v53, %v2635_v63  ;;  %v9069_v4 = vcombine.low %v2632_v10, %v2636_v55  ;;  %v2679_v43 = vld [vmem:[#allocation8 + $0x9c0] sm:$0xff] }
 0x2d4   :  { %5546 = vmatpush1.bf16.msra.mxu0 %v9011_v60  ;;  %5710 = vmatpush1.bf16.msra.mxu1 %v9013_v61  ;;  %v9070_v60 = vcombine.high %v2632_v10, %v2636_v55  ;;  %v2639_v61 = vld [vmem:[#allocation8 + $0x880] sm:$0xff] }
 0x2d5   :  { %5547 = vmatprep.subr.bf16.mxu0 %v9020_v1  ;;  %5711 = vmatprep.subr.bf16.mxu1 %v9022_v2  ;;  %v2643_v1 = vld [vmem:[#allocation8 + $0x8a0] sm:$0xff]  ;;  %v2640_v2 = vld [vmem:[#allocation8 + $0x888] sm:$0xff] }
 0x2d6   :  { %v9076_v5 = vcombine.high %v2639_v61, %v2643_v1  ;;  %v9075_v12 = vcombine.low %v2639_v61, %v2643_v1  ;;  %v9077_v14 = vcombine.low %v2640_v2, %v2644_v3  ;;  %v2687_v10 = vld [vmem:[#allocation8 + $0xa00] sm:$0xff] }
 0x2d7   :  { %v2691_v55 = vld [vmem:[#allocation8 + $0xa20] sm:$0xff] }
 0x2d8   :  { %5548 = vmatpush1.bf16.msra.mxu0 %v9019_v7  ;;  %5712 = vmatpush1.bf16.msra.mxu1 %v9021_v8  ;;  %v9078_v7 = vcombine.high %v2640_v2, %v2644_v3  ;;  %v2647_v8 = vld [vmem:[#allocation8 + $0x8c0] sm:$0xff]  ;;  %v9124_v61 = vcombine.high %v2687_v10, %v2691_v55 }
 0x2d9   :  { %5549 = vmatprep.subr.bf16.mxu0 %v9028_v9  ;;  %5713 = vmatprep.subr.bf16.mxu1 %v9030_v30  ;;  %v2651_v9 = vld [vmem:[#allocation8 + $0x8e0] sm:$0xff]  ;;  %v2648_v30 = vld [vmem:[#allocation8 + $0x8c8] sm:$0xff] }
 0x2da   :  { %v9084_v15 = vcombine.high %v2647_v8, %v2651_v9  ;;  %v9083_v19 = vcombine.low %v2647_v8, %v2651_v9  ;;  %v9085_v20 = vcombine.low %v2648_v30, %v2652_v11  ;;  %v2695_v2 = vld [vmem:[#allocation8 + $0xa40] sm:$0xff] }
 0x2db   :  { %v2699_v3 = vld [vmem:[#allocation8 + $0xa60] sm:$0xff] }
 0x2dc   :  { %5550 = vmatpush1.bf16.msra.mxu0 %v9027_v46  ;;  %5714 = vmatpush1.bf16.msra.mxu1 %v9029_v27  ;;  %v9086_v46 = vcombine.high %v2648_v30, %v2652_v11  ;;  %v2655_v27 = vld [vmem:[#allocation8 + $0x900] sm:$0xff]  ;;  %v9132_v8 = vcombine.high %v2695_v2, %v2699_v3 }
 0x2dd   :  { %5551 = vmatprep.subr.bf16.mxu0 %v9036_v16  ;;  %5715 = vmatprep.subr.bf16.mxu1 %v9038_v17  ;;  %v2659_v16 = vld [vmem:[#allocation8 + $0x920] sm:$0xff]  ;;  %v2656_v17 = vld [vmem:[#allocation8 + $0x908] sm:$0xff] }
 0x2de   :  { %v9092_v21 = vcombine.high %v2655_v27, %v2659_v16  ;;  %v9091_v28 = vcombine.low %v2655_v27, %v2659_v16  ;;  %v9093_v31 = vcombine.low %v2656_v17, %v2660_v18  ;;  %v2703_v30 = vld [vmem:[#allocation8 + $0xa80] sm:$0xff] }
 0x2df   :  { %v2707_v11 = vld [vmem:[#allocation8 + $0xaa0] sm:$0xff] }
 0x2e0   :  { %5552 = vmatpush1.bf16.msra.mxu0 %v9035_v22  ;;  %5716 = vmatpush1.bf16.msra.mxu1 %v9037_v23  ;;  %v9094_v22 = vcombine.high %v2656_v17, %v2660_v18  ;;  %v2663_v23 = vld [vmem:[#allocation8 + $0x940] sm:$0xff]  ;;  %v9140_v27 = vcombine.high %v2703_v30, %v2707_v11 }
 0x2e1   :  { %5553 = vmatprep.subr.bf16.mxu0 %v9044_v13  ;;  %5717 = vmatprep.subr.bf16.mxu1 %v9046_v26  ;;  %v2664_v13 = vld [vmem:[#allocation8 + $0x948] sm:$0xff]  ;;  %v9100_v32 = vcombine.high %v2663_v23, %v2667_v24  ;;  %v2711_v17 = vld [vmem:[#allocation8 + $0xac0] sm:$0xff] }
 0x2e2   :  { %v2668_v26 = vld [vmem:[#allocation8 + $0x968] sm:$0xff]  ;;  %v2715_v18 = vld [vmem:[#allocation8 + $0xae0] sm:$0xff] }
 0x2e3   :  { %v9102_v33 = vcombine.high %v2664_v13, %v2668_v26  ;;  %v9101_v40 = vcombine.low %v2664_v13, %v2668_v26  ;;  %v2719_v13 = vld [vmem:[#allocation8 + $0xb00] sm:$0xff] }
 0x2e4   :  { %5554 = vmatpush1.bf16.msra.mxu0 %v9043_v34  ;;  %5718 = vmatpush1.bf16.msra.mxu1 %v9045_v35  ;;  %v2671_v34 = vld [vmem:[#allocation8 + $0x980] sm:$0xff] }
 0x2e5   :  { %5555 = vmatprep.subr.bf16.mxu0 %v9052_v38  ;;  %5719 = vmatprep.subr.bf16.mxu1 %v9054_v39  ;;  %v2675_v35 = vld [vmem:[#allocation8 + $0x9a0] sm:$0xff]  ;;  %v2676_v38 = vld [vmem:[#allocation8 + $0x9a8] sm:$0xff]  ;;  %v9099_v39 = vcombine.low %v2663_v23, %v2667_v24  ;;  %v9148_v23 = vcombine.high %v2711_v17, %v2715_v18 }
 0x2e6   :  { %v9108_v41 = vcombine.high %v2671_v34, %v2675_v35  ;;  %v9110_v42 = vcombine.high %v2672_v36, %v2676_v38  ;;  %v2723_v26 = vld [vmem:[#allocation8 + $0xb20] sm:$0xff] }
 0x2e8   :  { %5556 = vmatpush1.bf16.msra.mxu0 %v9051_v48  ;;  %5720 = vmatpush1.bf16.msra.mxu1 %v9053_v49  ;;  %v2683_v48 = vld [vmem:[#allocation8 + $0x9e0] sm:$0xff]  ;;  %v2680_v49 = vld [vmem:[#allocation8 + $0x9c8] sm:$0xff] }
 0x2e9   :  { %5566 = vmatprep.subr.bf16.mxu0 %v9060_v51  ;;  %5730 = vmatprep.subr.bf16.mxu1 %v9062_v52  ;;  %v9107_v51 = vcombine.low %v2671_v34, %v2675_v35  ;;  %v9109_v52 = vcombine.low %v2672_v36, %v2676_v38  ;;  %v9116_v53 = vcombine.high %v2679_v43, %v2683_v48  ;;  %v2727_v36 = vld [vmem:[#allocation8 + $0xb40] sm:$0xff] }
 0x2ea   :  { %v9118_v63 = vcombine.high %v2680_v49, %v2684_v50  ;;  %v9156_v34 = vcombine.high %v2719_v13, %v2723_v26  ;;  %v2731_v38 = vld [vmem:[#allocation8 + $0xb60] sm:$0xff] }
 0x2eb   :  { %5558 = vmatmul.mubr.bf16.vlgmr.msra.gmra.mrb[12].mxu0 %v10745_v58  ;;  %5722 = vmatmul.mubr.bf16.vlgmr.msra.gmra.mrb[12].mxu1 %v10745_v58 }
 0x2ec   :  { %5567 = vmatpush1.bf16.msra.mxu0 %v9059_v56  ;;  %5731 = vmatpush1.bf16.msra.mxu1 %v9061_v57  ;;  %v2688_v56 = vld [vmem:[#allocation8 + $0xa08] sm:$0xff] }
 0x2ed   :  { %5568 = vmatprep.subr.bf16.mxu0 %v9068_v59  ;;  %5732 = vmatprep.subr.bf16.mxu1 %v9070_v60  ;;  %v2692_v57 = vld [vmem:[#allocation8 + $0xa28] sm:$0xff]  ;;  %v9115_v59 = vcombine.low %v2679_v43, %v2683_v48  ;;  %v9117_v60 = vcombine.low %v2680_v49, %v2684_v50  ;;  %v9164_v43 = vcombine.high %v2727_v36, %v2731_v38  ;;  %v2735_v49 = vld [vmem:[#allocation8 + $0xb80] sm:$0xff] }
 0x2ee   :  { %v9126_v1 = vcombine.high %v2688_v56, %v2692_v57  ;;  %v2739_v50 = vld [vmem:[#allocation8 + $0xba0] sm:$0xff] }
 0x2f0   :  { %5569 = vmatpush1.bf16.msra.mxu0 %v9067_v0  ;;  %5733 = vmatpush1.bf16.msra.mxu1 %v9069_v4  ;;  %v2696_v0 = vld [vmem:[#allocation8 + $0xa48] sm:$0xff] }
 0x2f1   :  { %5570 = vmatprep.subr.bf16.mxu0 %v9076_v5  ;;  %5734 = vmatprep.subr.bf16.mxu1 %v9078_v7  ;;  %v2700_v4 = vld [vmem:[#allocation8 + $0xa68] sm:$0xff]  ;;  %v9123_v5 = vcombine.low %v2687_v10, %v2691_v55  ;;  %v9125_v7 = vcombine.low %v2688_v56, %v2692_v57  ;;  %v725_v55 = vsub.s32 5, %v10669_v44  ;;  %v9172_v56 = vcombine.high %v2735_v49, %v2739_v50 }
 0x2f2   :  { %v9134_v9 = vcombine.high %v2696_v0, %v2700_v4 }
 0x2f4   :  { %5571 = vmatpush1.bf16.msra.mxu0 %v9075_v12  ;;  %5735 = vmatpush1.bf16.msra.mxu1 %v9077_v14  ;;  %v2704_v12 = vld [vmem:[#allocation8 + $0xa88] sm:$0xff] }
 0x2f5   :  { %5572 = vmatprep.subr.bf16.mxu0 %v9084_v15  ;;  %5736 = vmatprep.subr.bf16.mxu1 %v9086_v46  ;;  %v2708_v14 = vld [vmem:[#allocation8 + $0xaa8] sm:$0xff]  ;;  %v9131_v15 = vcombine.low %v2695_v2, %v2699_v3  ;;  %v9133_v46 = vcombine.low %v2696_v0, %v2700_v4  ;;  %v9171_v0 = vcombine.low %v2735_v49, %v2739_v50  ;;  %v2771_v50 = vld [vmem:[#allocation8 + $0xca0] sm:$0xff] }
 0x2f6   :  { %v9142_v16 = vcombine.high %v2704_v12, %v2708_v14  ;;  %v2748_v2 = vld [vmem:[#allocation8 + $0xbe8] sm:$0xff] }
 0x2f8   :  { %5573 = vmatpush1.bf16.msra.mxu0 %v9083_v19  ;;  %5737 = vmatpush1.bf16.msra.mxu1 %v9085_v20  ;;  %v2712_v19 = vld [vmem:[#allocation8 + $0xac8] sm:$0xff] }
 0x2f9   :  { %5574 = vmatprep.subr.bf16.mxu0 %v9092_v21  ;;  %5738 = vmatprep.subr.bf16.mxu1 %v9094_v22  ;;  %v2716_v20 = vld [vmem:[#allocation8 + $0xae8] sm:$0xff]  ;;  %v9139_v21 = vcombine.low %v2703_v30, %v2707_v11  ;;  %v9141_v22 = vcombine.low %v2704_v12, %v2708_v14  ;;  %v2751_v30 = vld [vmem:[#allocation8 + $0xc00] sm:$0xff] }
 0x2fa   :  { %v9150_v24 = vcombine.high %v2712_v19, %v2716_v20  ;;  %v2755_v12 = vld [vmem:[#allocation8 + $0xc20] sm:$0xff]  ;;  %v2752_v14 = vld [vmem:[#allocation8 + $0xc08] sm:$0xff] }
 0x2fc   :  { %5575 = vmatpush1.bf16.msra.mxu0 %v9091_v28  ;;  %5739 = vmatpush1.bf16.msra.mxu1 %v9093_v31  ;;  %v2720_v28 = vld [vmem:[#allocation8 + $0xb08] sm:$0xff] }
 0x2fd   :  { %5576 = vmatprep.subr.bf16.mxu0 %v9100_v32  ;;  %5740 = vmatprep.subr.bf16.mxu1 %v9102_v33  ;;  %v2724_v31 = vld [vmem:[#allocation8 + $0xb28] sm:$0xff]  ;;  %v9147_v32 = vcombine.low %v2711_v17, %v2715_v18  ;;  %v9149_v33 = vcombine.low %v2712_v19, %v2716_v20 }
 0x2fe   :  { %v9158_v35 = vcombine.high %v2720_v28, %v2724_v31 }
 0x300   :  { %5577 = vmatpush1.bf16.msra.mxu0 %v9099_v39  ;;  %5741 = vmatpush1.bf16.msra.mxu1 %v9101_v40  ;;  %v2728_v39 = vld [vmem:[#allocation8 + $0xb48] sm:$0xff] }
 0x301   :  { %5578 = vmatprep.subr.bf16.mxu0 %v9108_v41  ;;  %5742 = vmatprep.subr.bf16.mxu1 %v9110_v42  ;;  %v2732_v40 = vld [vmem:[#allocation8 + $0xb68] sm:$0xff]  ;;  %v9155_v41 = vcombine.low %v2719_v13, %v2723_v26  ;;  %v9157_v42 = vcombine.low %v2720_v28, %v2724_v31  ;;  %v9188_v26 = vcombine.high %v2751_v30, %v2755_v12 }
 0x302   :  { %v9166_v48 = vcombine.high %v2728_v39, %v2732_v40  ;;  %v9165_v10 = vcombine.low %v2728_v39, %v2732_v40  ;;  %v9187_v40 = vcombine.low %v2751_v30, %v2755_v12  ;;  %v2784_v30 = vld [vmem:[#allocation8 + $0xd08] sm:$0xff] }
 0x304   :  { %5579 = vmatpush1.bf16.msra.mxu0 %v9107_v51  ;;  %5743 = vmatpush1.bf16.msra.mxu1 %v9109_v52  ;;  %v2736_v51 = vld [vmem:[#allocation8 + $0xb88] sm:$0xff] }
 0x305   :  { %5580 = vmatprep.subr.bf16.mxu0 %v9116_v53  ;;  %5744 = vmatprep.subr.bf16.mxu1 %v9118_v63  ;;  %v2740_v52 = vld [vmem:[#allocation8 + $0xba8] sm:$0xff]  ;;  %v721_v53 = vsub.s32 4, %v10669_v44  ;;  %v9163_v63 = vcombine.low %v2727_v36, %v2731_v38 }
 0x306   :  { %v9174_v57 = vcombine.high %v2736_v51, %v2740_v52  ;;  %v9173_v4 = vcombine.low %v2736_v51, %v2740_v52  ;;  %v2760_v36 = vld [vmem:[#allocation8 + $0xc48] sm:$0xff] }
 0x307   :  { %v722_v3 = vrot.slane %v10720_v6, %v721_v53  ;;  %v2764_v38 = vld [vmem:[#allocation8 + $0xc68] sm:$0xff] }
 0x308   :  { %5581 = vmatpush1.bf16.msra.mxu0 %v9115_v59  ;;  %5745 = vmatpush1.bf16.msra.mxu1 %v9117_v60  ;;  %v733_v59 = vsub.s32 7, %v10669_v44  ;;  %v2743_v60 = vld [vmem:[#allocation8 + $0xbc0] sm:$0xff]  ;;  %v9198_v49 = vcombine.high %v2760_v36, %v2764_v38  ;;  %v2768_v51 = vld [vmem:[#allocation8 + $0xc88] sm:$0xff] }
 0x309   :  { %5582 = vmatprep.subr.bf16.mxu0 %v9124_v61  ;;  %5746 = vmatprep.subr.bf16.mxu1 %v9126_v1  ;;  %v2747_v61 = vld [vmem:[#allocation8 + $0xbe0] sm:$0xff]  ;;  %v2744_v1 = vld [vmem:[#allocation8 + $0xbc8] sm:$0xff] }
 0x30a   :  { %v9179_v20 = vcombine.low %v2743_v60, %v2747_v61  ;;  %v2772_v52 = vld [vmem:[#allocation8 + $0xca8] sm:$0xff] }
 0x30c   :  { %5583 = vmatpush1.bf16.msra.mxu0 %v9123_v5  ;;  %5747 = vmatpush1.bf16.msra.mxu1 %v9125_v7  ;;  %v726_v5 = vrot.slane %v10720_v6, %v725_v55  ;;  %v734_v7 = vrot.slane %v10720_v6, %v733_v59 }
 0x30d   :  { %5584 = vmatprep.subr.bf16.mxu0 %v9132_v8  ;;  %5748 = vmatprep.subr.bf16.mxu1 %v9134_v9  ;;  %v9180_v8 = vcombine.high %v2743_v60, %v2747_v61  ;;  %v9182_v9 = vcombine.high %v2744_v1, %v2748_v2  ;;  %v9206_v60 = vcombine.high %v2768_v51, %v2772_v52  ;;  %v2775_v61 = vld [vmem:[#allocation8 + $0xcc0] sm:$0xff] }
 0x310   :  { %5585 = vmatpush1.bf16.msra.mxu0 %v9131_v15  ;;  %5749 = vmatpush1.bf16.msra.mxu1 %v9133_v46  ;;  %v2756_v15 = vld [vmem:[#allocation8 + $0xc28] sm:$0xff] }
 0x311   :  { %5586 = vmatprep.subr.bf16.mxu0 %v9140_v27  ;;  %5750 = vmatprep.subr.bf16.mxu1 %v9142_v16  ;;  %v9190_v28 = vcombine.high %v2752_v14, %v2756_v15 }
 0x314   :  { %5587 = vmatpush1.bf16.msra.mxu0 %v9139_v21  ;;  %5751 = vmatpush1.bf16.msra.mxu1 %v9141_v22  ;;  %v9181_v21 = vcombine.low %v2744_v1, %v2748_v2  ;;  %v2779_v1 = vld [vmem:[#allocation8 + $0xce0] sm:$0xff]  ;;  %v2776_v2 = vld [vmem:[#allocation8 + $0xcc8] sm:$0xff] }
 0x315   :  { %5588 = vmatprep.subr.bf16.mxu0 %v9148_v23  ;;  %5752 = vmatprep.subr.bf16.mxu1 %v9150_v24  ;;  %v9211_v12 = vcombine.low %v2775_v61, %v2779_v1 }
 0x318   :  { %5589 = vmatpush1.bf16.msra.mxu0 %v9147_v32  ;;  %5753 = vmatpush1.bf16.msra.mxu1 %v9149_v33  ;;  %v2759_v33 = vld [vmem:[#allocation8 + $0xc40] sm:$0xff] }
 0x319   :  { %5590 = vmatprep.subr.bf16.mxu0 %v9156_v34  ;;  %5754 = vmatprep.subr.bf16.mxu1 %v9158_v35  ;;  %v2763_v35 = vld [vmem:[#allocation8 + $0xc60] sm:$0xff] }
 0x31c   :  { %5591 = vmatpush1.bf16.msra.mxu0 %v9155_v41  ;;  %5755 = vmatpush1.bf16.msra.mxu1 %v9157_v42  ;;  %v9189_v41 = vcombine.low %v2752_v14, %v2756_v15 }
 0x31d   :  { %5592 = vmatprep.subr.bf16.mxu0 %v9164_v43  ;;  %5756 = vmatprep.subr.bf16.mxu1 %v9166_v48  ;;  %v2767_v43 = vld [vmem:[#allocation8 + $0xc80] sm:$0xff]  ;;  %v9196_v48 = vcombine.high %v2759_v33, %v2763_v35 }
 0x320   :  { %5593 = vmatpush1.bf16.msra.mxu0 %v9163_v63  ;;  %5757 = vmatpush1.bf16.msra.mxu1 %v9165_v10  ;;  %v9195_v10 = vcombine.low %v2759_v33, %v2763_v35  ;;  %v2807_v35 = vld [vmem:[#allocation8 + $0xdc0] sm:$0xff] }
 0x321   :  { %5594 = vmatprep.subr.bf16.mxu0 %v9172_v56  ;;  %5758 = vmatprep.subr.bf16.mxu1 %v9174_v57  ;;  %v9197_v56 = vcombine.low %v2760_v36, %v2764_v38  ;;  %v9204_v57 = vcombine.high %v2767_v43, %v2771_v50  ;;  %v2811_v36 = vld [vmem:[#allocation8 + $0xde0] sm:$0xff]  ;;  %v2808_v38 = vld [vmem:[#allocation8 + $0xdc8] sm:$0xff] }
 0x322   :  { %v2262_v11 = vpop.f32.mrb[8].mxu0 }
 0x323   :  { %v9688_v46 = vadd.f32 %v2262_v11, %v722_v3  ;;  %v10761_v27 = vpop.f32.mrb[8].mxu1  ;;  %v2264_v16 = vpop.f32.mrb[9].mxu0  ;;  %v2780_v3 = vld [vmem:[#allocation8 + $0xce8] sm:$0xff] }
 0x324   :  { %v9689_v17 = vadd.f32 %v2264_v16, %v726_v5  ;;  %v2346_v18 = vpop.f32.mrb[9].mxu1  ;;  %5595 = vmatpush1.bf16.msra.mxu0 %v9171_v0  ;;  %5759 = vmatpush1.bf16.msra.mxu1 %v9173_v4  ;;  %v2266_v19 = vpop.f32.mrb[10].mxu0  ;;  %v9203_v0 = vcombine.low %v2767_v43, %v2771_v50  ;;  %v9205_v4 = vcombine.low %v2768_v51, %v2772_v52  ;;  %v2788_v11 = vld [vmem:[#allocation8 + $0xd28] sm:$0xff]  ;;  %v2791_v16 = vld [vmem:[#allocation8 + $0xd40] sm:$0xff] }
 0x325   :  { %v2355_v22 = vmax.f32 %v9688_v46, 0.0  ;;  %v9691_v23 = vadd.f32 %v2346_v18, %v734_v7  ;;  %v2348_v24 = vpop.f32.mrb[10].mxu1  ;;  %v2267_v13 = vpop.f32.mrb[11].mxu0  ;;  %5596 = vmatprep.subr.bf16.mxu0 %v9180_v8  ;;  %5760 = vmatprep.subr.bf16.mxu1 %v9182_v9  ;;  %v9212_v5 = vcombine.high %v2775_v61, %v2779_v1  ;;  %v9214_v7 = vcombine.high %v2776_v2, %v2780_v3  ;;  %v2783_v8 = vld [vmem:[#allocation8 + $0xd00] sm:$0xff]  ;;  %v2792_v18 = vld [vmem:[#allocation8 + $0xd48] sm:$0xff] }
 0x326   :  { %v2356_v31 = vmax.f32 %v9689_v17, 0.0  ;;  %v2349_v32 = vpop.f32.mrb[11].mxu1  ;;  %v2787_v9 = vld [vmem:[#allocation8 + $0xd20] sm:$0xff]  ;;  %v9213_v14 = vcombine.low %v2776_v2, %v2780_v3  ;;  %v9222_v46 = vcombine.high %v2784_v30, %v2788_v11  ;;  %v2796_v19 = vld [vmem:[#allocation8 + $0xd68] sm:$0xff] }
 0x327   :  { %v2358_v34 = vmax.f32 %v9691_v23, 0.0  ;;  %v10765_v42 = vpack.c.bf16 %v2355_v22, %v2355_v22  ;;  %v9220_v15 = vcombine.high %v2783_v8, %v2787_v9  ;;  %v2795_v17 = vld [vmem:[#allocation8 + $0xd60] sm:$0xff]  ;;  %v9230_v23 = vcombine.high %v2792_v18, %v2796_v19  ;;  %v2816_v52 = vld [vmem:[#allocation8 + $0xe08] sm:$0xff] }
 0x328   :  { %v10763_v39 = vpack.c.bf16 %v2356_v31, %v2356_v31  ;;  %5597 = vmatpush1.bf16.msra.mxu0 %v9179_v20  ;;  %5761 = vmatpush1.bf16.msra.mxu1 %v9181_v21  ;;  %v9219_v20 = vcombine.low %v2783_v8, %v2787_v9  ;;  %v9221_v21 = vcombine.low %v2784_v30, %v2788_v11  ;;  %v2799_v24 = vld [vmem:[#allocation8 + $0xd80] sm:$0xff]  ;;  %v2824_v3 = vld [vmem:[#allocation8 + $0xe48] sm:$0xff] }
 0x329   :  { %5607 = vmatprep.subr.bf16.mxu0 %v9188_v26  ;;  %5771 = vmatprep.subr.bf16.mxu1 %v9190_v28  ;;  %v10769_v63 = vpack.c.bf16 %v2358_v34, %v2358_v34  ;;  %v9228_v22 = vcombine.high %v2791_v16, %v2795_v17  ;;  %v2803_v13 = vld [vmem:[#allocation8 + $0xda0] sm:$0xff]  ;;  %v2800_v26 = vld [vmem:[#allocation8 + $0xd88] sm:$0xff]  ;;  %v9227_v31 = vcombine.low %v2791_v16, %v2795_v17 }
 0x32a   :  { %5598 = vmatprep.mubr.bf16.mxu0 %v10763_v39  ;;  %5762 = vmatprep.mubr.bf16.mxu1 %v10763_v39  ;;  %v2804_v28 = vld [vmem:[#allocation8 + $0xda8] sm:$0xff]  ;;  %v9229_v32 = vcombine.low %v2792_v18, %v2796_v19  ;;  %v9236_v33 = vcombine.high %v2799_v24, %v2803_v13  ;;  %v2815_v50 = vld [vmem:[#allocation8 + $0xe00] sm:$0xff] }
 0x32b   :  { %5599 = vmatmul.mubr.bf16.vlgmr.msra.gmra.mrb[12].mxu0 %v10765_v42  ;;  %5763 = vmatmul.mubr.bf16.vlgmr.msra.gmra.mrb[12].mxu1 %v10765_v42  ;;  %v9238_v34 = vcombine.high %v2800_v26, %v2804_v28  ;;  %v9237_v43 = vcombine.low %v2800_v26, %v2804_v28  ;;  %v2819_v51 = vld [vmem:[#allocation8 + $0xe20] sm:$0xff]  ;;  %v2832_v11 = vld [vmem:[#allocation8 + $0xe88] sm:$0xff] }
 0x32c   :  { %5608 = vmatpush1.bf16.msra.mxu0 %v9187_v40  ;;  %5772 = vmatpush1.bf16.msra.mxu1 %v9189_v41  ;;  %v2812_v40 = vld [vmem:[#allocation8 + $0xde8] sm:$0xff]  ;;  %v9235_v41 = vcombine.low %v2799_v24, %v2803_v13  ;;  %v2823_v1 = vld [vmem:[#allocation8 + $0xe40] sm:$0xff] }
 0x32d   :  { %5639 = vmatprep.mubr.bf16.mxu0 %v10769_v63  ;;  %5803 = vmatprep.mubr.bf16.mxu1 %v10769_v63  ;;  %v2827_v2 = vld [vmem:[#allocation8 + $0xe60] sm:$0xff]  ;;  %v2840_v19 = vld [vmem:[#allocation8 + $0xec8] sm:$0xff] }
 0x32e   :  { %5609 = vmatprep.subr.bf16.mxu0 %v9196_v48  ;;  %5773 = vmatprep.subr.bf16.mxu1 %v9198_v49  ;;  %v9244_v48 = vcombine.high %v2807_v35, %v2811_v36  ;;  %v9246_v49 = vcombine.high %v2808_v38, %v2812_v40  ;;  %v2831_v9 = vld [vmem:[#allocation8 + $0xe80] sm:$0xff]  ;;  %v2848_v28 = vld [vmem:[#allocation8 + $0xf08] sm:$0xff] }
 0x32f   :  { %v2835_v30 = vld [vmem:[#allocation8 + $0xea0] sm:$0xff] }
 0x330   :  { %5610 = vmatpush1.bf16.msra.mxu0 %v9195_v10  ;;  %5774 = vmatpush1.bf16.msra.mxu1 %v9197_v56  ;;  %v2820_v10 = vld [vmem:[#allocation8 + $0xe28] sm:$0xff]  ;;  %v9243_v56 = vcombine.low %v2807_v35, %v2811_v36  ;;  %v2839_v17 = vld [vmem:[#allocation8 + $0xec0] sm:$0xff] }
 0x331   :  { %5611 = vmatprep.subr.bf16.mxu0 %v9204_v57  ;;  %5775 = vmatprep.subr.bf16.mxu1 %v9206_v60  ;;  %v9245_v57 = vcombine.low %v2808_v38, %v2812_v40  ;;  %v9252_v60 = vcombine.high %v2815_v50, %v2819_v51  ;;  %v9254_v61 = vcombine.high %v2816_v52, %v2820_v10  ;;  %v2843_v18 = vld [vmem:[#allocation8 + $0xee0] sm:$0xff]  ;;  %v2856_v40 = vld [vmem:[#allocation8 + $0xf48] sm:$0xff] }
 0x332   :  { %v2847_v13 = vld [vmem:[#allocation8 + $0xf00] sm:$0xff] }
 0x333   :  { %v2851_v26 = vld [vmem:[#allocation8 + $0xf20] sm:$0xff] }
 0x334   :  { %5612 = vmatpush1.bf16.msra.mxu0 %v9203_v0  ;;  %5776 = vmatpush1.bf16.msra.mxu1 %v9205_v4  ;;  %v2828_v0 = vld [vmem:[#allocation8 + $0xe68] sm:$0xff]  ;;  %v9251_v4 = vcombine.low %v2815_v50, %v2819_v51  ;;  %v2855_v36 = vld [vmem:[#allocation8 + $0xf40] sm:$0xff] }
 0x335   :  { %5613 = vmatprep.subr.bf16.mxu0 %v9212_v5  ;;  %5777 = vmatprep.subr.bf16.mxu1 %v9214_v7  ;;  %v9253_v5 = vcombine.low %v2816_v52, %v2820_v10  ;;  %v9260_v7 = vcombine.high %v2823_v1, %v2827_v2  ;;  %v9262_v8 = vcombine.high %v2824_v3, %v2828_v0  ;;  %v2859_v38 = vld [vmem:[#allocation8 + $0xf60] sm:$0xff] }
 0x336   :  { %v9292_v50 = vcombine.high %v2855_v36, %v2859_v38  ;;  %v2863_v52 = vld [vmem:[#allocation8 + $0xf80] sm:$0xff] }
 0x337   :  { %v2867_v10 = vld [vmem:[#allocation8 + $0xfa0] sm:$0xff] }
 0x338   :  { %5614 = vmatpush1.bf16.msra.mxu0 %v9211_v12  ;;  %5778 = vmatpush1.bf16.msra.mxu1 %v9213_v14  ;;  %v2836_v12 = vld [vmem:[#allocation8 + $0xea8] sm:$0xff]  ;;  %v9259_v14 = vcombine.low %v2823_v1, %v2827_v2  ;;  %v9300_v2 = vcombine.high %v2863_v52, %v2867_v10 }
 0x339   :  { %5615 = vmatprep.subr.bf16.mxu0 %v9220_v15  ;;  %5779 = vmatprep.subr.bf16.mxu1 %v9222_v46  ;;  %v9261_v15 = vcombine.low %v2824_v3, %v2828_v0  ;;  %v9268_v46 = vcombine.high %v2831_v9, %v2835_v30  ;;  %v9270_v16 = vcombine.high %v2832_v11, %v2836_v12  ;;  %v2871_v0 = vld [vmem:[#allocation8 + $0xfc0] sm:$0xff] }
 0x33c   :  { %5616 = vmatpush1.bf16.msra.mxu0 %v9219_v20  ;;  %5780 = vmatpush1.bf16.msra.mxu1 %v9221_v21  ;;  %v2844_v20 = vld [vmem:[#allocation8 + $0xee8] sm:$0xff]  ;;  %v9267_v21 = vcombine.low %v2831_v9, %v2835_v30 }
 0x33d   :  { %5617 = vmatprep.subr.bf16.mxu0 %v9228_v22  ;;  %5781 = vmatprep.subr.bf16.mxu1 %v9230_v23  ;;  %v9269_v22 = vcombine.low %v2832_v11, %v2836_v12  ;;  %v9276_v23 = vcombine.high %v2839_v17, %v2843_v18  ;;  %v9278_v24 = vcombine.high %v2840_v19, %v2844_v20 }
 0x340   :  { %5618 = vmatpush1.bf16.msra.mxu0 %v9227_v31  ;;  %5782 = vmatpush1.bf16.msra.mxu1 %v9229_v32  ;;  %v2852_v31 = vld [vmem:[#allocation8 + $0xf28] sm:$0xff]  ;;  %v9275_v32 = vcombine.low %v2839_v17, %v2843_v18 }
 0x341   :  { %5619 = vmatprep.subr.bf16.mxu0 %v9236_v33  ;;  %5783 = vmatprep.subr.bf16.mxu1 %v9238_v34  ;;  %v9277_v33 = vcombine.low %v2840_v19, %v2844_v20  ;;  %v9284_v34 = vcombine.high %v2847_v13, %v2851_v26  ;;  %v9286_v35 = vcombine.high %v2848_v28, %v2852_v31 }
 0x344   :  { %5620 = vmatpush1.bf16.msra.mxu0 %v9235_v41  ;;  %5784 = vmatpush1.bf16.msra.mxu1 %v9237_v43  ;;  %v2860_v41 = vld [vmem:[#allocation8 + $0xf68] sm:$0xff]  ;;  %v9283_v43 = vcombine.low %v2847_v13, %v2851_v26 }
 0x345   :  { %5621 = vmatprep.subr.bf16.mxu0 %v9244_v48  ;;  %5785 = vmatprep.subr.bf16.mxu1 %v9246_v49  ;;  %v9285_v48 = vcombine.low %v2848_v28, %v2852_v31  ;;  %v729_v49 = vsub.s32 6, %v10669_v44  ;;  %v9294_v51 = vcombine.high %v2856_v40, %v2860_v41  ;;  %v10239_v44 = vld [vmem:[#allocation10 + $0x7e8] ss:$16 sps:$4 sm:$0xff]  }
 0x347   :  { %v730_v1 = vrot.slane %v10720_v6, %v729_v49  ;;  %v2373_v6 = vld [vmem:[#allocation8 + $0x30] sm:$0xff] }
 0x348   :  { %5622 = vmatpush1.bf16.msra.mxu0 %v9243_v56  ;;  %5786 = vmatpush1.bf16.msra.mxu1 %v9245_v57  ;;  %v2864_v56 = vld [vmem:[#allocation8 + $0xf88] sm:$0xff] }
 0x349   :  { %5623 = vmatprep.subr.bf16.mxu0 %v9252_v60  ;;  %5787 = vmatprep.subr.bf16.mxu1 %v9254_v61  ;;  %v2868_v57 = vld [vmem:[#allocation8 + $0xfa8] sm:$0xff]  ;;  %v9291_v60 = vcombine.low %v2855_v36, %v2859_v38  ;;  %v9293_v61 = vcombine.low %v2856_v40, %v2860_v41  ;;  %v9690_v30 = vadd.f32 %v10761_v27, %v730_v1  ;;  %v2378_v27 = vld [vmem:[#allocation8 + $0x58] sm:$0xff] }
 0x34a   :  { %v9302_v3 = vcombine.high %v2864_v56, %v2868_v57  ;;  %v9301_v9 = vcombine.low %v2864_v56, %v2868_v57  ;;  %v2406_v1 = vld [vmem:[#allocation8 + $0x138] sm:$0xff] }
 0x34b   :  { %v2357_v18 = vmax.f32 %v9690_v30, 0.0 }
 0x34c   :  { %5624 = vmatpush1.bf16.msra.mxu0 %v9251_v4  ;;  %5788 = vmatpush1.bf16.msra.mxu1 %v9253_v5  ;;  %v2875_v4 = vld [vmem:[#allocation8 + $0xfe0] sm:$0xff]  ;;  %v2872_v5 = vld [vmem:[#allocation8 + $0xfc8] sm:$0xff] }
 0x34d   :  { %5625 = vmatprep.subr.bf16.mxu0 %v9260_v7  ;;  %5789 = vmatprep.subr.bf16.mxu1 %v9262_v8  ;;  %v2876_v7 = vld [vmem:[#allocation8 + $0xfe8] sm:$0xff]  ;;  %v9299_v8 = vcombine.low %v2863_v52, %v2867_v10  ;;  %v9308_v11 = vcombine.high %v2871_v0, %v2875_v4  ;;  %v10780_v13 = vpack.c.bf16 %v2357_v18, %v2357_v18 }
 0x34e   :  { %v9310_v12 = vcombine.high %v2872_v5, %v2876_v7  ;;  %v9309_v17 = vcombine.low %v2872_v5, %v2876_v7  ;;  %v2409_v5 = vld [vmem:[#allocation8 + $0x150] sm:$0xff] }
 0x34f   :  { %v2413_v7 = vld [vmem:[#allocation8 + $0x170] sm:$0xff] }
 0x350   :  { %5626 = vmatpush1.bf16.msra.mxu0 %v9259_v14  ;;  %5790 = vmatpush1.bf16.msra.mxu1 %v9261_v15  ;;  %v2369_v14 = vld [vmem:[#allocation8 + $0x10] sm:$0xff]  ;;  %v2370_v15 = vld [vmem:[#allocation8 + $0x18] sm:$0xff] }
 0x351   :  { %5627 = vmatprep.subr.bf16.mxu0 %v9268_v46  ;;  %5791 = vmatprep.subr.bf16.mxu1 %v9270_v16  ;;  %v2374_v46 = vld [vmem:[#allocation8 + $0x38] sm:$0xff]  ;;  %v9307_v16 = vcombine.low %v2871_v0, %v2875_v4  ;;  %v8808_v19 = vcombine.high %v2369_v14, %v2373_v6 }
 0x352   :  { %v8810_v20 = vcombine.high %v2370_v15, %v2374_v46  ;;  %v8809_v26 = vcombine.low %v2370_v15, %v2374_v46  ;;  %v2421_v15 = vld [vmem:[#allocation8 + $0x1b0] sm:$0xff]  ;;  %v2418_v46 = vld [vmem:[#allocation8 + $0x198] sm:$0xff] }
 0x354   :  { %5628 = vmatpush1.bf16.msra.mxu0 %v9267_v21  ;;  %5792 = vmatpush1.bf16.msra.mxu1 %v9269_v22  ;;  %v2377_v21 = vld [vmem:[#allocation8 + $0x50] sm:$0xff] }
 0x355   :  { %5629 = vmatprep.subr.bf16.mxu0 %v9276_v23  ;;  %5793 = vmatprep.subr.bf16.mxu1 %v9278_v24  ;;  %v2381_v22 = vld [vmem:[#allocation8 + $0x70] sm:$0xff]  ;;  %v2382_v23 = vld [vmem:[#allocation8 + $0x78] sm:$0xff]  ;;  %v8807_v24 = vcombine.low %v2369_v14, %v2373_v6 }
 0x356   :  { %v8816_v28 = vcombine.high %v2377_v21, %v2381_v22  ;;  %v8818_v31 = vcombine.high %v2378_v27, %v2382_v23  ;;  %v8815_v36 = vcombine.low %v2377_v21, %v2381_v22  ;;  %v8817_v38 = vcombine.low %v2378_v27, %v2382_v23  ;;  %v2417_v6 = vld [vmem:[#allocation8 + $0x190] sm:$0xff]  ;;  %v2426_v27 = vld [vmem:[#allocation8 + $0x1d8] sm:$0xff] }
 0x357   :  { %v2425_v21 = vld [vmem:[#allocation8 + $0x1d0] sm:$0xff]  ;;  %v2430_v23 = vld [vmem:[#allocation8 + $0x1f8] sm:$0xff] }
 0x358   :  { %5630 = vmatpush1.bf16.msra.mxu0 %v9275_v32  ;;  %5794 = vmatpush1.bf16.msra.mxu1 %v9277_v33  ;;  %v2385_v32 = vld [vmem:[#allocation8 + $0x90] sm:$0xff] }
 0x359   :  { %5631 = vmatprep.subr.bf16.mxu0 %v9284_v34  ;;  %5795 = vmatprep.subr.bf16.mxu1 %v9286_v35  ;;  %v2389_v33 = vld [vmem:[#allocation8 + $0xb0] sm:$0xff]  ;;  %v2386_v34 = vld [vmem:[#allocation8 + $0x98] sm:$0xff] }
 0x35a   :  { %v2390_v35 = vld [vmem:[#allocation8 + $0xb8] sm:$0xff]  ;;  %v8824_v40 = vcombine.high %v2385_v32, %v2389_v33  ;;  %v8823_v52 = vcombine.low %v2385_v32, %v2389_v33  ;;  %v2429_v22 = vld [vmem:[#allocation8 + $0x1f0] sm:$0xff] }
 0x35b   :  { %v8826_v41 = vcombine.high %v2386_v34, %v2390_v35  ;;  %v8825_v10 = vcombine.low %v2386_v34, %v2390_v35  ;;  %v2433_v32 = vld [vmem:[#allocation8 + $0x210] sm:$0xff]  ;;  %v2434_v34 = vld [vmem:[#allocation8 + $0x218] sm:$0xff] }
 0x35c   :  { %5632 = vmatpush1.bf16.msra.mxu0 %v9283_v43  ;;  %5796 = vmatpush1.bf16.msra.mxu1 %v9285_v48  ;;  %v2393_v43 = vld [vmem:[#allocation8 + $0xd0] sm:$0xff]  ;;  %v2438_v35 = vld [vmem:[#allocation8 + $0x238] sm:$0xff] }
 0x35d   :  { %5633 = vmatprep.subr.bf16.mxu0 %v9292_v50  ;;  %5797 = vmatprep.subr.bf16.mxu1 %v9294_v51  ;;  %v2397_v48 = vld [vmem:[#allocation8 + $0xf0] sm:$0xff]  ;;  %v2394_v50 = vld [vmem:[#allocation8 + $0xd8] sm:$0xff] }
 0x35e   :  { %v2398_v51 = vld [vmem:[#allocation8 + $0xf8] sm:$0xff]  ;;  %v8832_v56 = vcombine.high %v2393_v43, %v2397_v48  ;;  %v2437_v33 = vld [vmem:[#allocation8 + $0x230] sm:$0xff] }
 0x35f   :  { %v8834_v57 = vcombine.high %v2394_v50, %v2398_v51 }
 0x360   :  { %5634 = vmatpush1.bf16.msra.mxu0 %v9291_v60  ;;  %5798 = vmatpush1.bf16.msra.mxu1 %v9293_v61  ;;  %v2401_v60 = vld [vmem:[#allocation8 + $0x110] sm:$0xff] }
 0x361   :  { %5635 = vmatprep.subr.bf16.mxu0 %v9300_v2  ;;  %5799 = vmatprep.subr.bf16.mxu1 %v9302_v3  ;;  %v2405_v61 = vld [vmem:[#allocation8 + $0x130] sm:$0xff]  ;;  %v8831_v2 = vcombine.low %v2393_v43, %v2397_v48  ;;  %v8833_v3 = vcombine.low %v2394_v50, %v2398_v51  ;;  %v2442_v50 = vld [vmem:[#allocation8 + $0x258] sm:$0xff] }
 0x362   :  { %v8840_v0 = vcombine.high %v2401_v60, %v2405_v61  ;;  %v8839_v30 = vcombine.low %v2401_v60, %v2405_v61  ;;  %v2441_v43 = vld [vmem:[#allocation8 + $0x250] sm:$0xff]  ;;  %v2446_v51 = vld [vmem:[#allocation8 + $0x278] sm:$0xff] }
 0x363   :  { %v2445_v48 = vld [vmem:[#allocation8 + $0x270] sm:$0xff] }
 0x364   :  { %5636 = vmatpush1.bf16.msra.mxu0 %v9299_v8  ;;  %5800 = vmatpush1.bf16.msra.mxu1 %v9301_v9  ;;  %v2410_v8 = vld [vmem:[#allocation8 + $0x158] sm:$0xff]  ;;  %v2449_v60 = vld [vmem:[#allocation8 + $0x290] sm:$0xff] }
 0x365   :  { %5637 = vmatprep.subr.bf16.mxu0 %v9308_v11  ;;  %5801 = vmatprep.subr.bf16.mxu1 %v9310_v12  ;;  %v2414_v9 = vld [vmem:[#allocation8 + $0x178] sm:$0xff]  ;;  %v8848_v12 = vcombine.high %v2409_v5, %v2413_v7  ;;  %v2453_v61 = vld [vmem:[#allocation8 + $0x2b0] sm:$0xff] }
 0x366   :  { %v8850_v14 = vcombine.high %v2410_v8, %v2414_v9  ;;  %v8849_v18 = vcombine.low %v2410_v8, %v2414_v9  ;;  %v2458_v8 = vld [vmem:[#allocation8 + $0x2d8] sm:$0xff] }
 0x367   :  { %v2462_v9 = vld [vmem:[#allocation8 + $0x2f8] sm:$0xff] }
 0x368   :  { %5638 = vmatpush1.bf16.msra.mxu0 %v9307_v16  ;;  %5802 = vmatpush1.bf16.msra.mxu1 %v9309_v17  ;;  %v2422_v16 = vld [vmem:[#allocation8 + $0x1b8] sm:$0xff]  ;;  %v8847_v17 = vcombine.low %v2409_v5, %v2413_v7  ;;  %v2457_v5 = vld [vmem:[#allocation8 + $0x2d0] sm:$0xff] }
 0x369   :  { %5812 = vmatprep.subr.bf16.mxu0 %v8808_v19  ;;  %5976 = vmatprep.subr.bf16.mxu1 %v8810_v20  ;;  %v8856_v19 = vcombine.high %v2417_v6, %v2421_v15  ;;  %v8858_v20 = vcombine.high %v2418_v46, %v2422_v16  ;;  %v2461_v7 = vld [vmem:[#allocation8 + $0x2f0] sm:$0xff] }
 0x36b   :  { %5640 = vmatmul.mubr.bf16.vlgmr.msra.gmra.mrb[12].mxu0 %v10780_v13  ;;  %5804 = vmatmul.mubr.bf16.vlgmr.msra.gmra.mrb[12].mxu1 %v10780_v13 }
 0x36c   :  { %5813 = vmatpush1.bf16.msra.mxu0 %v8807_v24  ;;  %5844 = vmatprep.mubr.bf16.mxu0 %v10730_v25  ;;  %v8855_v24 = vcombine.low %v2417_v6, %v2421_v15  ;;  %v2465_v6 = vld [vmem:[#allocation8 + $0x310] sm:$0xff] }
 0x36d   :  { %5977 = vmatpush1.bf16.msra.mxu1 %v8809_v26  ;;  %6008 = vmatprep.mubr.bf16.mxu1 %v10730_v25  ;;  %v2402_v25 = vld [vmem:[#allocation8 + $0x118] sm:$0xff]  ;;  %v8857_v26 = vcombine.low %v2418_v46, %v2422_v16  ;;  %v2469_v15 = vld [vmem:[#allocation8 + $0x330] sm:$0xff] }
 0x36e   :  { %5814 = vmatprep.subr.bf16.mxu0 %v8816_v28  ;;  %5978 = vmatprep.subr.bf16.mxu1 %v8818_v31  ;;  %v8842_v4 = vcombine.high %v2402_v25, %v2406_v1  ;;  %v8841_v11 = vcombine.low %v2402_v25, %v2406_v1  ;;  %v8864_v28 = vcombine.high %v2425_v21, %v2429_v22  ;;  %v2450_v25 = vld [vmem:[#allocation8 + $0x298] sm:$0xff] }
 0x36f   :  { %v8866_v31 = vcombine.high %v2426_v27, %v2430_v23  ;;  %v2454_v1 = vld [vmem:[#allocation8 + $0x2b8] sm:$0xff] }
 0x370   :  { %5815 = vmatpush1.bf16.msra.mxu0 %v8815_v36  ;;  %v8863_v36 = vcombine.low %v2425_v21, %v2429_v22  ;;  %v2466_v46 = vld [vmem:[#allocation8 + $0x318] sm:$0xff]  ;;  %v2473_v21 = vld [vmem:[#allocation8 + $0x350] sm:$0xff] }
 0x371   :  { %5979 = vmatpush1.bf16.msra.mxu1 %v8817_v38  ;;  %5816 = vmatprep.subr.bf16.mxu0 %v8824_v40  ;;  %v8865_v38 = vcombine.low %v2426_v27, %v2430_v23  ;;  %v8872_v40 = vcombine.high %v2433_v32, %v2437_v33  ;;  %v2470_v16 = vld [vmem:[#allocation8 + $0x338] sm:$0xff]  ;;  %v2477_v22 = vld [vmem:[#allocation8 + $0x370] sm:$0xff] }
 0x372   :  { %5980 = vmatprep.subr.bf16.mxu1 %v8826_v41  ;;  %v8874_v41 = vcombine.high %v2434_v34, %v2438_v35  ;;  %v2474_v27 = vld [vmem:[#allocation8 + $0x358] sm:$0xff] }
 0x373   :  { %v2478_v23 = vld [vmem:[#allocation8 + $0x378] sm:$0xff] }
 0x374   :  { %5817 = vmatpush1.bf16.msra.mxu0 %v8823_v52  ;;  %v8871_v52 = vcombine.low %v2433_v32, %v2437_v33  ;;  %v2481_v32 = vld [vmem:[#allocation8 + $0x390] sm:$0xff] }
 0x375   :  { %5981 = vmatpush1.bf16.msra.mxu1 %v8825_v10  ;;  %5818 = vmatprep.subr.bf16.mxu0 %v8832_v56  ;;  %v8873_v10 = vcombine.low %v2434_v34, %v2438_v35  ;;  %v8880_v56 = vcombine.high %v2441_v43, %v2445_v48  ;;  %v2485_v33 = vld [vmem:[#allocation8 + $0x3b0] sm:$0xff]  ;;  %v2482_v34 = vld [vmem:[#allocation8 + $0x398] sm:$0xff] }
 0x376   :  { %5982 = vmatprep.subr.bf16.mxu1 %v8834_v57  ;;  %v8882_v57 = vcombine.high %v2442_v50, %v2446_v51  ;;  %v2486_v35 = vld [vmem:[#allocation8 + $0x3b8] sm:$0xff] }
 0x378   :  { %5819 = vmatpush1.bf16.msra.mxu0 %v8831_v2  ;;  %v8879_v2 = vcombine.low %v2441_v43, %v2445_v48  ;;  %v2489_v43 = vld [vmem:[#allocation8 + $0x3d0] sm:$0xff] }
 0x379   :  { %5983 = vmatpush1.bf16.msra.mxu1 %v8833_v3  ;;  %5820 = vmatprep.subr.bf16.mxu0 %v8840_v0  ;;  %v8881_v3 = vcombine.low %v2442_v50, %v2446_v51  ;;  %v8888_v0 = vcombine.high %v2449_v60, %v2453_v61  ;;  %v2493_v48 = vld [vmem:[#allocation8 + $0x3f0] sm:$0xff]  ;;  %v2490_v50 = vld [vmem:[#allocation8 + $0x3d8] sm:$0xff] }
 0x37a   :  { %5984 = vmatprep.subr.bf16.mxu1 %v8842_v4  ;;  %v8890_v4 = vcombine.high %v2450_v25, %v2454_v1  ;;  %v2494_v51 = vld [vmem:[#allocation8 + $0x3f8] sm:$0xff] }
 0x37c   :  { %5821 = vmatpush1.bf16.msra.mxu0 %v8839_v30  ;;  %v8887_v30 = vcombine.low %v2449_v60, %v2453_v61  ;;  %v2497_v60 = vld [vmem:[#allocation8 + $0x410] sm:$0xff] }
 0x37d   :  { %5985 = vmatpush1.bf16.msra.mxu1 %v8841_v11  ;;  %5822 = vmatprep.subr.bf16.mxu0 %v8848_v12  ;;  %v8889_v11 = vcombine.low %v2450_v25, %v2454_v1  ;;  %v8896_v12 = vcombine.high %v2457_v5, %v2461_v7  ;;  %v2501_v61 = vld [vmem:[#allocation8 + $0x430] sm:$0xff]  ;;  %v2498_v25 = vld [vmem:[#allocation8 + $0x418] sm:$0xff] }
 0x37e   :  { %5986 = vmatprep.subr.bf16.mxu1 %v8850_v14  ;;  %v8898_v14 = vcombine.high %v2458_v8, %v2462_v9  ;;  %v2502_v1 = vld [vmem:[#allocation8 + $0x438] sm:$0xff] }
 0x380   :  { %5823 = vmatpush1.bf16.msra.mxu0 %v8847_v17  ;;  %v8895_v17 = vcombine.low %v2457_v5, %v2461_v7  ;;  %v2505_v5 = vld [vmem:[#allocation8 + $0x450] sm:$0xff] }
 0x381   :  { %5987 = vmatpush1.bf16.msra.mxu1 %v8849_v18  ;;  %5824 = vmatprep.subr.bf16.mxu0 %v8856_v19  ;;  %v8897_v18 = vcombine.low %v2458_v8, %v2462_v9  ;;  %v8904_v19 = vcombine.high %v2465_v6, %v2469_v15  ;;  %v2509_v7 = vld [vmem:[#allocation8 + $0x470] sm:$0xff]  ;;  %v8935_v8 = vcombine.low %v2497_v60, %v2501_v61  ;;  %v2506_v9 = vld [vmem:[#allocation8 + $0x458] sm:$0xff] }
 0x382   :  { %5988 = vmatprep.subr.bf16.mxu1 %v8858_v20  ;;  %v8906_v20 = vcombine.high %v2466_v46, %v2470_v16 }
 0x384   :  { %5825 = vmatpush1.bf16.msra.mxu0 %v8855_v24  ;;  %v8903_v24 = vcombine.low %v2465_v6, %v2469_v15  ;;  %v2517_v6 = vld [vmem:[#allocation8 + $0x4b0] sm:$0xff] }
 0x385   :  { %5989 = vmatpush1.bf16.msra.mxu1 %v8857_v26  ;;  %5826 = vmatprep.subr.bf16.mxu0 %v8864_v28  ;;  %v8905_v26 = vcombine.low %v2466_v46, %v2470_v16  ;;  %v8912_v28 = vcombine.high %v2473_v21, %v2477_v22  ;;  %v2514_v46 = vld [vmem:[#allocation8 + $0x498] sm:$0xff] }
 0x386   :  { %5990 = vmatprep.subr.bf16.mxu1 %v8866_v31  ;;  %v8914_v31 = vcombine.high %v2474_v27, %v2478_v23  ;;  %v2518_v16 = vld [vmem:[#allocation8 + $0x4b8] sm:$0xff] }
 0x388   :  { %5827 = vmatpush1.bf16.msra.mxu0 %v8863_v36  ;;  %v8911_v36 = vcombine.low %v2473_v21, %v2477_v22  ;;  %v2521_v21 = vld [vmem:[#allocation8 + $0x4d0] sm:$0xff] }
 0x389   :  { %5991 = vmatpush1.bf16.msra.mxu1 %v8865_v38  ;;  %5828 = vmatprep.subr.bf16.mxu0 %v8872_v40  ;;  %v8913_v38 = vcombine.low %v2474_v27, %v2478_v23  ;;  %v8920_v40 = vcombine.high %v2481_v32, %v2485_v33  ;;  %v2525_v22 = vld [vmem:[#allocation8 + $0x4f0] sm:$0xff]  ;;  %v2522_v27 = vld [vmem:[#allocation8 + $0x4d8] sm:$0xff] }
 0x38a   :  { %5992 = vmatprep.subr.bf16.mxu1 %v8874_v41  ;;  %v8922_v41 = vcombine.high %v2482_v34, %v2486_v35  ;;  %v2526_v23 = vld [vmem:[#allocation8 + $0x4f8] sm:$0xff] }
 0x38c   :  { %5829 = vmatpush1.bf16.msra.mxu0 %v8871_v52  ;;  %v8919_v52 = vcombine.low %v2481_v32, %v2485_v33  ;;  %v2533_v32 = vld [vmem:[#allocation8 + $0x530] sm:$0xff]  ;;  %v2530_v33 = vld [vmem:[#allocation8 + $0x518] sm:$0xff] }
 0x38d   :  { %5993 = vmatpush1.bf16.msra.mxu1 %v8873_v10  ;;  %5830 = vmatprep.subr.bf16.mxu0 %v8880_v56  ;;  %v8921_v10 = vcombine.low %v2482_v34, %v2486_v35  ;;  %v8928_v56 = vcombine.high %v2489_v43, %v2493_v48  ;;  %v2534_v34 = vld [vmem:[#allocation8 + $0x538] sm:$0xff]  ;;  %v8961_v35 = vcombine.low %v2522_v27, %v2526_v23 }
 0x38e   :  { %5994 = vmatprep.subr.bf16.mxu1 %v8882_v57  ;;  %v8930_v57 = vcombine.high %v2490_v50, %v2494_v51 }
 0x390   :  { %5831 = vmatpush1.bf16.msra.mxu0 %v8879_v2  ;;  %v8927_v2 = vcombine.low %v2489_v43, %v2493_v48  ;;  %v2538_v43 = vld [vmem:[#allocation8 + $0x558] sm:$0xff] }
 0x391   :  { %5995 = vmatpush1.bf16.msra.mxu1 %v8881_v3  ;;  %5832 = vmatprep.subr.bf16.mxu0 %v8888_v0  ;;  %v8929_v3 = vcombine.low %v2490_v50, %v2494_v51  ;;  %v8936_v0 = vcombine.high %v2497_v60, %v2501_v61  ;;  %v2542_v48 = vld [vmem:[#allocation8 + $0x578] sm:$0xff]  ;;  %v8969_v51 = vcombine.low %v2530_v33, %v2534_v34 }
 0x392   :  { %5996 = vmatprep.subr.bf16.mxu1 %v8890_v4  ;;  %v8938_v4 = vcombine.high %v2498_v25, %v2502_v1  ;;  %v2546_v60 = vld [vmem:[#allocation8 + $0x598] sm:$0xff] }
 0x393   :  { %v2550_v61 = vld [vmem:[#allocation8 + $0x5b8] sm:$0xff] }
 0x394   :  { %5833 = vmatpush1.bf16.msra.mxu0 %v8887_v30  ;;  %v2510_v30 = vld [vmem:[#allocation8 + $0x478] sm:$0xff] }
 0x395   :  { %5997 = vmatpush1.bf16.msra.mxu1 %v8889_v11  ;;  %5834 = vmatprep.subr.bf16.mxu0 %v8896_v12  ;;  %v8937_v11 = vcombine.low %v2498_v25, %v2502_v1  ;;  %v8944_v12 = vcombine.high %v2505_v5, %v2509_v7  ;;  %v8946_v15 = vcombine.high %v2506_v9, %v2510_v30 }
 0x396   :  { %5998 = vmatprep.subr.bf16.mxu1 %v8898_v14  ;;  %v2513_v14 = vld [vmem:[#allocation8 + $0x490] sm:$0xff]  ;;  %v8977_v1 = vcombine.low %v2538_v43, %v2542_v48 }
 0x398   :  { %5835 = vmatpush1.bf16.msra.mxu0 %v8895_v17  ;;  %v8943_v17 = vcombine.low %v2505_v5, %v2509_v7  ;;  %v2554_v5 = vld [vmem:[#allocation8 + $0x5d8] sm:$0xff] }
 0x399   :  { %5999 = vmatpush1.bf16.msra.mxu1 %v8897_v18  ;;  %5836 = vmatprep.subr.bf16.mxu0 %v8904_v19  ;;  %v8945_v18 = vcombine.low %v2506_v9, %v2510_v30  ;;  %v8952_v19 = vcombine.high %v2513_v14, %v2517_v6  ;;  %v2558_v7 = vld [vmem:[#allocation8 + $0x5f8] sm:$0xff]  ;;  %v8985_v9 = vcombine.low %v2546_v60, %v2550_v61 }
 0x39a   :  { %6000 = vmatprep.subr.bf16.mxu1 %v8906_v20  ;;  %v8954_v20 = vcombine.high %v2514_v46, %v2518_v16 }
 0x39c   :  { %5837 = vmatpush1.bf16.msra.mxu0 %v8903_v24  ;;  %v8951_v24 = vcombine.low %v2513_v14, %v2517_v6  ;;  %v2565_v14 = vld [vmem:[#allocation8 + $0x630] sm:$0xff]  ;;  %v2562_v6 = vld [vmem:[#allocation8 + $0x618] sm:$0xff] }
 0x39d   :  { %6001 = vmatpush1.bf16.msra.mxu1 %v8905_v26  ;;  %5838 = vmatprep.subr.bf16.mxu0 %v8912_v28  ;;  %v8960_v26 = vcombine.high %v2521_v21, %v2525_v22  ;;  %v8962_v28 = vcombine.high %v2522_v27, %v2526_v23 }
 0x39e   :  { %6002 = vmatprep.subr.bf16.mxu1 %v8914_v31  ;;  %v2529_v31 = vld [vmem:[#allocation8 + $0x510] sm:$0xff] }
 0x39f   :  { %v8967_v50 = vcombine.low %v2529_v31, %v2533_v32 }
 0x3a0   :  { %5839 = vmatpush1.bf16.msra.mxu0 %v8911_v36  ;;  %v8968_v36 = vcombine.high %v2529_v31, %v2533_v32  ;;  %v2578_v31 = vld [vmem:[#allocation8 + $0x698] sm:$0xff] }
 0x3a1   :  { %6003 = vmatpush1.bf16.msra.mxu1 %v8913_v38  ;;  %5840 = vmatprep.subr.bf16.mxu0 %v8920_v40  ;;  %v8970_v38 = vcombine.high %v2530_v33, %v2534_v34  ;;  %v2537_v40 = vld [vmem:[#allocation8 + $0x550] sm:$0xff]  ;;  %v2582_v32 = vld [vmem:[#allocation8 + $0x6b8] sm:$0xff] }
 0x3a2   :  { %6004 = vmatprep.subr.bf16.mxu1 %v8922_v41  ;;  %v2541_v41 = vld [vmem:[#allocation8 + $0x570] sm:$0xff] }
 0x3a3   :  { %v8975_v25 = vcombine.low %v2537_v40, %v2541_v41 }
 0x3a4   :  { %5841 = vmatpush1.bf16.msra.mxu0 %v8919_v52  ;;  %v8976_v52 = vcombine.high %v2537_v40, %v2541_v41  ;;  %v2586_v40 = vld [vmem:[#allocation8 + $0x6d8] sm:$0xff] }
 0x3a5   :  { %6005 = vmatpush1.bf16.msra.mxu1 %v8921_v10  ;;  %5842 = vmatprep.subr.bf16.mxu0 %v8928_v56  ;;  %v8978_v10 = vcombine.high %v2538_v43, %v2542_v48  ;;  %v2545_v56 = vld [vmem:[#allocation8 + $0x590] sm:$0xff]  ;;  %v2590_v41 = vld [vmem:[#allocation8 + $0x6f8] sm:$0xff]  ;;  %v9017_v48 = vcombine.low %v2578_v31, %v2582_v32 }
 0x3a6   :  { %6006 = vmatprep.subr.bf16.mxu1 %v8930_v57  ;;  %v2549_v57 = vld [vmem:[#allocation8 + $0x5b0] sm:$0xff] }
 0x3a8   :  { %5843 = vmatpush1.bf16.msra.mxu0 %v8927_v2  ;;  %v8984_v2 = vcombine.high %v2545_v56, %v2549_v57 }
 0x3a9   :  { %6007 = vmatpush1.bf16.msra.mxu1 %v8929_v3  ;;  %5853 = vmatprep.subr.bf16.mxu0 %v8936_v0  ;;  %v8986_v3 = vcombine.high %v2546_v60, %v2550_v61  ;;  %v2553_v0 = vld [vmem:[#allocation8 + $0x5d0] sm:$0xff]  ;;  %v9025_v61 = vcombine.low %v2586_v40, %v2590_v41 }
 0x3aa   :  { %6017 = vmatprep.subr.bf16.mxu1 %v8938_v4  ;;  %v2557_v4 = vld [vmem:[#allocation8 + $0x5f0] sm:$0xff] }
 0x3ab   :  { %5845 = vmatmul.mubr.bf16.vlgmr.msra.gmra.mrb[16].mxu0 %v10732_v29  ;;  %v8992_v30 = vcombine.high %v2553_v0, %v2557_v4 }
 0x3ac   :  { %6009 = vmatmul.mubr.bf16.vlgmr.msra.gmra.mrb[16].mxu1 %v10732_v29  ;;  %5854 = vmatpush1.bf16.msra.mxu0 %v8935_v8  ;;  %v8953_v29 = vcombine.low %v2514_v46, %v2518_v16  ;;  %v8983_v8 = vcombine.low %v2545_v56, %v2549_v57  ;;  %v8991_v46 = vcombine.low %v2553_v0, %v2557_v4  ;;  %v2594_v56 = vld [vmem:[#allocation8 + $0x718] sm:$0xff] }
 0x3ad   :  { %5885 = vmatprep.mubr.bf16.mxu0 %v10736_v37  ;;  %6018 = vmatpush1.bf16.msra.mxu1 %v8937_v11  ;;  %v8994_v11 = vcombine.high %v2554_v5, %v2558_v7  ;;  %v8993_v16 = vcombine.low %v2554_v5, %v2558_v7  ;;  %v2598_v57 = vld [vmem:[#allocation8 + $0x738] sm:$0xff] }
 0x3ae   :  { %6049 = vmatprep.mubr.bf16.mxu1 %v10736_v37  ;;  %5855 = vmatprep.subr.bf16.mxu0 %v8944_v12  ;;  %v8959_v37 = vcombine.low %v2521_v21, %v2525_v22  ;;  %v2561_v12 = vld [vmem:[#allocation8 + $0x610] sm:$0xff]  ;;  %v2570_v21 = vld [vmem:[#allocation8 + $0x658] sm:$0xff]  ;;  %v9033_v7 = vcombine.low %v2594_v56, %v2598_v57 }
 0x3af   :  { %6019 = vmatprep.subr.bf16.mxu1 %v8946_v15  ;;  %v2566_v15 = vld [vmem:[#allocation8 + $0x638] sm:$0xff]  ;;  %v8999_v27 = vcombine.low %v2561_v12, %v2565_v14 }
 0x3b0   :  { %5856 = vmatpush1.bf16.msra.mxu0 %v8943_v17  ;;  %v9000_v17 = vcombine.high %v2561_v12, %v2565_v14  ;;  %v2574_v22 = vld [vmem:[#allocation8 + $0x678] sm:$0xff]  ;;  %v9001_v23 = vcombine.low %v2562_v6, %v2566_v15 }
 0x3b1   :  { %6020 = vmatpush1.bf16.msra.mxu1 %v8945_v18  ;;  %5857 = vmatprep.subr.bf16.mxu0 %v8952_v19  ;;  %v9002_v18 = vcombine.high %v2562_v6, %v2566_v15  ;;  %v2569_v19 = vld [vmem:[#allocation8 + $0x650] sm:$0xff]  ;;  %v9009_v34 = vcombine.low %v2570_v21, %v2574_v22  ;;  %v2602_v0 = vld [vmem:[#allocation8 + $0x758] sm:$0xff] }
 0x3b2   :  { %6021 = vmatprep.subr.bf16.mxu1 %v8954_v20  ;;  %v2573_v20 = vld [vmem:[#allocation8 + $0x670] sm:$0xff]  ;;  %v2606_v4 = vld [vmem:[#allocation8 + $0x778] sm:$0xff] }
 0x3b3   :  { %v9007_v33 = vcombine.low %v2569_v19, %v2573_v20  ;;  %v2610_v12 = vld [vmem:[#allocation8 + $0x798] sm:$0xff]  ;;  %v9041_v15 = vcombine.low %v2602_v0, %v2606_v4 }
 0x3b4   :  { %5858 = vmatpush1.bf16.msra.mxu0 %v8951_v24  ;;  %v9008_v24 = vcombine.high %v2569_v19, %v2573_v20  ;;  %v2614_v14 = vld [vmem:[#allocation8 + $0x7b8] sm:$0xff] }
 0x3b5   :  { %6022 = vmatpush1.bf16.msra.mxu1 %v8953_v29  ;;  %5859 = vmatprep.subr.bf16.mxu0 %v8960_v26  ;;  %v9010_v29 = vcombine.high %v2570_v21, %v2574_v22  ;;  %v2577_v26 = vld [vmem:[#allocation8 + $0x690] sm:$0xff]  ;;  %v2618_v19 = vld [vmem:[#allocation8 + $0x7d8] sm:$0xff]  ;;  %v9049_v22 = vcombine.low %v2610_v12, %v2614_v14 }
 0x3b6   :  { %6023 = vmatprep.subr.bf16.mxu1 %v8962_v28  ;;  %v2581_v28 = vld [vmem:[#allocation8 + $0x6b0] sm:$0xff]  ;;  %v2622_v20 = vld [vmem:[#allocation8 + $0x7f8] sm:$0xff] }
 0x3b7   :  { %v9015_v43 = vcombine.low %v2577_v26, %v2581_v28 }
 0x3b8   :  { %5860 = vmatpush1.bf16.msra.mxu0 %v8959_v37  ;;  %v9016_v37 = vcombine.high %v2577_v26, %v2581_v28  ;;  %v2626_v26 = vld [vmem:[#allocation8 + $0x818] sm:$0xff] }
 0x3b9   :  { %6024 = vmatpush1.bf16.msra.mxu1 %v8961_v35  ;;  %5861 = vmatprep.subr.bf16.mxu0 %v8968_v36  ;;  %v9018_v35 = vcombine.high %v2578_v31, %v2582_v32  ;;  %v2585_v36 = vld [vmem:[#allocation8 + $0x6d0] sm:$0xff]  ;;  %v2630_v28 = vld [vmem:[#allocation8 + $0x838] sm:$0xff]  ;;  %v9057_v32 = vcombine.low %v2618_v19, %v2622_v20 }
 0x3ba   :  { %6025 = vmatprep.subr.bf16.mxu1 %v8970_v38  ;;  %v2589_v38 = vld [vmem:[#allocation8 + $0x6f0] sm:$0xff] }
 0x3bb   :  { %v9023_v60 = vcombine.low %v2585_v36, %v2589_v38 }
 0x3bc   :  { %5862 = vmatpush1.bf16.msra.mxu0 %v8967_v50  ;;  %v9024_v50 = vcombine.high %v2585_v36, %v2589_v38  ;;  %v2634_v38 = vld [vmem:[#allocation8 + $0x858] sm:$0xff] }
 0x3bd   :  { %6026 = vmatpush1.bf16.msra.mxu1 %v8969_v51  ;;  %5863 = vmatprep.subr.bf16.mxu0 %v8976_v52  ;;  %v9026_v51 = vcombine.high %v2586_v40, %v2590_v41  ;;  %v2593_v52 = vld [vmem:[#allocation8 + $0x710] sm:$0xff]  ;;  %v2638_v40 = vld [vmem:[#allocation8 + $0x878] sm:$0xff]  ;;  %v9065_v41 = vcombine.low %v2626_v26, %v2630_v28 }
 0x3be   :  { %6027 = vmatprep.subr.bf16.mxu1 %v8978_v10  ;;  %v2597_v10 = vld [vmem:[#allocation8 + $0x730] sm:$0xff] }
 0x3bf   :  { %v9031_v5 = vcombine.low %v2593_v52, %v2597_v10 }
 0x3c0   :  { %5864 = vmatpush1.bf16.msra.mxu0 %v8975_v25  ;;  %v9032_v25 = vcombine.high %v2593_v52, %v2597_v10  ;;  %v2642_v52 = vld [vmem:[#allocation8 + $0x898] sm:$0xff] }
 0x3c1   :  { %6028 = vmatpush1.bf16.msra.mxu1 %v8977_v1  ;;  %5865 = vmatprep.subr.bf16.mxu0 %v8984_v2  ;;  %v9034_v1 = vcombine.high %v2594_v56, %v2598_v57  ;;  %v2601_v2 = vld [vmem:[#allocation8 + $0x750] sm:$0xff]  ;;  %v2646_v10 = vld [vmem:[#allocation8 + $0x8b8] sm:$0xff]  ;;  %v9073_v57 = vcombine.low %v2634_v38, %v2638_v40 }
 0x3c2   :  { %6029 = vmatprep.subr.bf16.mxu1 %v8986_v3  ;;  %v2605_v3 = vld [vmem:[#allocation8 + $0x770] sm:$0xff] }
 0x3c3   :  { %v9039_v6 = vcombine.low %v2601_v2, %v2605_v3 }
 0x3c4   :  { %5866 = vmatpush1.bf16.msra.mxu0 %v8983_v8  ;;  %v9040_v8 = vcombine.high %v2601_v2, %v2605_v3  ;;  %v2650_v2 = vld [vmem:[#allocation8 + $0x8d8] sm:$0xff] }
 0x3c5   :  { %6030 = vmatpush1.bf16.msra.mxu1 %v8985_v9  ;;  %5867 = vmatprep.subr.bf16.mxu0 %v8992_v30  ;;  %v9042_v9 = vcombine.high %v2602_v0, %v2606_v4  ;;  %v2609_v30 = vld [vmem:[#allocation8 + $0x790] sm:$0xff]  ;;  %v2654_v3 = vld [vmem:[#allocation8 + $0x8f8] sm:$0xff] }
 0x3c6   :  { %6031 = vmatprep.subr.bf16.mxu1 %v8994_v11  ;;  %v2613_v11 = vld [vmem:[#allocation8 + $0x7b0] sm:$0xff] }
 0x3c7   :  { %v9047_v21 = vcombine.low %v2609_v30, %v2613_v11 }
 0x3c8   :  { %5868 = vmatpush1.bf16.msra.mxu0 %v8991_v46  ;;  %v9048_v46 = vcombine.high %v2609_v30, %v2613_v11  ;;  %v2662_v30 = vld [vmem:[#allocation8 + $0x938] sm:$0xff]  ;;  %v9089_v11 = vcombine.low %v2650_v2, %v2654_v3 }
 0x3c9   :  { %6032 = vmatpush1.bf16.msra.mxu1 %v8993_v16  ;;  %5869 = vmatprep.subr.bf16.mxu0 %v9000_v17  ;;  %v9050_v16 = vcombine.high %v2610_v12, %v2614_v14  ;;  %v2617_v17 = vld [vmem:[#allocation8 + $0x7d0] sm:$0xff] }
 0x3ca   :  { %6033 = vmatprep.subr.bf16.mxu1 %v9002_v18  ;;  %v2621_v18 = vld [vmem:[#allocation8 + $0x7f0] sm:$0xff] }
 0x3cb   :  { %v9055_v31 = vcombine.low %v2617_v17, %v2621_v18 }
 0x3cc   :  { %5870 = vmatpush1.bf16.msra.mxu0 %v8999_v27  ;;  %v9056_v27 = vcombine.high %v2617_v17, %v2621_v18 }
 0x3cd   :  { %6034 = vmatpush1.bf16.msra.mxu1 %v9001_v23  ;;  %5871 = vmatprep.subr.bf16.mxu0 %v9008_v24  ;;  %v9058_v23 = vcombine.high %v2618_v19, %v2622_v20  ;;  %v2625_v24 = vld [vmem:[#allocation8 + $0x810] sm:$0xff] }
 0x3ce   :  { %6035 = vmatprep.subr.bf16.mxu1 %v9010_v29  ;;  %v2629_v29 = vld [vmem:[#allocation8 + $0x830] sm:$0xff] }
 0x3cf   :  { %v9063_v36 = vcombine.low %v2625_v24, %v2629_v29 }
 0x3d0   :  { %5872 = vmatpush1.bf16.msra.mxu0 %v9007_v33  ;;  %v9064_v33 = vcombine.high %v2625_v24, %v2629_v29 }
 0x3d1   :  { %6036 = vmatpush1.bf16.msra.mxu1 %v9009_v34  ;;  %5873 = vmatprep.subr.bf16.mxu0 %v9016_v37  ;;  %v9066_v34 = vcombine.high %v2626_v26, %v2630_v28  ;;  %v2633_v37 = vld [vmem:[#allocation8 + $0x850] sm:$0xff] }
 0x3d2   :  { %6037 = vmatprep.subr.bf16.mxu1 %v9018_v35  ;;  %v2637_v35 = vld [vmem:[#allocation8 + $0x870] sm:$0xff] }
 0x3d3   :  { %v9071_v56 = vcombine.low %v2633_v37, %v2637_v35 }
 0x3d4   :  { %5874 = vmatpush1.bf16.msra.mxu0 %v9015_v43  ;;  %v9072_v43 = vcombine.high %v2633_v37, %v2637_v35 }
 0x3d5   :  { %6038 = vmatpush1.bf16.msra.mxu1 %v9017_v48  ;;  %5875 = vmatprep.subr.bf16.mxu0 %v9024_v50  ;;  %v2641_v48 = vld [vmem:[#allocation8 + $0x890] sm:$0xff] }
 0x3d6   :  { %6039 = vmatprep.subr.bf16.mxu1 %v9026_v51  ;;  %v2645_v50 = vld [vmem:[#allocation8 + $0x8b0] sm:$0xff]  ;;  %v9074_v51 = vcombine.high %v2634_v38, %v2638_v40 }
 0x3d7   :  { %v9079_v0 = vcombine.low %v2641_v48, %v2645_v50  ;;  %v2689_v40 = vld [vmem:[#allocation8 + $0xa10] sm:$0xff] }
 0x3d8   :  { %5876 = vmatpush1.bf16.msra.mxu0 %v9023_v60  ;;  %v9080_v60 = vcombine.high %v2641_v48, %v2645_v50  ;;  %v2694_v48 = vld [vmem:[#allocation8 + $0xa38] sm:$0xff] }
 0x3d9   :  { %6040 = vmatpush1.bf16.msra.mxu1 %v9025_v61  ;;  %5877 = vmatprep.subr.bf16.mxu0 %v9032_v25  ;;  %v9082_v61 = vcombine.high %v2642_v52, %v2646_v10  ;;  %v2649_v25 = vld [vmem:[#allocation8 + $0x8d0] sm:$0xff] }
 0x3da   :  { %6041 = vmatprep.subr.bf16.mxu1 %v9034_v1  ;;  %v2653_v1 = vld [vmem:[#allocation8 + $0x8f0] sm:$0xff] }
 0x3db   :  { %v9088_v4 = vcombine.high %v2649_v25, %v2653_v1 }
 0x3dc   :  { %5878 = vmatpush1.bf16.msra.mxu0 %v9031_v5  ;;  %v9090_v5 = vcombine.high %v2650_v2, %v2654_v3 }
 0x3dd   :  { %6042 = vmatpush1.bf16.msra.mxu1 %v9033_v7  ;;  %5879 = vmatprep.subr.bf16.mxu0 %v9040_v8  ;;  %v2657_v7 = vld [vmem:[#allocation8 + $0x910] sm:$0xff] }
 0x3de   :  { %6043 = vmatprep.subr.bf16.mxu1 %v9042_v9  ;;  %v2661_v8 = vld [vmem:[#allocation8 + $0x930] sm:$0xff]  ;;  %v2658_v9 = vld [vmem:[#allocation8 + $0x918] sm:$0xff] }
 0x3df   :  { %v9096_v12 = vcombine.high %v2657_v7, %v2661_v8  ;;  %v9098_v14 = vcombine.high %v2658_v9, %v2662_v30  ;;  %v9095_v17 = vcombine.low %v2657_v7, %v2661_v8  ;;  %v9097_v18 = vcombine.low %v2658_v9, %v2662_v30 }
 0x3e0   :  { %5880 = vmatpush1.bf16.msra.mxu0 %v9039_v6  ;;  %v2665_v6 = vld [vmem:[#allocation8 + $0x950] sm:$0xff] }
 0x3e1   :  { %6044 = vmatpush1.bf16.msra.mxu1 %v9041_v15  ;;  %5881 = vmatprep.subr.bf16.mxu0 %v9048_v46  ;;  %v2669_v15 = vld [vmem:[#allocation8 + $0x970] sm:$0xff]  ;;  %v2666_v46 = vld [vmem:[#allocation8 + $0x958] sm:$0xff] }
 0x3e2   :  { %6045 = vmatprep.subr.bf16.mxu1 %v9050_v16  ;;  %v2670_v16 = vld [vmem:[#allocation8 + $0x978] sm:$0xff]  ;;  %v9104_v19 = vcombine.high %v2665_v6, %v2669_v15  ;;  %v9103_v24 = vcombine.low %v2665_v6, %v2669_v15 }
 0x3e3   :  { %v9106_v20 = vcombine.high %v2666_v46, %v2670_v16  ;;  %v9105_v29 = vcombine.low %v2666_v46, %v2670_v16 }
 0x3e4   :  { %5882 = vmatpush1.bf16.msra.mxu0 %v9047_v21  ;;  %v2673_v21 = vld [vmem:[#allocation8 + $0x990] sm:$0xff] }
 0x3e5   :  { %6046 = vmatpush1.bf16.msra.mxu1 %v9049_v22  ;;  %5883 = vmatprep.subr.bf16.mxu0 %v9056_v27  ;;  %v2677_v22 = vld [vmem:[#allocation8 + $0x9b0] sm:$0xff]  ;;  %v2674_v27 = vld [vmem:[#allocation8 + $0x998] sm:$0xff] }
 0x3e6   :  { %6047 = vmatprep.subr.bf16.mxu1 %v9058_v23  ;;  %v2678_v23 = vld [vmem:[#allocation8 + $0x9b8] sm:$0xff]  ;;  %v9112_v26 = vcombine.high %v2673_v21, %v2677_v22  ;;  %v9111_v37 = vcombine.low %v2673_v21, %v2677_v22 }
 0x3e7   :  { %v9114_v28 = vcombine.high %v2674_v27, %v2678_v23  ;;  %v9113_v35 = vcombine.low %v2674_v27, %v2678_v23 }
 0x3e8   :  { %5884 = vmatpush1.bf16.msra.mxu0 %v9055_v31  ;;  %v2681_v31 = vld [vmem:[#allocation8 + $0x9d0] sm:$0xff] }
 0x3e9   :  { %6048 = vmatpush1.bf16.msra.mxu1 %v9057_v32  ;;  %5894 = vmatprep.subr.bf16.mxu0 %v9064_v33  ;;  %v2685_v32 = vld [vmem:[#allocation8 + $0x9f0] sm:$0xff]  ;;  %v2682_v33 = vld [vmem:[#allocation8 + $0x9d8] sm:$0xff] }
 0x3ea   :  { %6058 = vmatprep.subr.bf16.mxu1 %v9066_v34  ;;  %v2686_v34 = vld [vmem:[#allocation8 + $0x9f8] sm:$0xff]  ;;  %v9119_v50 = vcombine.low %v2681_v31, %v2685_v32 }
 0x3eb   :  { %5886 = vmatmul.mubr.bf16.vlgmr.msra.gmra.mrb[16].mxu0 %v10745_v58  ;;  %v9122_v38 = vcombine.high %v2682_v33, %v2686_v34 }
 0x3ec   :  { %6050 = vmatmul.mubr.bf16.vlgmr.msra.gmra.mrb[16].mxu1 %v10745_v58  ;;  %5895 = vmatpush1.bf16.msra.mxu0 %v9063_v36  ;;  %v9081_v58 = vcombine.low %v2642_v52, %v2646_v10  ;;  %v9120_v36 = vcombine.high %v2681_v31, %v2685_v32 }
 0x3ed   :  { %5926 = vmatprep.mubr.bf16.mxu0 %v10763_v39  ;;  %6059 = vmatpush1.bf16.msra.mxu1 %v9065_v41  ;;  %v2693_v41 = vld [vmem:[#allocation8 + $0xa30] sm:$0xff] }
 0x3ee   :  { %6090 = vmatprep.mubr.bf16.mxu1 %v10763_v39  ;;  %5896 = vmatprep.subr.bf16.mxu0 %v9072_v43  ;;  %v9087_v39 = vcombine.low %v2649_v25, %v2653_v1  ;;  %v2690_v43 = vld [vmem:[#allocation8 + $0xa18] sm:$0xff]  ;;  %v9128_v52 = vcombine.high %v2689_v40, %v2693_v41  ;;  %v9127_v25 = vcombine.low %v2689_v40, %v2693_v41 }
 0x3ef   :  { %6060 = vmatprep.subr.bf16.mxu1 %v9074_v51  ;;  %v9121_v51 = vcombine.low %v2682_v33, %v2686_v34  ;;  %v9130_v10 = vcombine.high %v2690_v43, %v2694_v48  ;;  %v9129_v1 = vcombine.low %v2690_v43, %v2694_v48 }
 0x3f0   :  { %5897 = vmatpush1.bf16.msra.mxu0 %v9071_v56  ;;  %v2697_v56 = vld [vmem:[#allocation8 + $0xa50] sm:$0xff] }
 0x3f1   :  { %6061 = vmatpush1.bf16.msra.mxu1 %v9073_v57  ;;  %5898 = vmatprep.subr.bf16.mxu0 %v9080_v60  ;;  %v2701_v57 = vld [vmem:[#allocation8 + $0xa70] sm:$0xff]  ;;  %v2698_v60 = vld [vmem:[#allocation8 + $0xa58] sm:$0xff] }
 0x3f2   :  { %6062 = vmatprep.subr.bf16.mxu1 %v9082_v61  ;;  %v2702_v61 = vld [vmem:[#allocation8 + $0xa78] sm:$0xff]  ;;  %v9136_v2 = vcombine.high %v2697_v56, %v2701_v57  ;;  %v9135_v7 = vcombine.low %v2697_v56, %v2701_v57 }
 0x3f3   :  { %v9138_v3 = vcombine.high %v2698_v60, %v2702_v61  ;;  %v9137_v8 = vcombine.low %v2698_v60, %v2702_v61 }
 0x3f4   :  { %5899 = vmatpush1.bf16.msra.mxu0 %v9079_v0  ;;  %v2705_v0 = vld [vmem:[#allocation8 + $0xa90] sm:$0xff] }
 0x3f5   :  { %6063 = vmatpush1.bf16.msra.mxu1 %v9081_v58  ;;  %5900 = vmatprep.subr.bf16.mxu0 %v9088_v4  ;;  %v2709_v58 = vld [vmem:[#allocation8 + $0xab0] sm:$0xff]  ;;  %v2706_v4 = vld [vmem:[#allocation8 + $0xa98] sm:$0xff] }
 0x3f6   :  { %6064 = vmatprep.subr.bf16.mxu1 %v9090_v5  ;;  %v2710_v5 = vld [vmem:[#allocation8 + $0xab8] sm:$0xff]  ;;  %v9144_v9 = vcombine.high %v2705_v0, %v2709_v58  ;;  %v9143_v6 = vcombine.low %v2705_v0, %v2709_v58 }
 0x3f7   :  { %v9146_v30 = vcombine.high %v2706_v4, %v2710_v5  ;;  %v9145_v15 = vcombine.low %v2706_v4, %v2710_v5 }
 0x3f8   :  { %5901 = vmatpush1.bf16.msra.mxu0 %v9087_v39  ;;  %v2713_v39 = vld [vmem:[#allocation8 + $0xad0] sm:$0xff] }
 0x3f9   :  { %6065 = vmatpush1.bf16.msra.mxu1 %v9089_v11  ;;  %5902 = vmatprep.subr.bf16.mxu0 %v9096_v12  ;;  %v2717_v11 = vld [vmem:[#allocation8 + $0xaf0] sm:$0xff]  ;;  %v2714_v12 = vld [vmem:[#allocation8 + $0xad8] sm:$0xff] }
 0x3fa   :  { %6066 = vmatprep.subr.bf16.mxu1 %v9098_v14  ;;  %v2718_v14 = vld [vmem:[#allocation8 + $0xaf8] sm:$0xff]  ;;  %v9152_v46 = vcombine.high %v2713_v39, %v2717_v11  ;;  %v9151_v21 = vcombine.low %v2713_v39, %v2717_v11 }
 0x3fb   :  { %v9154_v16 = vcombine.high %v2714_v12, %v2718_v14  ;;  %v9153_v22 = vcombine.low %v2714_v12, %v2718_v14  ;;  %v2766_v39 = vld [vmem:[#allocation8 + $0xc78] sm:$0xff]  ;;  %v2769_v14 = vld [vmem:[#allocation8 + $0xc90] sm:$0xff] }
 0x3fc   :  { %5903 = vmatpush1.bf16.msra.mxu0 %v9095_v17  ;;  %v2721_v17 = vld [vmem:[#allocation8 + $0xb10] sm:$0xff] }
 0x3fd   :  { %6067 = vmatpush1.bf16.msra.mxu1 %v9097_v18  ;;  %5904 = vmatprep.subr.bf16.mxu0 %v9104_v19  ;;  %v2725_v18 = vld [vmem:[#allocation8 + $0xb30] sm:$0xff]  ;;  %v2722_v19 = vld [vmem:[#allocation8 + $0xb18] sm:$0xff] }
 0x3fe   :  { %6068 = vmatprep.subr.bf16.mxu1 %v9106_v20  ;;  %v2726_v20 = vld [vmem:[#allocation8 + $0xb38] sm:$0xff]  ;;  %v9160_v27 = vcombine.high %v2721_v17, %v2725_v18  ;;  %v9159_v31 = vcombine.low %v2721_v17, %v2725_v18 }
 0x3ff   :  { %v9162_v23 = vcombine.high %v2722_v19, %v2726_v20  ;;  %v9161_v32 = vcombine.low %v2722_v19, %v2726_v20 }
 0x400   :  { %5905 = vmatpush1.bf16.msra.mxu0 %v9103_v24  ;;  %v2729_v24 = vld [vmem:[#allocation8 + $0xb50] sm:$0xff] }
 0x401   :  { %6069 = vmatpush1.bf16.msra.mxu1 %v9105_v29  ;;  %5906 = vmatprep.subr.bf16.mxu0 %v9112_v26  ;;  %v2733_v29 = vld [vmem:[#allocation8 + $0xb70] sm:$0xff]  ;;  %v2730_v26 = vld [vmem:[#allocation8 + $0xb58] sm:$0xff] }
 0x402   :  { %6070 = vmatprep.subr.bf16.mxu1 %v9114_v28  ;;  %v2734_v28 = vld [vmem:[#allocation8 + $0xb78] sm:$0xff]  ;;  %v9168_v33 = vcombine.high %v2729_v24, %v2733_v29  ;;  %v9167_v40 = vcombine.low %v2729_v24, %v2733_v29 }
 0x403   :  { %v9170_v34 = vcombine.high %v2730_v26, %v2734_v28  ;;  %v9169_v41 = vcombine.low %v2730_v26, %v2734_v28  ;;  %v2785_v28 = vld [vmem:[#allocation8 + $0xd10] sm:$0xff] }
 0x404   :  { %5907 = vmatpush1.bf16.msra.mxu0 %v9111_v37  ;;  %v2737_v37 = vld [vmem:[#allocation8 + $0xb90] sm:$0xff] }
 0x405   :  { %6071 = vmatpush1.bf16.msra.mxu1 %v9113_v35  ;;  %5908 = vmatprep.subr.bf16.mxu0 %v9120_v36  ;;  %v2741_v35 = vld [vmem:[#allocation8 + $0xbb0] sm:$0xff]  ;;  %v2738_v36 = vld [vmem:[#allocation8 + $0xb98] sm:$0xff] }
 0x406   :  { %6072 = vmatprep.subr.bf16.mxu1 %v9122_v38  ;;  %v2742_v38 = vld [vmem:[#allocation8 + $0xbb8] sm:$0xff]  ;;  %v9176_v43 = vcombine.high %v2737_v37, %v2741_v35  ;;  %v9175_v56 = vcombine.low %v2737_v37, %v2741_v35 }
 0x407   :  { %v9178_v48 = vcombine.high %v2738_v36, %v2742_v38  ;;  %v9177_v57 = vcombine.low %v2738_v36, %v2742_v38  ;;  %v2793_v36 = vld [vmem:[#allocation8 + $0xd50] sm:$0xff] }
 0x408   :  { %5909 = vmatpush1.bf16.msra.mxu0 %v9119_v50  ;;  %v2745_v50 = vld [vmem:[#allocation8 + $0xbd0] sm:$0xff] }
 0x409   :  { %6073 = vmatpush1.bf16.msra.mxu1 %v9121_v51  ;;  %5910 = vmatprep.subr.bf16.mxu0 %v9128_v52  ;;  %v2749_v51 = vld [vmem:[#allocation8 + $0xbf0] sm:$0xff]  ;;  %v2746_v52 = vld [vmem:[#allocation8 + $0xbd8] sm:$0xff] }
 0x40a   :  { %6074 = vmatprep.subr.bf16.mxu1 %v9130_v10  ;;  %v2750_v10 = vld [vmem:[#allocation8 + $0xbf8] sm:$0xff]  ;;  %v9184_v60 = vcombine.high %v2745_v50, %v2749_v51  ;;  %v9183_v0 = vcombine.low %v2745_v50, %v2749_v51  ;;  %v2797_v38 = vld [vmem:[#allocation8 + $0xd70] sm:$0xff] }
 0x40b   :  { %v9186_v61 = vcombine.high %v2746_v52, %v2750_v10  ;;  %v9185_v58 = vcombine.low %v2746_v52, %v2750_v10  ;;  %v9232_v50 = vcombine.high %v2793_v36, %v2797_v38  ;;  %v2801_v52 = vld [vmem:[#allocation8 + $0xd90] sm:$0xff] }
 0x40c   :  { %5911 = vmatpush1.bf16.msra.mxu0 %v9127_v25  ;;  %v2753_v25 = vld [vmem:[#allocation8 + $0xc10] sm:$0xff] }
 0x40d   :  { %6075 = vmatpush1.bf16.msra.mxu1 %v9129_v1  ;;  %5912 = vmatprep.subr.bf16.mxu0 %v9136_v2  ;;  %v2757_v1 = vld [vmem:[#allocation8 + $0xc30] sm:$0xff]  ;;  %v2754_v2 = vld [vmem:[#allocation8 + $0xc18] sm:$0xff] }
 0x40e   :  { %6076 = vmatprep.subr.bf16.mxu1 %v9138_v3  ;;  %v2758_v3 = vld [vmem:[#allocation8 + $0xc38] sm:$0xff]  ;;  %v9192_v4 = vcombine.high %v2753_v25, %v2757_v1  ;;  %v2805_v10 = vld [vmem:[#allocation8 + $0xdb0] sm:$0xff] }
 0x40f   :  { %v9194_v5 = vcombine.high %v2754_v2, %v2758_v3  ;;  %v9193_v11 = vcombine.low %v2754_v2, %v2758_v3 }
 0x410   :  { %5913 = vmatpush1.bf16.msra.mxu0 %v9135_v7  ;;  %v2761_v7 = vld [vmem:[#allocation8 + $0xc50] sm:$0xff] }
 0x411   :  { %6077 = vmatpush1.bf16.msra.mxu1 %v9137_v8  ;;  %5914 = vmatprep.subr.bf16.mxu0 %v9144_v9  ;;  %v2765_v8 = vld [vmem:[#allocation8 + $0xc70] sm:$0xff]  ;;  %v9191_v9 = vcombine.low %v2753_v25, %v2757_v1  ;;  %v9240_v25 = vcombine.high %v2801_v52, %v2805_v10 }
 0x412   :  { %6078 = vmatprep.subr.bf16.mxu1 %v9146_v30  ;;  %v2762_v30 = vld [vmem:[#allocation8 + $0xc58] sm:$0xff]  ;;  %v9200_v12 = vcombine.high %v2761_v7, %v2765_v8  ;;  %v9199_v17 = vcombine.low %v2761_v7, %v2765_v8 }
 0x413   :  { %v9201_v18 = vcombine.low %v2762_v30, %v2766_v39  ;;  %v2810_v7 = vld [vmem:[#allocation8 + $0xdd8] sm:$0xff] }
 0x414   :  { %5915 = vmatpush1.bf16.msra.mxu0 %v9143_v6  ;;  %v2773_v6 = vld [vmem:[#allocation8 + $0xcb0] sm:$0xff]  ;;  %v2814_v8 = vld [vmem:[#allocation8 + $0xdf8] sm:$0xff] }
 0x415   :  { %6079 = vmatpush1.bf16.msra.mxu1 %v9145_v15  ;;  %5916 = vmatprep.subr.bf16.mxu0 %v9152_v46  ;;  %v9202_v15 = vcombine.high %v2762_v30, %v2766_v39  ;;  %v2770_v46 = vld [vmem:[#allocation8 + $0xc98] sm:$0xff]  ;;  %v9208_v19 = vcombine.high %v2769_v14, %v2773_v6  ;;  %v9207_v24 = vcombine.low %v2769_v14, %v2773_v6 }
 0x416   :  { %6080 = vmatprep.subr.bf16.mxu1 %v9154_v16  ;;  %v2774_v16 = vld [vmem:[#allocation8 + $0xcb8] sm:$0xff]  ;;  %v9239_v39 = vcombine.low %v2801_v52, %v2805_v10 }
 0x417   :  { %v9210_v20 = vcombine.high %v2770_v46, %v2774_v16 }
 0x418   :  { %5917 = vmatpush1.bf16.msra.mxu0 %v9151_v21  ;;  %v2777_v21 = vld [vmem:[#allocation8 + $0xcd0] sm:$0xff] }
 0x419   :  { %6081 = vmatpush1.bf16.msra.mxu1 %v9153_v22  ;;  %5918 = vmatprep.subr.bf16.mxu0 %v9160_v27  ;;  %v2781_v22 = vld [vmem:[#allocation8 + $0xcf0] sm:$0xff]  ;;  %v2778_v27 = vld [vmem:[#allocation8 + $0xcd8] sm:$0xff] }
 0x41a   :  { %6082 = vmatprep.subr.bf16.mxu1 %v9162_v23  ;;  %v2782_v23 = vld [vmem:[#allocation8 + $0xcf8] sm:$0xff]  ;;  %v9216_v29 = vcombine.high %v2777_v21, %v2781_v22 }
 0x41b   :  { %v9218_v26 = vcombine.high %v2778_v27, %v2782_v23 }
 0x41c   :  { %5919 = vmatpush1.bf16.msra.mxu0 %v9159_v31  ;;  %v2789_v31 = vld [vmem:[#allocation8 + $0xd30] sm:$0xff] }
 0x41d   :  { %6083 = vmatpush1.bf16.msra.mxu1 %v9161_v32  ;;  %5920 = vmatprep.subr.bf16.mxu0 %v9168_v33  ;;  %v2786_v32 = vld [vmem:[#allocation8 + $0xd18] sm:$0xff]  ;;  %v9224_v37 = vcombine.high %v2785_v28, %v2789_v31 }
 0x41e   :  { %6084 = vmatprep.subr.bf16.mxu1 %v9170_v34  ;;  %v2790_v33 = vld [vmem:[#allocation8 + $0xd38] sm:$0xff]  ;;  %v9217_v34 = vcombine.low %v2778_v27, %v2782_v23  ;;  %v2825_v27 = vld [vmem:[#allocation8 + $0xe50] sm:$0xff] }
 0x41f   :  { %v9226_v35 = vcombine.high %v2786_v32, %v2790_v33  ;;  %v2829_v23 = vld [vmem:[#allocation8 + $0xe70] sm:$0xff] }
 0x420   :  { %5921 = vmatpush1.bf16.msra.mxu0 %v9167_v40  ;;  %v2794_v40 = vld [vmem:[#allocation8 + $0xd58] sm:$0xff] }
 0x421   :  { %6085 = vmatpush1.bf16.msra.mxu1 %v9169_v41  ;;  %5922 = vmatprep.subr.bf16.mxu0 %v9176_v43  ;;  %v2798_v41 = vld [vmem:[#allocation8 + $0xd78] sm:$0xff]  ;;  %v9223_v43 = vcombine.low %v2785_v28, %v2789_v31  ;;  %v9264_v28 = vcombine.high %v2825_v27, %v2829_v23 }
 0x422   :  { %6086 = vmatprep.subr.bf16.mxu1 %v9178_v48  ;;  %v9225_v48 = vcombine.low %v2786_v32, %v2790_v33  ;;  %v9234_v51 = vcombine.high %v2794_v40, %v2798_v41  ;;  %v2833_v32 = vld [vmem:[#allocation8 + $0xe90] sm:$0xff] }
 0x423   :  { %v2837_v33 = vld [vmem:[#allocation8 + $0xeb0] sm:$0xff] }
 0x424   :  { %5923 = vmatpush1.bf16.msra.mxu0 %v9175_v56  ;;  %v2802_v56 = vld [vmem:[#allocation8 + $0xd98] sm:$0xff] }
 0x425   :  { %6087 = vmatpush1.bf16.msra.mxu1 %v9177_v57  ;;  %5924 = vmatprep.subr.bf16.mxu0 %v9184_v60  ;;  %v2806_v57 = vld [vmem:[#allocation8 + $0xdb8] sm:$0xff]  ;;  %v9231_v60 = vcombine.low %v2793_v36, %v2797_v38  ;;  %v9272_v36 = vcombine.high %v2833_v32, %v2837_v33 }
 0x426   :  { %6088 = vmatprep.subr.bf16.mxu1 %v9186_v61  ;;  %v9233_v61 = vcombine.low %v2794_v40, %v2798_v41  ;;  %v9242_v3 = vcombine.high %v2802_v56, %v2806_v57  ;;  %v9241_v14 = vcombine.low %v2802_v56, %v2806_v57  ;;  %v2841_v40 = vld [vmem:[#allocation8 + $0xed0] sm:$0xff] }
 0x427   :  { %v2845_v41 = vld [vmem:[#allocation8 + $0xef0] sm:$0xff] }
 0x428   :  { %5925 = vmatpush1.bf16.msra.mxu0 %v9183_v0  ;;  %v2809_v0 = vld [vmem:[#allocation8 + $0xdd0] sm:$0xff]  ;;  %v9280_v52 = vcombine.high %v2841_v40, %v2845_v41 }
 0x429   :  { %6089 = vmatpush1.bf16.msra.mxu1 %v9185_v58  ;;  %5935 = vmatprep.subr.bf16.mxu0 %v9192_v4  ;;  %v2813_v58 = vld [vmem:[#allocation8 + $0xdf0] sm:$0xff] }
 0x42a   :  { %6099 = vmatprep.subr.bf16.mxu1 %v9194_v5  ;;  %v9248_v6 = vcombine.high %v2809_v0, %v2813_v58  ;;  %v2849_v56 = vld [vmem:[#allocation8 + $0xf10] sm:$0xff] }
 0x42b   :  { %5927 = vmatmul.mubr.bf16.vlgmr.msra.gmra.mrb[16].mxu0 %v10765_v42  ;;  %v2853_v57 = vld [vmem:[#allocation8 + $0xf30] sm:$0xff] }
 0x42c   :  { %6091 = vmatmul.mubr.bf16.vlgmr.msra.gmra.mrb[16].mxu1 %v10765_v42  ;;  %5936 = vmatpush1.bf16.msra.mxu0 %v9191_v9  ;;  %v9209_v42 = vcombine.low %v2770_v46, %v2774_v16  ;;  %v2817_v46 = vld [vmem:[#allocation8 + $0xe10] sm:$0xff] }
 0x42d   :  { %5967 = vmatprep.mubr.bf16.mxu0 %v10769_v63  ;;  %6100 = vmatpush1.bf16.msra.mxu1 %v9193_v11  ;;  %v2821_v16 = vld [vmem:[#allocation8 + $0xe30] sm:$0xff] }
 0x42e   :  { %6131 = vmatprep.mubr.bf16.mxu1 %v10769_v63  ;;  %5937 = vmatprep.subr.bf16.mxu0 %v9200_v12  ;;  %v9215_v63 = vcombine.low %v2777_v21, %v2781_v22  ;;  %v9256_v21 = vcombine.high %v2817_v46, %v2821_v16 }
 0x42f   :  { %6101 = vmatprep.subr.bf16.mxu1 %v9202_v15  ;;  %v9250_v15 = vcombine.high %v2810_v7, %v2814_v8 }
 0x430   :  { %5938 = vmatpush1.bf16.msra.mxu0 %v9199_v17  ;;  %v2818_v17 = vld [vmem:[#allocation8 + $0xe18] sm:$0xff] }
 0x431   :  { %6102 = vmatpush1.bf16.msra.mxu1 %v9201_v18  ;;  %5939 = vmatprep.subr.bf16.mxu0 %v9208_v19  ;;  %v2822_v18 = vld [vmem:[#allocation8 + $0xe38] sm:$0xff]  ;;  %v9247_v19 = vcombine.low %v2809_v0, %v2813_v58  ;;  %v9288_v0 = vcombine.high %v2849_v56, %v2853_v57 }
 0x432   :  { %6103 = vmatprep.subr.bf16.mxu1 %v9210_v20  ;;  %v9249_v20 = vcombine.low %v2810_v7, %v2814_v8  ;;  %v9258_v22 = vcombine.high %v2818_v17, %v2822_v18  ;;  %v2857_v7 = vld [vmem:[#allocation8 + $0xf50] sm:$0xff] }
 0x433   :  { %v2861_v8 = vld [vmem:[#allocation8 + $0xf70] sm:$0xff] }
 0x434   :  { %5940 = vmatpush1.bf16.msra.mxu0 %v9207_v24  ;;  %v2826_v24 = vld [vmem:[#allocation8 + $0xe58] sm:$0xff] }
 0x435   :  { %6104 = vmatpush1.bf16.msra.mxu1 %v9209_v42  ;;  %5941 = vmatprep.subr.bf16.mxu0 %v9216_v29  ;;  %v2830_v42 = vld [vmem:[#allocation8 + $0xe78] sm:$0xff]  ;;  %v9255_v29 = vcombine.low %v2817_v46, %v2821_v16  ;;  %v2865_v46 = vld [vmem:[#allocation8 + $0xf90] sm:$0xff] }
 0x436   :  { %6105 = vmatprep.subr.bf16.mxu1 %v9218_v26  ;;  %v9257_v26 = vcombine.low %v2818_v17, %v2822_v18  ;;  %v9266_v31 = vcombine.high %v2826_v24, %v2830_v42  ;;  %v2869_v16 = vld [vmem:[#allocation8 + $0xfb0] sm:$0xff]  ;;  %v2866_v18 = vld [vmem:[#allocation8 + $0xf98] sm:$0xff] }
 0x438   :  { %5942 = vmatpush1.bf16.msra.mxu0 %v9215_v63  ;;  %v2834_v63 = vld [vmem:[#allocation8 + $0xe98] sm:$0xff] }
 0x439   :  { %6106 = vmatpush1.bf16.msra.mxu1 %v9217_v34  ;;  %5943 = vmatprep.subr.bf16.mxu0 %v9224_v37  ;;  %v2838_v34 = vld [vmem:[#allocation8 + $0xeb8] sm:$0xff]  ;;  %v9263_v37 = vcombine.low %v2825_v27, %v2829_v23  ;;  %v2873_v23 = vld [vmem:[#allocation8 + $0xfd0] sm:$0xff] }
 0x43a   :  { %6107 = vmatprep.subr.bf16.mxu1 %v9226_v35  ;;  %v9265_v35 = vcombine.low %v2826_v24, %v2830_v42  ;;  %v9274_v38 = vcombine.high %v2834_v63, %v2838_v34  ;;  %v2877_v24 = vld [vmem:[#allocation8 + $0xff0] sm:$0xff] }
 0x43c   :  { %5944 = vmatpush1.bf16.msra.mxu0 %v9223_v43  ;;  %v2842_v43 = vld [vmem:[#allocation8 + $0xed8] sm:$0xff] }
 0x43d   :  { %6108 = vmatpush1.bf16.msra.mxu1 %v9225_v48  ;;  %5945 = vmatprep.subr.bf16.mxu0 %v9232_v50  ;;  %v2846_v48 = vld [vmem:[#allocation8 + $0xef8] sm:$0xff]  ;;  %v9271_v50 = vcombine.low %v2833_v32, %v2837_v33  ;;  %v9312_v32 = vcombine.high %v2873_v23, %v2877_v24 }
 0x43e   :  { %v10798_v1 = vpop.f32.mrb[12].mxu0  ;;  %v10800_v2 = vpop.f32.mrb[12].mxu1  ;;  %6109 = vmatprep.subr.bf16.mxu1 %v9234_v51  ;;  %v9273_v51 = vcombine.low %v2834_v63, %v2838_v34  ;;  %v9282_v10 = vcombine.high %v2842_v43, %v2846_v48  ;;  %v9311_v34 = vcombine.low %v2873_v23, %v2877_v24  ;;  %v9917_v23 = vld [vmem:[#allocation10 + $0x12c] ss:$16 sps:$4 sm:$0xff]   ;;  %v9912_v24 = vld [vmem:[#allocation10 + $0x120] ss:$16 sps:$4 sm:$0xff]  }
 0x43f   :  { %v10802_v4 = vpop.f32.mrb[13].mxu0  ;;  %v10804_v5 = vpop.f32.mrb[13].mxu1 }
 0x440   :  { %v5645_v9 = vpop.f32.mrb[14].mxu0  ;;  %v5809_v30 = vpop.f32.mrb[14].mxu1  ;;  %5946 = vmatpush1.bf16.msra.mxu0 %v9231_v60  ;;  %v2850_v60 = vld [vmem:[#allocation8 + $0xf18] sm:$0xff] }
 0x441   :  { %6110 = vmatpush1.bf16.msra.mxu1 %v9233_v61  ;;  %v5646_v11 = vpop.f32.mrb[15].mxu0  ;;  %v5810_v12 = vpop.f32.mrb[15].mxu1  ;;  %5947 = vmatprep.subr.bf16.mxu0 %v9240_v25  ;;  %v2854_v61 = vld [vmem:[#allocation8 + $0xf38] sm:$0xff]  ;;  %v9279_v25 = vcombine.low %v2841_v40, %v2845_v41  ;;  %v9858_v40 = vld [vmem:[#allocation10] ss:$16 sps:$4 sm:$0xff]  }
 0x442   :  { %6111 = vmatprep.subr.bf16.mxu1 %v9242_v3  ;;  %v9281_v3 = vcombine.low %v2842_v43, %v2846_v48  ;;  %v9290_v58 = vcombine.high %v2850_v60, %v2854_v61  ;;  %v2858_v9 = vld [vmem:[#allocation8 + $0xf58] sm:$0xff]  ;;  %v9287_v12 = vcombine.low %v2849_v56, %v2853_v57  ;;  %v9866_v43 = vld [vmem:[#allocation10 + $0x24] ss:$16 sps:$4 sm:$0xff]   ;;  %v9870_v56 = vld [vmem:[#allocation10 + $0x40] ss:$16 sps:$4 sm:$0xff]  }
 0x443   :  { %v2862_v30 = vld [vmem:[#allocation8 + $0xf78] sm:$0xff] }
 0x444   :  { %5948 = vmatpush1.bf16.msra.mxu0 %v9239_v39  ;;  %v2880_v39 = vld [vmem:[#allocation14 + $0x2] ss:$8 sm:$0xf] }
 0x445   :  { %6112 = vmatpush1.bf16.msra.mxu1 %v9241_v14  ;;  %5949 = vmatprep.subr.bf16.mxu0 %v9248_v6  ;;  %v2881_v11 = vld [vmem:[#allocation14 + $0x2] ss:$8 sm:$0xf0]  ;;  %v9289_v14 = vcombine.low %v2850_v60, %v2854_v61  ;;  %v9296_v6 = vcombine.high %v2857_v7, %v2861_v8  ;;  %v9878_v60 = vld [vmem:[#allocation10 + $0x64] ss:$16 sps:$4 sm:$0xff]  }
 0x446   :  { %6113 = vmatprep.subr.bf16.mxu1 %v9250_v15  ;;  %v9298_v15 = vcombine.high %v2858_v9, %v2862_v30  ;;  %v10806_v17 = vor.u32 %v2881_v11, %v2880_v39  ;;  %v9861_v41 = vld [vmem:[#allocation10 + $0x8] ss:$16 sps:$4 sm:$0xff]   ;;  %v9881_v61 = vld [vmem:[#allocation10 + $0x6c] ss:$16 sps:$4 sm:$0xff]   ;;  %v9896_v11 = vld [vmem:[#allocation10 + $0xc4] ss:$16 sps:$4 sm:$0xff]  }
 0x447   :  { %v9873_v57 = vld [vmem:[#allocation10 + $0x48] ss:$16 sps:$4 sm:$0xff]  }
 0x448   :  { %5950 = vmatpush1.bf16.msra.mxu0 %v9247_v19  ;;  %v2870_v19 = vld [vmem:[#allocation8 + $0xfb8] sm:$0xff]  ;;  %v2891_v42 = vrot.slane %v10806_v17, %v10677_v47 }
 0x449   :  { %6114 = vmatpush1.bf16.msra.mxu1 %v9249_v20  ;;  %5951 = vmatprep.subr.bf16.mxu0 %v9256_v21  ;;  %v9295_v20 = vcombine.low %v2857_v7, %v2861_v8  ;;  %v9297_v21 = vcombine.low %v2858_v9, %v2862_v30  ;;  %v9306_v27 = vcombine.high %v2866_v18, %v2870_v19  ;;  %v9885_v7 = vld [vmem:[#allocation10 + $0x88] ss:$16 sps:$4 sm:$0xff]   ;;  %v9890_v8 = vld [vmem:[#allocation10 + $0xa4] ss:$16 sps:$4 sm:$0xff]   ;;  %v9893_v9 = vld [vmem:[#allocation10 + $0xac] ss:$16 sps:$4 sm:$0xff]  }
 0x44a   :  { %6115 = vmatprep.subr.bf16.mxu1 %v9258_v22  ;;  %v9304_v22 = vcombine.high %v2865_v46, %v2869_v16  ;;  %v9693_v63 = vadd.f32 %v10802_v4, %v2891_v42  ;;  %v9869_v4 = vld [vmem:[#allocation10 + $0x2c] ss:$16 sps:$4 sm:$0xff]   ;;  %v9888_v30 = vld [vmem:[#allocation10 + $0xa0] ss:$16 sps:$4 sm:$0xff]   ;;  %v9891_v39 = vld [vmem:[#allocation10 + $0xa8] ss:$16 sps:$4 sm:$0xff]  }
 0x44b   :  { %v9915_v42 = vld [vmem:[#allocation10 + $0x128] ss:$16 sps:$4 sm:$0xff]  }
 0x44c   :  { %5952 = vmatpush1.bf16.msra.mxu0 %v9255_v29  ;;  %v2874_v29 = vld [vmem:[#allocation8 + $0xfd8] sm:$0xff] }
 0x44d   :  { %6116 = vmatpush1.bf16.msra.mxu1 %v9257_v26  ;;  %5953 = vmatprep.subr.bf16.mxu0 %v9264_v28  ;;  %v2878_v26 = vld [vmem:[#allocation8 + $0xff8] sm:$0xff]  ;;  %v9303_v28 = vcombine.low %v2865_v46, %v2869_v16  ;;  %v9900_v16 = vld [vmem:[#allocation10 + $0xe0] ss:$16 sps:$4 sm:$0xff]  }
 0x44e   :  { %6117 = vmatprep.subr.bf16.mxu1 %v9266_v31  ;;  %v9305_v31 = vcombine.low %v2866_v18, %v2870_v19  ;;  %v9314_v33 = vcombine.high %v2874_v29, %v2878_v26  ;;  %v9905_v46 = vld [vmem:[#allocation10 + $0xec] ss:$16 sps:$4 sm:$0xff]   ;;  %v9903_v18 = vld [vmem:[#allocation10 + $0xe8] ss:$16 sps:$4 sm:$0xff]   ;;  %v9908_v19 = vld [vmem:[#allocation10 + $0x104] ss:$16 sps:$4 sm:$0xff]  }
 0x450   :  { %5954 = vmatpush1.bf16.msra.mxu0 %v9263_v37  ;;  %v9313_v37 = vcombine.low %v2874_v29, %v2878_v26  ;;  %v9920_v29 = vld [vmem:[#allocation10 + $0x144] ss:$16 sps:$4 sm:$0xff]   ;;  %v9923_v26 = vld [vmem:[#allocation10 + $0x14c] ss:$16 sps:$4 sm:$0xff]  }
 0x451   :  { %6118 = vmatpush1.bf16.msra.mxu1 %v9265_v35  ;;  %5955 = vmatprep.subr.bf16.mxu0 %v9272_v36  ;;  %v9860_v35 = vld [vmem:[#allocation10 + $0x4] ss:$16 sps:$4 sm:$0xff]   ;;  %v9863_v36 = vld [vmem:[#allocation10 + $0xc] ss:$16 sps:$4 sm:$0xff]  }
 0x452   :  { %6119 = vmatprep.subr.bf16.mxu1 %v9274_v38  ;;  %v6141_v38 = vmax.f32 %v9693_v63, 0.0  ;;  %v9924_v63 = vld [vmem:[#allocation10 + $0x160] ss:$16 sps:$4 sm:$0xff]  }
 0x454   :  { %5956 = vmatpush1.bf16.msra.mxu0 %v9271_v50  ;;  %v6149_v48 = vpack.c.bf16 %v6141_v38, %v6141_v38  ;;  %v9864_v50 = vld [vmem:[#allocation10 + $0x20] ss:$16 sps:$4 sm:$0xff]   ;;  %v9933_v38 = vld [vmem:[#allocation10 + $0x188] ss:$16 sps:$4 sm:$0xff]  }
 0x455   :  { %6120 = vmatpush1.bf16.msra.mxu1 %v9273_v51  ;;  %5957 = vmatprep.subr.bf16.mxu0 %v9280_v52  ;;  %v9867_v51 = vld [vmem:[#allocation10 + $0x28] ss:$16 sps:$4 sm:$0xff]   ;;  %v9872_v52 = vld [vmem:[#allocation10 + $0x44] ss:$16 sps:$4 sm:$0xff]  }
 0x456   :  { %6121 = vmatprep.subr.bf16.mxu1 %v9282_v10  ;;  %v9875_v10 = vld [vmem:[#allocation10 + $0x4c] ss:$16 sps:$4 sm:$0xff]  }
 0x458   :  { %5958 = vmatpush1.bf16.msra.mxu0 %v9279_v25  ;;  %v9879_v25 = vld [vmem:[#allocation10 + $0x68] ss:$16 sps:$4 sm:$0xff]  }
 0x459   :  { %6122 = vmatpush1.bf16.msra.mxu1 %v9281_v3  ;;  %5959 = vmatprep.subr.bf16.mxu0 %v9288_v0  ;;  %v9884_v3 = vld [vmem:[#allocation10 + $0x84] ss:$16 sps:$4 sm:$0xff]   ;;  %v9887_v0 = vld [vmem:[#allocation10 + $0x8c] ss:$16 sps:$4 sm:$0xff]  }
 0x45a   :  { %6123 = vmatprep.subr.bf16.mxu1 %v9290_v58  ;;  %v9882_v58 = vld [vmem:[#allocation10 + $0x80] ss:$16 sps:$4 sm:$0xff]  }
 0x45c   :  { %5960 = vmatpush1.bf16.msra.mxu0 %v9287_v12  ;;  %v9899_v12 = vld [vmem:[#allocation10 + $0xcc] ss:$16 sps:$4 sm:$0xff]  }
 0x45d   :  { %6124 = vmatpush1.bf16.msra.mxu1 %v9289_v14  ;;  %5961 = vmatprep.subr.bf16.mxu0 %v9296_v6  ;;  %v9894_v14 = vld [vmem:[#allocation10 + $0xc0] ss:$16 sps:$4 sm:$0xff]   ;;  %v9897_v6 = vld [vmem:[#allocation10 + $0xc8] ss:$16 sps:$4 sm:$0xff]  }
 0x45e   :  { %6125 = vmatprep.subr.bf16.mxu1 %v9298_v15  ;;  %v9902_v15 = vld [vmem:[#allocation10 + $0xe4] ss:$16 sps:$4 sm:$0xff]  }
 0x460   :  { %5962 = vmatpush1.bf16.msra.mxu0 %v9295_v20  ;;  %v9911_v20 = vld [vmem:[#allocation10 + $0x10c] ss:$16 sps:$4 sm:$0xff]  }
 0x461   :  { %6126 = vmatpush1.bf16.msra.mxu1 %v9297_v21  ;;  %5963 = vmatprep.subr.bf16.mxu0 %v9304_v22  ;;  %v9906_v21 = vld [vmem:[#allocation10 + $0x100] ss:$16 sps:$4 sm:$0xff]   ;;  %v9909_v22 = vld [vmem:[#allocation10 + $0x108] ss:$16 sps:$4 sm:$0xff]  }
 0x462   :  { %6127 = vmatprep.subr.bf16.mxu1 %v9306_v27  ;;  %v9914_v27 = vld [vmem:[#allocation10 + $0x124] ss:$16 sps:$4 sm:$0xff]  }
 0x464   :  { %5964 = vmatpush1.bf16.msra.mxu0 %v9303_v28  ;;  %v9918_v28 = vld [vmem:[#allocation10 + $0x140] ss:$16 sps:$4 sm:$0xff]  }
 0x465   :  { %6128 = vmatpush1.bf16.msra.mxu1 %v9305_v31  ;;  %5965 = vmatprep.subr.bf16.mxu0 %v9312_v32  ;;  %v9921_v31 = vld [vmem:[#allocation10 + $0x148] ss:$16 sps:$4 sm:$0xff]   ;;  %v9926_v32 = vld [vmem:[#allocation10 + $0x164] ss:$16 sps:$4 sm:$0xff]  }
 0x466   :  { %6129 = vmatprep.subr.bf16.mxu1 %v9314_v33  ;;  %v9929_v33 = vld [vmem:[#allocation10 + $0x16c] ss:$16 sps:$4 sm:$0xff]  }
 0x468   :  { %5966 = vmatpush1.bf16.msra.mxu0 %v9311_v34  ;;  %v9927_v34 = vld [vmem:[#allocation10 + $0x168] ss:$16 sps:$4 sm:$0xff]  }
 0x469   :  { %6130 = vmatpush1.bf16.msra.mxu1 %v9313_v37  ;;  %7715 = vmatprep.subr.bf16.mxu0 %v9860_v35  ;;  %v9932_v37 = vld [vmem:[#allocation10 + $0x184] ss:$16 sps:$4 sm:$0xff]   ;;  %v9935_v35 = vld [vmem:[#allocation10 + $0x18c] ss:$16 sps:$4 sm:$0xff]  }
 0x46a   :  { %7879 = vmatprep.subr.bf16.mxu1 %v9863_v36  ;;  %v9930_v36 = vld [vmem:[#allocation10 + $0x180] ss:$16 sps:$4 sm:$0xff]  }
 0x46b   :  { %5968 = vmatmul.mubr.bf16.vlgmr.msra.gmra.mrb[16].mxu0 %v10780_v13 }
 0x46c   :  { %6132 = vmatmul.mubr.bf16.vlgmr.msra.gmra.mrb[16].mxu1 %v10780_v13  ;;  %7716 = vmatpush1.bf16.msra.mxu0 %v9858_v40  ;;  %v9876_v13 = vld [vmem:[#allocation10 + $0x60] ss:$16 sps:$4 sm:$0xff]   ;;  %v9938_v40 = vld [vmem:[#allocation10 + $0x1a4] ss:$16 sps:$4 sm:$0xff]  }
 0x46d   :  { %7747 = vmatprep.mubr.bf16.mxu0 %v6149_v48  ;;  %7880 = vmatpush1.bf16.msra.mxu1 %v9861_v41  ;;  %v9941_v41 = vld [vmem:[#allocation10 + $0x1ac] ss:$16 sps:$4 sm:$0xff]  }
 0x46e   :  { %7911 = vmatprep.mubr.bf16.mxu1 %v6149_v48  ;;  %7717 = vmatprep.subr.bf16.mxu0 %v9866_v43  ;;  %v9936_v43 = vld [vmem:[#allocation10 + $0x1a0] ss:$16 sps:$4 sm:$0xff]   ;;  %v2887_v48 = vrot.slane %v10806_v17, %v10672_v45 }
 0x46f   :  { %7881 = vmatprep.subr.bf16.mxu1 %v9869_v4  ;;  %v9939_v4 = vld [vmem:[#allocation10 + $0x1a8] ss:$16 sps:$4 sm:$0xff]  }
 0x470   :  { %7718 = vmatpush1.bf16.msra.mxu0 %v9864_v50  ;;  %v9944_v50 = vld [vmem:[#allocation10 + $0x1c4] ss:$16 sps:$4 sm:$0xff]  }
 0x471   :  { %7882 = vmatpush1.bf16.msra.mxu1 %v9867_v51  ;;  %7719 = vmatprep.subr.bf16.mxu0 %v9872_v52  ;;  %v9947_v51 = vld [vmem:[#allocation10 + $0x1cc] ss:$16 sps:$4 sm:$0xff]   ;;  %v2899_v52 = vrot.slane %v10806_v17, %v10684_v62 }
 0x472   :  { %7883 = vmatprep.subr.bf16.mxu1 %v9875_v10  ;;  %v9942_v10 = vld [vmem:[#allocation10 + $0x1c0] ss:$16 sps:$4 sm:$0xff]  }
 0x474   :  { %7720 = vmatpush1.bf16.msra.mxu0 %v9870_v56  ;;  %v9692_v56 = vadd.f32 %v10798_v1, %v2887_v48  ;;  %v9954_v1 = vld [vmem:[#allocation10 + $0x200] ss:$16 sps:$4 sm:$0xff]   ;;  %v10010_v48 = vld [vmem:[#allocation10 + $0x324] ss:$16 sps:$4 sm:$0xff]  }
 0x475   :  { %7884 = vmatpush1.bf16.msra.mxu1 %v9873_v57  ;;  %7721 = vmatprep.subr.bf16.mxu0 %v9878_v60  ;;  %v9945_v57 = vld [vmem:[#allocation10 + $0x1c8] ss:$16 sps:$4 sm:$0xff]   ;;  %v9950_v60 = vld [vmem:[#allocation10 + $0x1e4] ss:$16 sps:$4 sm:$0xff]  }
 0x476   :  { %7885 = vmatprep.subr.bf16.mxu1 %v9881_v61  ;;  %v9953_v61 = vld [vmem:[#allocation10 + $0x1ec] ss:$16 sps:$4 sm:$0xff]  }
 0x478   :  { %7722 = vmatpush1.bf16.msra.mxu0 %v9876_v13  ;;  %v9695_v13 = vadd.f32 %v10804_v5, %v2899_v52  ;;  %v9965_v5 = vld [vmem:[#allocation10 + $0x22c] ss:$16 sps:$4 sm:$0xff]   ;;  %v10016_v52 = vld [vmem:[#allocation10 + $0x344] ss:$16 sps:$4 sm:$0xff]  }
 0x479   :  { %7886 = vmatpush1.bf16.msra.mxu1 %v9879_v25  ;;  %7723 = vmatprep.subr.bf16.mxu0 %v9884_v3  ;;  %v9948_v25 = vld [vmem:[#allocation10 + $0x1e0] ss:$16 sps:$4 sm:$0xff]   ;;  %v6140_v3 = vmax.f32 %v9692_v56, 0.0 }
 0x47a   :  { %7887 = vmatprep.subr.bf16.mxu1 %v9887_v0  ;;  %v9951_v0 = vld [vmem:[#allocation10 + $0x1e8] ss:$16 sps:$4 sm:$0xff]   ;;  %v10014_v56 = vld [vmem:[#allocation10 + $0x340] ss:$16 sps:$4 sm:$0xff]  }
 0x47c   :  { %7724 = vmatpush1.bf16.msra.mxu0 %v9882_v58  ;;  %v9956_v58 = vld [vmem:[#allocation10 + $0x204] ss:$16 sps:$4 sm:$0xff]  }
 0x47d   :  { %7888 = vmatpush1.bf16.msra.mxu1 %v9885_v7  ;;  %7725 = vmatprep.subr.bf16.mxu0 %v9890_v8  ;;  %v9959_v7 = vld [vmem:[#allocation10 + $0x20c] ss:$16 sps:$4 sm:$0xff]   ;;  %v6143_v8 = vmax.f32 %v9695_v13, 0.0  ;;  %v10020_v13 = vld [vmem:[#allocation10 + $0x360] ss:$16 sps:$4 sm:$0xff]  }
 0x47e   :  { %7889 = vmatprep.subr.bf16.mxu1 %v9893_v9  ;;  %v6148_v9 = vpack.c.bf16 %v6140_v3, %v6140_v3  ;;  %v10028_v3 = vld [vmem:[#allocation10 + $0x384] ss:$16 sps:$4 sm:$0xff]  }
 0x480   :  { %7726 = vmatpush1.bf16.msra.mxu0 %v9888_v30  ;;  %v9957_v30 = vld [vmem:[#allocation10 + $0x208] ss:$16 sps:$4 sm:$0xff]  }
 0x481   :  { %7890 = vmatpush1.bf16.msra.mxu1 %v9891_v39  ;;  %7727 = vmatprep.subr.bf16.mxu0 %v9896_v11  ;;  %v9962_v39 = vld [vmem:[#allocation10 + $0x224] ss:$16 sps:$4 sm:$0xff]   ;;  %v6151_v11 = vpack.c.bf16 %v6143_v8, %v6143_v8 }
 0x482   :  { %7891 = vmatprep.subr.bf16.mxu1 %v9899_v12  ;;  %v9960_v12 = vld [vmem:[#allocation10 + $0x220] ss:$16 sps:$4 sm:$0xff]   ;;  %v10034_v8 = vld [vmem:[#allocation10 + $0x3a4] ss:$16 sps:$4 sm:$0xff]  }
 0x484   :  { %7728 = vmatpush1.bf16.msra.mxu0 %v9894_v14  ;;  %v9963_v14 = vld [vmem:[#allocation10 + $0x228] ss:$16 sps:$4 sm:$0xff]  }
 0x485   :  { %7892 = vmatpush1.bf16.msra.mxu1 %v9897_v6  ;;  %7729 = vmatprep.subr.bf16.mxu0 %v9902_v15  ;;  %v9968_v6 = vld [vmem:[#allocation10 + $0x244] ss:$16 sps:$4 sm:$0xff]   ;;  %v9971_v15 = vld [vmem:[#allocation10 + $0x24c] ss:$16 sps:$4 sm:$0xff]  }
 0x486   :  { %7893 = vmatprep.subr.bf16.mxu1 %v9905_v46  ;;  %v9966_v46 = vld [vmem:[#allocation10 + $0x240] ss:$16 sps:$4 sm:$0xff]  }
 0x488   :  { %7730 = vmatpush1.bf16.msra.mxu0 %v9900_v16  ;;  %v9969_v16 = vld [vmem:[#allocation10 + $0x248] ss:$16 sps:$4 sm:$0xff]  }
 0x489   :  { %7894 = vmatpush1.bf16.msra.mxu1 %v9903_v18  ;;  %7731 = vmatprep.subr.bf16.mxu0 %v9908_v19  ;;  %v9974_v18 = vld [vmem:[#allocation10 + $0x264] ss:$16 sps:$4 sm:$0xff]   ;;  %v9977_v19 = vld [vmem:[#allocation10 + $0x26c] ss:$16 sps:$4 sm:$0xff]  }
 0x48a   :  { %7895 = vmatprep.subr.bf16.mxu1 %v9911_v20  ;;  %v9972_v20 = vld [vmem:[#allocation10 + $0x260] ss:$16 sps:$4 sm:$0xff]  }
 0x48c   :  { %7732 = vmatpush1.bf16.msra.mxu0 %v9906_v21  ;;  %v9975_v21 = vld [vmem:[#allocation10 + $0x268] ss:$16 sps:$4 sm:$0xff]  }
 0x48d   :  { %7896 = vmatpush1.bf16.msra.mxu1 %v9909_v22  ;;  %7733 = vmatprep.subr.bf16.mxu0 %v9914_v27  ;;  %v9980_v22 = vld [vmem:[#allocation10 + $0x284] ss:$16 sps:$4 sm:$0xff]   ;;  %v9983_v27 = vld [vmem:[#allocation10 + $0x28c] ss:$16 sps:$4 sm:$0xff]  }
 0x48e   :  { %7897 = vmatprep.subr.bf16.mxu1 %v9917_v23  ;;  %v9978_v23 = vld [vmem:[#allocation10 + $0x280] ss:$16 sps:$4 sm:$0xff]  }
 0x490   :  { %7734 = vmatpush1.bf16.msra.mxu0 %v9912_v24  ;;  %v9981_v24 = vld [vmem:[#allocation10 + $0x288] ss:$16 sps:$4 sm:$0xff]  }
 0x491   :  { %7898 = vmatpush1.bf16.msra.mxu1 %v9915_v42  ;;  %7735 = vmatprep.subr.bf16.mxu0 %v9920_v29  ;;  %v9986_v42 = vld [vmem:[#allocation10 + $0x2a4] ss:$16 sps:$4 sm:$0xff]   ;;  %v9989_v29 = vld [vmem:[#allocation10 + $0x2ac] ss:$16 sps:$4 sm:$0xff]  }
 0x492   :  { %7899 = vmatprep.subr.bf16.mxu1 %v9923_v26  ;;  %v9984_v26 = vld [vmem:[#allocation10 + $0x2a0] ss:$16 sps:$4 sm:$0xff]  }
 0x494   :  { %7736 = vmatpush1.bf16.msra.mxu0 %v9918_v28  ;;  %v9987_v28 = vld [vmem:[#allocation10 + $0x2a8] ss:$16 sps:$4 sm:$0xff]  }
 0x495   :  { %7900 = vmatpush1.bf16.msra.mxu1 %v9921_v31  ;;  %7737 = vmatprep.subr.bf16.mxu0 %v9926_v32  ;;  %v9992_v31 = vld [vmem:[#allocation10 + $0x2c4] ss:$16 sps:$4 sm:$0xff]   ;;  %v9995_v32 = vld [vmem:[#allocation10 + $0x2cc] ss:$16 sps:$4 sm:$0xff]  }
 0x496   :  { %7901 = vmatprep.subr.bf16.mxu1 %v9929_v33  ;;  %v9990_v33 = vld [vmem:[#allocation10 + $0x2c0] ss:$16 sps:$4 sm:$0xff]  }
 0x498   :  { %7738 = vmatpush1.bf16.msra.mxu0 %v9924_v63  ;;  %v9993_v63 = vld [vmem:[#allocation10 + $0x2c8] ss:$16 sps:$4 sm:$0xff]  }
 0x499   :  { %7902 = vmatpush1.bf16.msra.mxu1 %v9927_v34  ;;  %7739 = vmatprep.subr.bf16.mxu0 %v9932_v37  ;;  %v9998_v34 = vld [vmem:[#allocation10 + $0x2e4] ss:$16 sps:$4 sm:$0xff]   ;;  %v10001_v37 = vld [vmem:[#allocation10 + $0x2ec] ss:$16 sps:$4 sm:$0xff]  }
 0x49a   :  { %7903 = vmatprep.subr.bf16.mxu1 %v9935_v35  ;;  %v9996_v35 = vld [vmem:[#allocation10 + $0x2e0] ss:$16 sps:$4 sm:$0xff]  }
 0x49c   :  { %7740 = vmatpush1.bf16.msra.mxu0 %v9930_v36  ;;  %v9999_v36 = vld [vmem:[#allocation10 + $0x2e8] ss:$16 sps:$4 sm:$0xff]  }
 0x49d   :  { %7904 = vmatpush1.bf16.msra.mxu1 %v9933_v38  ;;  %7741 = vmatprep.subr.bf16.mxu0 %v9938_v40  ;;  %v10004_v38 = vld [vmem:[#allocation10 + $0x304] ss:$16 sps:$4 sm:$0xff]   ;;  %v10007_v40 = vld [vmem:[#allocation10 + $0x30c] ss:$16 sps:$4 sm:$0xff]  }
 0x49e   :  { %7905 = vmatprep.subr.bf16.mxu1 %v9941_v41  ;;  %v10002_v41 = vld [vmem:[#allocation10 + $0x300] ss:$16 sps:$4 sm:$0xff]  }
 0x4a0   :  { %7742 = vmatpush1.bf16.msra.mxu0 %v9936_v43  ;;  %v10005_v43 = vld [vmem:[#allocation10 + $0x308] ss:$16 sps:$4 sm:$0xff]  }
 0x4a1   :  { %7906 = vmatpush1.bf16.msra.mxu1 %v9939_v4  ;;  %7743 = vmatprep.subr.bf16.mxu0 %v9944_v50  ;;  %v10013_v4 = vld [vmem:[#allocation10 + $0x32c] ss:$16 sps:$4 sm:$0xff]   ;;  %v10008_v50 = vld [vmem:[#allocation10 + $0x320] ss:$16 sps:$4 sm:$0xff]  }
 0x4a2   :  { %7907 = vmatprep.subr.bf16.mxu1 %v9947_v51  ;;  %v10011_v51 = vld [vmem:[#allocation10 + $0x328] ss:$16 sps:$4 sm:$0xff]  }
 0x4a4   :  { %7744 = vmatpush1.bf16.msra.mxu0 %v9942_v10  ;;  %v10019_v10 = vld [vmem:[#allocation10 + $0x34c] ss:$16 sps:$4 sm:$0xff]  }
 0x4a5   :  { %7908 = vmatpush1.bf16.msra.mxu1 %v9945_v57  ;;  %7745 = vmatprep.subr.bf16.mxu0 %v9950_v60  ;;  %v10017_v57 = vld [vmem:[#allocation10 + $0x348] ss:$16 sps:$4 sm:$0xff]   ;;  %v10022_v60 = vld [vmem:[#allocation10 + $0x364] ss:$16 sps:$4 sm:$0xff]  }
 0x4a6   :  { %7909 = vmatprep.subr.bf16.mxu1 %v9953_v61  ;;  %v10025_v61 = vld [vmem:[#allocation10 + $0x36c] ss:$16 sps:$4 sm:$0xff]  }
 0x4a8   :  { %7746 = vmatpush1.bf16.msra.mxu0 %v9948_v25  ;;  %v10023_v25 = vld [vmem:[#allocation10 + $0x368] ss:$16 sps:$4 sm:$0xff]  }
 0x4a9   :  { %7910 = vmatpush1.bf16.msra.mxu1 %v9951_v0  ;;  %7756 = vmatprep.subr.bf16.mxu0 %v9956_v58  ;;  %v10031_v0 = vld [vmem:[#allocation10 + $0x38c] ss:$16 sps:$4 sm:$0xff]   ;;  %v10026_v58 = vld [vmem:[#allocation10 + $0x380] ss:$16 sps:$4 sm:$0xff]  }
 0x4aa   :  { %7920 = vmatprep.subr.bf16.mxu1 %v9959_v7  ;;  %v10029_v7 = vld [vmem:[#allocation10 + $0x388] ss:$16 sps:$4 sm:$0xff]  }
 0x4ab   :  { %7748 = vmatmul.mubr.bf16.vlgmr.msra.gmra.mrb[20].mxu0 %v6148_v9 }
 0x4ac   :  { %7912 = vmatmul.mubr.bf16.vlgmr.msra.gmra.mrb[20].mxu1 %v6148_v9  ;;  %7757 = vmatpush1.bf16.msra.mxu0 %v9954_v1  ;;  %v10037_v1 = vld [vmem:[#allocation10 + $0x3ac] ss:$16 sps:$4 sm:$0xff]   ;;  %v10032_v9 = vld [vmem:[#allocation10 + $0x3a0] ss:$16 sps:$4 sm:$0xff]  }
 0x4ad   :  { %7788 = vmatprep.mubr.bf16.mxu0 %v6151_v11  ;;  %7921 = vmatpush1.bf16.msra.mxu1 %v9957_v30  ;;  %v2895_v30 = vrot.slane %v10806_v17, %v10703_v54 }
 0x4ae   :  { %7952 = vmatprep.mubr.bf16.mxu1 %v6151_v11  ;;  %7758 = vmatprep.subr.bf16.mxu0 %v9962_v39  ;;  %v10035_v39 = vld [vmem:[#allocation10 + $0x3a8] ss:$16 sps:$4 sm:$0xff]   ;;  %v10040_v11 = vld [vmem:[#allocation10 + $0x3c4] ss:$16 sps:$4 sm:$0xff]  }
 0x4af   :  { %7922 = vmatprep.subr.bf16.mxu1 %v9965_v5  ;;  %v10043_v5 = vld [vmem:[#allocation10 + $0x3cc] ss:$16 sps:$4 sm:$0xff]  }
 0x4b0   :  { %7759 = vmatpush1.bf16.msra.mxu0 %v9960_v12  ;;  %v10038_v12 = vld [vmem:[#allocation10 + $0x3c0] ss:$16 sps:$4 sm:$0xff]  }
 0x4b1   :  { %7923 = vmatpush1.bf16.msra.mxu1 %v9963_v14  ;;  %7760 = vmatprep.subr.bf16.mxu0 %v9968_v6  ;;  %v9694_v14 = vadd.f32 %v10800_v2, %v2895_v30  ;;  %v10041_v6 = vld [vmem:[#allocation10 + $0x3c8] ss:$16 sps:$4 sm:$0xff]   ;;  %v10115_v30 = vld [vmem:[#allocation10 + $0x54c] ss:$16 sps:$4 sm:$0xff]  }
 0x4b2   :  { %7924 = vmatprep.subr.bf16.mxu1 %v9971_v15  ;;  %v10046_v15 = vld [vmem:[#allocation10 + $0x3e4] ss:$16 sps:$4 sm:$0xff]   ;;  %v10053_v2 = vld [vmem:[#allocation10 + $0x408] ss:$16 sps:$4 sm:$0xff]  }
 0x4b4   :  { %7761 = vmatpush1.bf16.msra.mxu0 %v9966_v46  ;;  %v10049_v46 = vld [vmem:[#allocation10 + $0x3ec] ss:$16 sps:$4 sm:$0xff]  }
 0x4b5   :  { %7925 = vmatpush1.bf16.msra.mxu1 %v9969_v16  ;;  %7762 = vmatprep.subr.bf16.mxu0 %v9974_v18  ;;  %v10044_v16 = vld [vmem:[#allocation10 + $0x3e0] ss:$16 sps:$4 sm:$0xff]   ;;  %v6142_v18 = vmax.f32 %v9694_v14, 0.0 }
 0x4b6   :  { %7926 = vmatprep.subr.bf16.mxu1 %v9977_v19  ;;  %v10047_v19 = vld [vmem:[#allocation10 + $0x3e8] ss:$16 sps:$4 sm:$0xff]   ;;  %v10116_v14 = vld [vmem:[#allocation10 + $0x560] ss:$16 sps:$4 sm:$0xff]  }
 0x4b8   :  { %7763 = vmatpush1.bf16.msra.mxu0 %v9972_v20  ;;  %v10052_v20 = vld [vmem:[#allocation10 + $0x404] ss:$16 sps:$4 sm:$0xff]  }
 0x4b9   :  { %7927 = vmatpush1.bf16.msra.mxu1 %v9975_v21  ;;  %7764 = vmatprep.subr.bf16.mxu0 %v9980_v22  ;;  %v10055_v21 = vld [vmem:[#allocation10 + $0x40c] ss:$16 sps:$4 sm:$0xff]   ;;  %v10050_v22 = vld [vmem:[#allocation10 + $0x400] ss:$16 sps:$4 sm:$0xff]  }
 0x4ba   :  { %7928 = vmatprep.subr.bf16.mxu1 %v9983_v27  ;;  %v6150_v27 = vpack.c.bf16 %v6142_v18, %v6142_v18  ;;  %v10125_v18 = vld [vmem:[#allocation10 + $0x588] ss:$16 sps:$4 sm:$0xff]  }
 0x4bc   :  { %7765 = vmatpush1.bf16.msra.mxu0 %v9978_v23  ;;  %v10058_v23 = vld [vmem:[#allocation10 + $0x424] ss:$16 sps:$4 sm:$0xff]  }
 0x4bd   :  { %7929 = vmatpush1.bf16.msra.mxu1 %v9981_v24  ;;  %7766 = vmatprep.subr.bf16.mxu0 %v9986_v42  ;;  %v10061_v24 = vld [vmem:[#allocation10 + $0x42c] ss:$16 sps:$4 sm:$0xff]   ;;  %v10056_v42 = vld [vmem:[#allocation10 + $0x420] ss:$16 sps:$4 sm:$0xff]  }
 0x4be   :  { %7930 = vmatprep.subr.bf16.mxu1 %v9989_v29  ;;  %v10059_v29 = vld [vmem:[#allocation10 + $0x428] ss:$16 sps:$4 sm:$0xff]  }
 0x4c0   :  { %7767 = vmatpush1.bf16.msra.mxu0 %v9984_v26  ;;  %v10064_v26 = vld [vmem:[#allocation10 + $0x444] ss:$16 sps:$4 sm:$0xff]  }
 0x4c1   :  { %7931 = vmatpush1.bf16.msra.mxu1 %v9987_v28  ;;  %7768 = vmatprep.subr.bf16.mxu0 %v9992_v31  ;;  %v10067_v28 = vld [vmem:[#allocation10 + $0x44c] ss:$16 sps:$4 sm:$0xff]   ;;  %v10062_v31 = vld [vmem:[#allocation10 + $0x440] ss:$16 sps:$4 sm:$0xff]  }
 0x4c2   :  { %7932 = vmatprep.subr.bf16.mxu1 %v9995_v32  ;;  %v10065_v32 = vld [vmem:[#allocation10 + $0x448] ss:$16 sps:$4 sm:$0xff]  }
 0x4c4   :  { %7769 = vmatpush1.bf16.msra.mxu0 %v9990_v33  ;;  %v10070_v33 = vld [vmem:[#allocation10 + $0x464] ss:$16 sps:$4 sm:$0xff]  }
 0x4c5   :  { %7933 = vmatpush1.bf16.msra.mxu1 %v9993_v63  ;;  %7770 = vmatprep.subr.bf16.mxu0 %v9998_v34  ;;  %v10073_v63 = vld [vmem:[#allocation10 + $0x46c] ss:$16 sps:$4 sm:$0xff]   ;;  %v10068_v34 = vld [vmem:[#allocation10 + $0x460] ss:$16 sps:$4 sm:$0xff]  }
 0x4c6   :  { %7934 = vmatprep.subr.bf16.mxu1 %v10001_v37  ;;  %v10071_v37 = vld [vmem:[#allocation10 + $0x468] ss:$16 sps:$4 sm:$0xff]  }
 0x4c8   :  { %7771 = vmatpush1.bf16.msra.mxu0 %v9996_v35  ;;  %v10076_v35 = vld [vmem:[#allocation10 + $0x484] ss:$16 sps:$4 sm:$0xff]  }
 0x4c9   :  { %7935 = vmatpush1.bf16.msra.mxu1 %v9999_v36  ;;  %7772 = vmatprep.subr.bf16.mxu0 %v10004_v38  ;;  %v10079_v36 = vld [vmem:[#allocation10 + $0x48c] ss:$16 sps:$4 sm:$0xff]   ;;  %v10074_v38 = vld [vmem:[#allocation10 + $0x480] ss:$16 sps:$4 sm:$0xff]  }
 0x4ca   :  { %7936 = vmatprep.subr.bf16.mxu1 %v10007_v40  ;;  %v10077_v40 = vld [vmem:[#allocation10 + $0x488] ss:$16 sps:$4 sm:$0xff]  }
 0x4cc   :  { %7773 = vmatpush1.bf16.msra.mxu0 %v10002_v41  ;;  %v10082_v41 = vld [vmem:[#allocation10 + $0x4a4] ss:$16 sps:$4 sm:$0xff]  }
 0x4cd   :  { %7937 = vmatpush1.bf16.msra.mxu1 %v10005_v43  ;;  %7774 = vmatprep.subr.bf16.mxu0 %v10010_v48  ;;  %v10085_v43 = vld [vmem:[#allocation10 + $0x4ac] ss:$16 sps:$4 sm:$0xff]   ;;  %v10080_v48 = vld [vmem:[#allocation10 + $0x4a0] ss:$16 sps:$4 sm:$0xff]  }
 0x4ce   :  { %7938 = vmatprep.subr.bf16.mxu1 %v10013_v4  ;;  %v10083_v4 = vld [vmem:[#allocation10 + $0x4a8] ss:$16 sps:$4 sm:$0xff]  }
 0x4d0   :  { %7775 = vmatpush1.bf16.msra.mxu0 %v10008_v50  ;;  %v10088_v50 = vld [vmem:[#allocation10 + $0x4c4] ss:$16 sps:$4 sm:$0xff]  }
 0x4d1   :  { %7939 = vmatpush1.bf16.msra.mxu1 %v10011_v51  ;;  %7776 = vmatprep.subr.bf16.mxu0 %v10016_v52  ;;  %v10091_v51 = vld [vmem:[#allocation10 + $0x4cc] ss:$16 sps:$4 sm:$0xff]   ;;  %v10086_v52 = vld [vmem:[#allocation10 + $0x4c0] ss:$16 sps:$4 sm:$0xff]  }
 0x4d2   :  { %7940 = vmatprep.subr.bf16.mxu1 %v10019_v10  ;;  %v10089_v10 = vld [vmem:[#allocation10 + $0x4c8] ss:$16 sps:$4 sm:$0xff]  }
 0x4d4   :  { %7777 = vmatpush1.bf16.msra.mxu0 %v10014_v56  ;;  %v10094_v56 = vld [vmem:[#allocation10 + $0x4e4] ss:$16 sps:$4 sm:$0xff]  }
 0x4d5   :  { %7941 = vmatpush1.bf16.msra.mxu1 %v10017_v57  ;;  %7778 = vmatprep.subr.bf16.mxu0 %v10022_v60  ;;  %v10097_v57 = vld [vmem:[#allocation10 + $0x4ec] ss:$16 sps:$4 sm:$0xff]   ;;  %v10092_v60 = vld [vmem:[#allocation10 + $0x4e0] ss:$16 sps:$4 sm:$0xff]  }
 0x4d6   :  { %7942 = vmatprep.subr.bf16.mxu1 %v10025_v61  ;;  %v10095_v61 = vld [vmem:[#allocation10 + $0x4e8] ss:$16 sps:$4 sm:$0xff]  }
 0x4d8   :  { %7779 = vmatpush1.bf16.msra.mxu0 %v10020_v13  ;;  %v10100_v13 = vld [vmem:[#allocation10 + $0x504] ss:$16 sps:$4 sm:$0xff]  }
 0x4d9   :  { %7943 = vmatpush1.bf16.msra.mxu1 %v10023_v25  ;;  %7780 = vmatprep.subr.bf16.mxu0 %v10028_v3  ;;  %v10103_v25 = vld [vmem:[#allocation10 + $0x50c] ss:$16 sps:$4 sm:$0xff]   ;;  %v10098_v3 = vld [vmem:[#allocation10 + $0x500] ss:$16 sps:$4 sm:$0xff]  }
 0x4da   :  { %7944 = vmatprep.subr.bf16.mxu1 %v10031_v0  ;;  %v10101_v0 = vld [vmem:[#allocation10 + $0x508] ss:$16 sps:$4 sm:$0xff]  }
 0x4dc   :  { %7781 = vmatpush1.bf16.msra.mxu0 %v10026_v58  ;;  %v10106_v58 = vld [vmem:[#allocation10 + $0x524] ss:$16 sps:$4 sm:$0xff]  }
 0x4dd   :  { %7945 = vmatpush1.bf16.msra.mxu1 %v10029_v7  ;;  %7782 = vmatprep.subr.bf16.mxu0 %v10034_v8  ;;  %v10109_v7 = vld [vmem:[#allocation10 + $0x52c] ss:$16 sps:$4 sm:$0xff]   ;;  %v10104_v8 = vld [vmem:[#allocation10 + $0x520] ss:$16 sps:$4 sm:$0xff]  }
 0x4de   :  { %7946 = vmatprep.subr.bf16.mxu1 %v10037_v1  ;;  %v10107_v1 = vld [vmem:[#allocation10 + $0x528] ss:$16 sps:$4 sm:$0xff]  }
 0x4e0   :  { %7783 = vmatpush1.bf16.msra.mxu0 %v10032_v9  ;;  %v10112_v9 = vld [vmem:[#allocation10 + $0x544] ss:$16 sps:$4 sm:$0xff]  }
 0x4e1   :  { %7947 = vmatpush1.bf16.msra.mxu1 %v10035_v39  ;;  %7784 = vmatprep.subr.bf16.mxu0 %v10040_v11  ;;  %v10110_v39 = vld [vmem:[#allocation10 + $0x540] ss:$16 sps:$4 sm:$0xff]   ;;  %v10113_v11 = vld [vmem:[#allocation10 + $0x548] ss:$16 sps:$4 sm:$0xff]  }
 0x4e2   :  { %7948 = vmatprep.subr.bf16.mxu1 %v10043_v5  ;;  %v10118_v5 = vld [vmem:[#allocation10 + $0x564] ss:$16 sps:$4 sm:$0xff]  }
 0x4e4   :  { %7785 = vmatpush1.bf16.msra.mxu0 %v10038_v12  ;;  %v10121_v12 = vld [vmem:[#allocation10 + $0x56c] ss:$16 sps:$4 sm:$0xff]  }
 0x4e5   :  { %7949 = vmatpush1.bf16.msra.mxu1 %v10041_v6  ;;  %7786 = vmatprep.subr.bf16.mxu0 %v10046_v15  ;;  %v10119_v6 = vld [vmem:[#allocation10 + $0x568] ss:$16 sps:$4 sm:$0xff]   ;;  %v10124_v15 = vld [vmem:[#allocation10 + $0x584] ss:$16 sps:$4 sm:$0xff]  }
 0x4e6   :  { %7950 = vmatprep.subr.bf16.mxu1 %v10049_v46  ;;  %v10127_v46 = vld [vmem:[#allocation10 + $0x58c] ss:$16 sps:$4 sm:$0xff]  }
 0x4e8   :  { %7787 = vmatpush1.bf16.msra.mxu0 %v10044_v16  ;;  %v10122_v16 = vld [vmem:[#allocation10 + $0x580] ss:$16 sps:$4 sm:$0xff]  }
 0x4e9   :  { %7951 = vmatpush1.bf16.msra.mxu1 %v10047_v19  ;;  %7797 = vmatprep.subr.bf16.mxu0 %v10052_v20  ;;  %v10130_v19 = vld [vmem:[#allocation10 + $0x5a4] ss:$16 sps:$4 sm:$0xff]   ;;  %v10133_v20 = vld [vmem:[#allocation10 + $0x5ac] ss:$16 sps:$4 sm:$0xff]  }
 0x4ea   :  { %7961 = vmatprep.subr.bf16.mxu1 %v10055_v21  ;;  %v10128_v21 = vld [vmem:[#allocation10 + $0x5a0] ss:$16 sps:$4 sm:$0xff]  }
 0x4eb   :  { %7789 = vmatmul.mubr.bf16.vlgmr.msra.gmra.mrb[20].mxu0 %v6150_v27 }
 0x4ec   :  { %7953 = vmatmul.mubr.bf16.vlgmr.msra.gmra.mrb[20].mxu1 %v6150_v27  ;;  %7798 = vmatpush1.bf16.msra.mxu0 %v10050_v22  ;;  %v10131_v22 = vld [vmem:[#allocation10 + $0x5a8] ss:$16 sps:$4 sm:$0xff]   ;;  %v10136_v27 = vld [vmem:[#allocation10 + $0x5c4] ss:$16 sps:$4 sm:$0xff]  }
 0x4ed   :  { %7962 = vmatpush1.bf16.msra.mxu1 %v10053_v2  ;;  %7799 = vmatprep.subr.bf16.mxu0 %v10058_v23  ;;  %v10139_v2 = vld [vmem:[#allocation10 + $0x5cc] ss:$16 sps:$4 sm:$0xff]   ;;  %v10134_v23 = vld [vmem:[#allocation10 + $0x5c0] ss:$16 sps:$4 sm:$0xff]  }
 0x4ee   :  { %7963 = vmatprep.subr.bf16.mxu1 %v10061_v24  ;;  %v10137_v24 = vld [vmem:[#allocation10 + $0x5c8] ss:$16 sps:$4 sm:$0xff]  }
 0x4f0   :  { %7800 = vmatpush1.bf16.msra.mxu0 %v10056_v42  ;;  %v10142_v42 = vld [vmem:[#allocation10 + $0x5e4] ss:$16 sps:$4 sm:$0xff]  }
 0x4f1   :  { %7964 = vmatpush1.bf16.msra.mxu1 %v10059_v29  ;;  %7801 = vmatprep.subr.bf16.mxu0 %v10064_v26  ;;  %v10145_v29 = vld [vmem:[#allocation10 + $0x5ec] ss:$16 sps:$4 sm:$0xff]   ;;  %v10140_v26 = vld [vmem:[#allocation10 + $0x5e0] ss:$16 sps:$4 sm:$0xff]  }
 0x4f2   :  { %7965 = vmatprep.subr.bf16.mxu1 %v10067_v28  ;;  %v10143_v28 = vld [vmem:[#allocation10 + $0x5e8] ss:$16 sps:$4 sm:$0xff]  }
 0x4f4   :  { %7802 = vmatpush1.bf16.msra.mxu0 %v10062_v31  ;;  %v10148_v31 = vld [vmem:[#allocation10 + $0x604] ss:$16 sps:$4 sm:$0xff]  }
 0x4f5   :  { %7966 = vmatpush1.bf16.msra.mxu1 %v10065_v32  ;;  %7803 = vmatprep.subr.bf16.mxu0 %v10070_v33  ;;  %v10151_v32 = vld [vmem:[#allocation10 + $0x60c] ss:$16 sps:$4 sm:$0xff]   ;;  %v2903_v33 = vrot.slane %v10806_v17, %v721_v53 }
 0x4f6   :  { %7967 = vmatprep.subr.bf16.mxu1 %v10073_v63  ;;  %v2907_v63 = vrot.slane %v10806_v17, %v725_v55 }
 0x4f8   :  { %7804 = vmatpush1.bf16.msra.mxu0 %v10068_v34  ;;  %v2915_v34 = vrot.slane %v10806_v17, %v733_v59  ;;  %v10154_v59 = vld [vmem:[#allocation10 + $0x624] ss:$16 sps:$4 sm:$0xff]  }
 0x4f9   :  { %7968 = vmatpush1.bf16.msra.mxu1 %v10071_v37  ;;  %7805 = vmatprep.subr.bf16.mxu0 %v10076_v35 }
 0x4fa   :  { %7969 = vmatprep.subr.bf16.mxu1 %v10079_v36 }
 0x4fc   :  { %7806 = vmatpush1.bf16.msra.mxu0 %v10074_v38 }
 0x4fd   :  { %7970 = vmatpush1.bf16.msra.mxu1 %v10077_v40  ;;  %7807 = vmatprep.subr.bf16.mxu0 %v10082_v41 }
 0x4fe   :  { %7971 = vmatprep.subr.bf16.mxu1 %v10085_v43 }
 0x500   :  { %7808 = vmatpush1.bf16.msra.mxu0 %v10080_v48 }
 0x501   :  { %7972 = vmatpush1.bf16.msra.mxu1 %v10083_v4  ;;  %7809 = vmatprep.subr.bf16.mxu0 %v10088_v50 }
 0x502   :  { %7973 = vmatprep.subr.bf16.mxu1 %v10091_v51 }
 0x504   :  { %7810 = vmatpush1.bf16.msra.mxu0 %v10086_v52 }
 0x505   :  { %7974 = vmatpush1.bf16.msra.mxu1 %v10089_v10  ;;  %7811 = vmatprep.subr.bf16.mxu0 %v10094_v56  ;;  %v10146_v56 = vld [vmem:[#allocation10 + $0x600] ss:$16 sps:$4 sm:$0xff]  }
 0x506   :  { %7975 = vmatprep.subr.bf16.mxu1 %v10097_v57  ;;  %v10149_v57 = vld [vmem:[#allocation10 + $0x608] ss:$16 sps:$4 sm:$0xff]  }
 0x508   :  { %7812 = vmatpush1.bf16.msra.mxu0 %v10092_v60 }
 0x509   :  { %7976 = vmatpush1.bf16.msra.mxu1 %v10095_v61  ;;  %7813 = vmatprep.subr.bf16.mxu0 %v10100_v13  ;;  %v10157_v61 = vld [vmem:[#allocation10 + $0x62c] ss:$16 sps:$4 sm:$0xff]  }
 0x50a   :  { %7977 = vmatprep.subr.bf16.mxu1 %v10103_v25  ;;  %v10152_v25 = vld [vmem:[#allocation10 + $0x620] ss:$16 sps:$4 sm:$0xff]  }
 0x50c   :  { %7814 = vmatpush1.bf16.msra.mxu0 %v10098_v3  ;;  %v10155_v3 = vld [vmem:[#allocation10 + $0x628] ss:$16 sps:$4 sm:$0xff]  }
 0x50d   :  { %7978 = vmatpush1.bf16.msra.mxu1 %v10101_v0  ;;  %7815 = vmatprep.subr.bf16.mxu0 %v10106_v58  ;;  %v10160_v0 = vld [vmem:[#allocation10 + $0x644] ss:$16 sps:$4 sm:$0xff]   ;;  %v10163_v58 = vld [vmem:[#allocation10 + $0x64c] ss:$16 sps:$4 sm:$0xff]  }
 0x50e   :  { %7979 = vmatprep.subr.bf16.mxu1 %v10109_v7  ;;  %v10158_v7 = vld [vmem:[#allocation10 + $0x640] ss:$16 sps:$4 sm:$0xff]  }
 0x510   :  { %7816 = vmatpush1.bf16.msra.mxu0 %v10104_v8  ;;  %v10161_v8 = vld [vmem:[#allocation10 + $0x648] ss:$16 sps:$4 sm:$0xff]  }
 0x511   :  { %7980 = vmatpush1.bf16.msra.mxu1 %v10107_v1  ;;  %7817 = vmatprep.subr.bf16.mxu0 %v10112_v9  ;;  %v10166_v1 = vld [vmem:[#allocation10 + $0x664] ss:$16 sps:$4 sm:$0xff]   ;;  %v10169_v9 = vld [vmem:[#allocation10 + $0x66c] ss:$16 sps:$4 sm:$0xff]  }
 0x512   :  { %7981 = vmatprep.subr.bf16.mxu1 %v10115_v30  ;;  %v10164_v30 = vld [vmem:[#allocation10 + $0x660] ss:$16 sps:$4 sm:$0xff]  }
 0x514   :  { %7818 = vmatpush1.bf16.msra.mxu0 %v10110_v39  ;;  %v10167_v39 = vld [vmem:[#allocation10 + $0x668] ss:$16 sps:$4 sm:$0xff]  }
 0x515   :  { %7982 = vmatpush1.bf16.msra.mxu1 %v10113_v11  ;;  %7819 = vmatprep.subr.bf16.mxu0 %v10118_v5  ;;  %v10172_v11 = vld [vmem:[#allocation10 + $0x684] ss:$16 sps:$4 sm:$0xff]   ;;  %v10175_v5 = vld [vmem:[#allocation10 + $0x68c] ss:$16 sps:$4 sm:$0xff]  }
 0x516   :  { %7983 = vmatprep.subr.bf16.mxu1 %v10121_v12  ;;  %v10170_v12 = vld [vmem:[#allocation10 + $0x680] ss:$16 sps:$4 sm:$0xff]  }
 0x518   :  { %7820 = vmatpush1.bf16.msra.mxu0 %v10116_v14  ;;  %v10173_v14 = vld [vmem:[#allocation10 + $0x688] ss:$16 sps:$4 sm:$0xff]  }
 0x519   :  { %7984 = vmatpush1.bf16.msra.mxu1 %v10119_v6  ;;  %7821 = vmatprep.subr.bf16.mxu0 %v10124_v15  ;;  %v10178_v6 = vld [vmem:[#allocation10 + $0x6a4] ss:$16 sps:$4 sm:$0xff]   ;;  %v10181_v15 = vld [vmem:[#allocation10 + $0x6ac] ss:$16 sps:$4 sm:$0xff]  }
 0x51a   :  { %7985 = vmatprep.subr.bf16.mxu1 %v10127_v46  ;;  %v10176_v46 = vld [vmem:[#allocation10 + $0x6a0] ss:$16 sps:$4 sm:$0xff]  }
 0x51c   :  { %7822 = vmatpush1.bf16.msra.mxu0 %v10122_v16  ;;  %v10179_v16 = vld [vmem:[#allocation10 + $0x6a8] ss:$16 sps:$4 sm:$0xff]  }
 0x51d   :  { %7986 = vmatpush1.bf16.msra.mxu1 %v10125_v18  ;;  %7823 = vmatprep.subr.bf16.mxu0 %v10130_v19  ;;  %v10184_v18 = vld [vmem:[#allocation10 + $0x6c4] ss:$16 sps:$4 sm:$0xff]   ;;  %v10187_v19 = vld [vmem:[#allocation10 + $0x6cc] ss:$16 sps:$4 sm:$0xff]  }
 0x51e   :  { %7987 = vmatprep.subr.bf16.mxu1 %v10133_v20  ;;  %v10182_v20 = vld [vmem:[#allocation10 + $0x6c0] ss:$16 sps:$4 sm:$0xff]  }
 0x520   :  { %7824 = vmatpush1.bf16.msra.mxu0 %v10128_v21  ;;  %v10185_v21 = vld [vmem:[#allocation10 + $0x6c8] ss:$16 sps:$4 sm:$0xff]  }
 0x521   :  { %7988 = vmatpush1.bf16.msra.mxu1 %v10131_v22  ;;  %7825 = vmatprep.subr.bf16.mxu0 %v10136_v27  ;;  %v10190_v22 = vld [vmem:[#allocation10 + $0x6e4] ss:$16 sps:$4 sm:$0xff]   ;;  %v10193_v27 = vld [vmem:[#allocation10 + $0x6ec] ss:$16 sps:$4 sm:$0xff]  }
 0x522   :  { %7989 = vmatprep.subr.bf16.mxu1 %v10139_v2  ;;  %v10188_v2 = vld [vmem:[#allocation10 + $0x6e0] ss:$16 sps:$4 sm:$0xff]  }
 0x524   :  { %7826 = vmatpush1.bf16.msra.mxu0 %v10134_v23  ;;  %v10191_v23 = vld [vmem:[#allocation10 + $0x6e8] ss:$16 sps:$4 sm:$0xff]  }
 0x525   :  { %7990 = vmatpush1.bf16.msra.mxu1 %v10137_v24  ;;  %7827 = vmatprep.subr.bf16.mxu0 %v10142_v42  ;;  %v10196_v24 = vld [vmem:[#allocation10 + $0x704] ss:$16 sps:$4 sm:$0xff]   ;;  %v10199_v42 = vld [vmem:[#allocation10 + $0x70c] ss:$16 sps:$4 sm:$0xff]  }
 0x526   :  { %7991 = vmatprep.subr.bf16.mxu1 %v10145_v29  ;;  %v10194_v29 = vld [vmem:[#allocation10 + $0x700] ss:$16 sps:$4 sm:$0xff]  }
 0x528   :  { %7828 = vmatpush1.bf16.msra.mxu0 %v10140_v26  ;;  %v10197_v26 = vld [vmem:[#allocation10 + $0x708] ss:$16 sps:$4 sm:$0xff]  }
 0x529   :  { %7992 = vmatpush1.bf16.msra.mxu1 %v10143_v28  ;;  %7838 = vmatprep.subr.bf16.mxu0 %v10148_v31  ;;  %v10202_v28 = vld [vmem:[#allocation10 + $0x724] ss:$16 sps:$4 sm:$0xff]   ;;  %v10205_v31 = vld [vmem:[#allocation10 + $0x72c] ss:$16 sps:$4 sm:$0xff]  }
 0x52a   :  { %8002 = vmatprep.subr.bf16.mxu1 %v10151_v32  ;;  %v10200_v32 = vld [vmem:[#allocation10 + $0x720] ss:$16 sps:$4 sm:$0xff]  }
 0x53e   :  { %v5969_v37 = vpop.f32.mrb[16].mxu0 }
 0x53f   :  { %v9696_v35 = vadd.f32 %v5969_v37, %v2903_v33  ;;  %v10831_v36 = vpop.f32.mrb[16].mxu1  ;;  %v5971_v38 = vpop.f32.mrb[17].mxu0  ;;  %v10203_v33 = vld [vmem:[#allocation10 + $0x728] ss:$16 sps:$4 sm:$0xff]   ;;  %v10206_v37 = vld [vmem:[#allocation10 + $0x740] ss:$16 sps:$4 sm:$0xff]  }
 0x540   :  { %v9697_v40 = vadd.f32 %v5971_v38, %v2907_v63  ;;  %v6135_v41 = vpop.f32.mrb[17].mxu1  ;;  %v5973_v43 = vpop.f32.mrb[18].mxu0  ;;  %v10208_v63 = vld [vmem:[#allocation10 + $0x744] ss:$16 sps:$4 sm:$0xff]  }
 0x541   :  { %v6144_v48 = vmax.f32 %v9696_v35, 0.0  ;;  %v9699_v4 = vadd.f32 %v6135_v41, %v2915_v34  ;;  %v6137_v50 = vpop.f32.mrb[18].mxu1  ;;  %v5974_v53 = vpop.f32.mrb[19].mxu0  ;;  %v10211_v34 = vld [vmem:[#allocation10 + $0x74c] ss:$16 sps:$4 sm:$0xff]  }
 0x542   :  { %v6145_v51 = vmax.f32 %v9697_v40, 0.0  ;;  %v6138_v52 = vpop.f32.mrb[19].mxu1  ;;  %v10209_v35 = vld [vmem:[#allocation10 + $0x748] ss:$16 sps:$4 sm:$0xff]   ;;  %v10214_v38 = vld [vmem:[#allocation10 + $0x764] ss:$16 sps:$4 sm:$0xff]  }
 0x543   :  { %v6147_v10 = vmax.f32 %v9699_v4, 0.0  ;;  %v6152_v60 = vpack.c.bf16 %v6144_v48, %v6144_v48  ;;  %v10217_v40 = vld [vmem:[#allocation10 + $0x76c] ss:$16 sps:$4 sm:$0xff]   ;;  %v10212_v41 = vld [vmem:[#allocation10 + $0x760] ss:$16 sps:$4 sm:$0xff]  }
 0x544   :  { %v6153_v55 = vpack.c.bf16 %v6145_v51, %v6145_v51  ;;  %v10215_v43 = vld [vmem:[#allocation10 + $0x768] ss:$16 sps:$4 sm:$0xff]   ;;  %v10220_v48 = vld [vmem:[#allocation10 + $0x784] ss:$16 sps:$4 sm:$0xff]   ;;  %v10223_v4 = vld [vmem:[#allocation10 + $0x78c] ss:$16 sps:$4 sm:$0xff]  }
 0x545   :  { %v6155_v13 = vpack.c.bf16 %v6147_v10, %v6147_v10  ;;  %v10218_v50 = vld [vmem:[#allocation10 + $0x780] ss:$16 sps:$4 sm:$0xff]   ;;  %v10221_v53 = vld [vmem:[#allocation10 + $0x788] ss:$16 sps:$4 sm:$0xff]   ;;  %v10226_v51 = vld [vmem:[#allocation10 + $0x7a4] ss:$16 sps:$4 sm:$0xff]  }
 0x546   :  { %7829 = vmatprep.mubr.bf16.mxu0 %v6153_v55  ;;  %7993 = vmatprep.mubr.bf16.mxu1 %v6153_v55  ;;  %v10229_v52 = vld [vmem:[#allocation10 + $0x7ac] ss:$16 sps:$4 sm:$0xff]   ;;  %v10224_v10 = vld [vmem:[#allocation10 + $0x7a0] ss:$16 sps:$4 sm:$0xff]   ;;  %v10227_v55 = vld [vmem:[#allocation10 + $0x7a8] ss:$16 sps:$4 sm:$0xff]  }
 0x547   :  { %7830 = vmatmul.mubr.bf16.vlgmr.msra.gmra.mrb[20].mxu0 %v6152_v60  ;;  %7994 = vmatmul.mubr.bf16.vlgmr.msra.gmra.mrb[20].mxu1 %v6152_v60  ;;  %v10235_v60 = vld [vmem:[#allocation10 + $0x7cc] ss:$16 sps:$4 sm:$0xff]  }
 0x548   :  { %7839 = vmatpush1.bf16.msra.mxu0 %v10146_v56  ;;  %8003 = vmatpush1.bf16.msra.mxu1 %v10149_v57  ;;  %v2911_v56 = vrot.slane %v10806_v17, %v729_v49  ;;  %v10232_v57 = vld [vmem:[#allocation10 + $0x7c4] ss:$16 sps:$4 sm:$0xff]  }
 0x549   :  { %7870 = vmatprep.mubr.bf16.mxu0 %v6155_v13  ;;  %8034 = vmatprep.mubr.bf16.mxu1 %v6155_v13  ;;  %v10242_v49 = vld [vmem:[#allocation11 + $0x40] sm:$0xff]  }
 0x54a   :  { %7840 = vmatprep.subr.bf16.mxu0 %v10154_v59  ;;  %8004 = vmatprep.subr.bf16.mxu1 %v10157_v61  ;;  %v10230_v59 = vld [vmem:[#allocation10 + $0x7c0] ss:$16 sps:$4 sm:$0xff]   ;;  %v10233_v61 = vld [vmem:[#allocation10 + $0x7c8] ss:$16 sps:$4 sm:$0xff]   ;;  %v9698_v13 = vadd.f32 %v10831_v36, %v2911_v56 }
 0x54b   :  { %v10243_v17 = vld [vmem:[#allocation11 + $0xc0] sm:$0xff]   ;;  %v10246_v36 = vld [vmem:[#allocation11 + $0x48] sm:$0xff]  }
 0x54c   :  { %7841 = vmatpush1.bf16.msra.mxu0 %v10152_v25  ;;  %8005 = vmatpush1.bf16.msra.mxu1 %v10155_v3  ;;  %v10238_v25 = vld [vmem:[#allocation10 + $0x7e4] ss:$16 sps:$4 sm:$0xff]   ;;  %v10241_v3 = vld [vmem:[#allocation10 + $0x7ec] ss:$16 sps:$4 sm:$0xff]  }
 0x54d   :  { %7842 = vmatprep.subr.bf16.mxu0 %v10160_v0  ;;  %8006 = vmatprep.subr.bf16.mxu1 %v10163_v58  ;;  %v10236_v0 = vld [vmem:[#allocation10 + $0x7e0] ss:$16 sps:$4 sm:$0xff]   ;;  %v6146_v58 = vmax.f32 %v9698_v13, 0.0 }
 0x54e   :  { %v10274_v13 = vld [vmem:[#allocation13] sm:$0xff]  }
 0x550   :  { %7843 = vmatpush1.bf16.msra.mxu0 %v10158_v7  ;;  %8007 = vmatpush1.bf16.msra.mxu1 %v10161_v8  ;;  %v10244_v7 = vld [vmem:[#allocation11] sm:$0xff]  }
 0x551   :  { %7844 = vmatprep.subr.bf16.mxu0 %v10166_v1  ;;  %8008 = vmatprep.subr.bf16.mxu1 %v10169_v9  ;;  %v10245_v8 = vld [vmem:[#allocation11 + $0x80] sm:$0xff]   ;;  %v6154_v1 = vpack.c.bf16 %v6146_v58, %v6146_v58  ;;  %v10247_v9 = vld [vmem:[#allocation11 + $0xc8] sm:$0xff]  }
 0x552   :  { %v10278_v58 = vld [vmem:[#allocation13 + $0x20] sm:$0xff]  }
 0x554   :  { %7845 = vmatpush1.bf16.msra.mxu0 %v10164_v30  ;;  %8009 = vmatpush1.bf16.msra.mxu1 %v10167_v39  ;;  %v10248_v30 = vld [vmem:[#allocation11 + $0x8] sm:$0xff]  }
 0x555   :  { %7846 = vmatprep.subr.bf16.mxu0 %v10172_v11  ;;  %8010 = vmatprep.subr.bf16.mxu1 %v10175_v5  ;;  %v10249_v39 = vld [vmem:[#allocation11 + $0x88] sm:$0xff]   ;;  %v10250_v11 = vld [vmem:[#allocation11 + $0x50] sm:$0xff]  }
 0x556   :  { %v10251_v5 = vld [vmem:[#allocation11 + $0xd0] sm:$0xff]  }
 0x558   :  { %7847 = vmatpush1.bf16.msra.mxu0 %v10170_v12  ;;  %8011 = vmatpush1.bf16.msra.mxu1 %v10173_v14  ;;  %v10252_v12 = vld [vmem:[#allocation11 + $0x10] sm:$0xff]  }
 0x559   :  { %7848 = vmatprep.subr.bf16.mxu0 %v10178_v6  ;;  %8012 = vmatprep.subr.bf16.mxu1 %v10181_v15  ;;  %v10253_v14 = vld [vmem:[#allocation11 + $0x90] sm:$0xff]   ;;  %v10254_v6 = vld [vmem:[#allocation11 + $0x58] sm:$0xff]  }
 0x55a   :  { %v10255_v15 = vld [vmem:[#allocation11 + $0xd8] sm:$0xff]  }
 0x55c   :  { %7849 = vmatpush1.bf16.msra.mxu0 %v10176_v46  ;;  %8013 = vmatpush1.bf16.msra.mxu1 %v10179_v16  ;;  %v10256_v46 = vld [vmem:[#allocation11 + $0x18] sm:$0xff]  }
 0x55d   :  { %7850 = vmatprep.subr.bf16.mxu0 %v10184_v18  ;;  %8014 = vmatprep.subr.bf16.mxu1 %v10187_v19  ;;  %v10257_v16 = vld [vmem:[#allocation11 + $0x98] sm:$0xff]   ;;  %v10258_v18 = vld [vmem:[#allocation11 + $0x60] sm:$0xff]  }
 0x55e   :  { %v10259_v19 = vld [vmem:[#allocation11 + $0xe0] sm:$0xff]  }
 0x560   :  { %7851 = vmatpush1.bf16.msra.mxu0 %v10182_v20  ;;  %8015 = vmatpush1.bf16.msra.mxu1 %v10185_v21  ;;  %v10260_v20 = vld [vmem:[#allocation11 + $0x20] sm:$0xff]  }
 0x561   :  { %7852 = vmatprep.subr.bf16.mxu0 %v10190_v22  ;;  %8016 = vmatprep.subr.bf16.mxu1 %v10193_v27  ;;  %v10261_v21 = vld [vmem:[#allocation11 + $0xa0] sm:$0xff]   ;;  %v10262_v22 = vld [vmem:[#allocation11 + $0x68] sm:$0xff]  }
 0x562   :  { %v10263_v27 = vld [vmem:[#allocation11 + $0xe8] sm:$0xff]  }
 0x564   :  { %7853 = vmatpush1.bf16.msra.mxu0 %v10188_v2  ;;  %8017 = vmatpush1.bf16.msra.mxu1 %v10191_v23  ;;  %v10264_v2 = vld [vmem:[#allocation11 + $0x28] sm:$0xff]  }
 0x565   :  { %7854 = vmatprep.subr.bf16.mxu0 %v10196_v24  ;;  %8018 = vmatprep.subr.bf16.mxu1 %v10199_v42  ;;  %v10265_v23 = vld [vmem:[#allocation11 + $0xa8] sm:$0xff]   ;;  %v10266_v24 = vld [vmem:[#allocation11 + $0x70] sm:$0xff]  }
 0x566   :  { %v10267_v42 = vld [vmem:[#allocation11 + $0xf0] sm:$0xff]  }
 0x568   :  { %7855 = vmatpush1.bf16.msra.mxu0 %v10194_v29  ;;  %8019 = vmatpush1.bf16.msra.mxu1 %v10197_v26  ;;  %v10268_v29 = vld [vmem:[#allocation11 + $0x30] sm:$0xff]  }
 0x569   :  { %7856 = vmatprep.subr.bf16.mxu0 %v10202_v28  ;;  %8020 = vmatprep.subr.bf16.mxu1 %v10205_v31  ;;  %v10269_v26 = vld [vmem:[#allocation11 + $0xb0] sm:$0xff]   ;;  %v10270_v28 = vld [vmem:[#allocation11 + $0x78] sm:$0xff]  }
 0x56a   :  { %v10271_v31 = vld [vmem:[#allocation11 + $0xf8] sm:$0xff]  }
 0x56c   :  { %7857 = vmatpush1.bf16.msra.mxu0 %v10200_v32  ;;  %8021 = vmatpush1.bf16.msra.mxu1 %v10203_v33  ;;  %v10272_v32 = vld [vmem:[#allocation11 + $0x38] sm:$0xff]  }
 0x56d   :  { %7858 = vmatprep.subr.bf16.mxu0 %v10208_v63  ;;  %8022 = vmatprep.subr.bf16.mxu1 %v10211_v34  ;;  %v10273_v33 = vld [vmem:[#allocation11 + $0xb8] sm:$0xff]   ;;  %v10507_v63 = vmov 0.0  }
 0x56e   :  { %v6413_v34 = vld [vmem:[#allocation14 + $0x3] ss:$8 sm:$0xf] }
 0x570   :  { %7859 = vmatpush1.bf16.msra.mxu0 %v10206_v37  ;;  %8023 = vmatpush1.bf16.msra.mxu1 %v10209_v35  ;;  %v6418_v37 = vrot.slane %v6413_v34, %v10672_v45  ;;  %v6426_v35 = vrot.slane %v6413_v34, %v10703_v54 }
 0x571   :  { %7860 = vmatprep.subr.bf16.mxu0 %v10214_v38  ;;  %8024 = vmatprep.subr.bf16.mxu1 %v10217_v40  ;;  %v6422_v38 = vrot.slane %v6413_v34, %v10677_v47  ;;  %v6430_v40 = vrot.slane %v6413_v34, %v10684_v62 }
 0x574   :  { %7861 = vmatpush1.bf16.msra.mxu0 %v10212_v41  ;;  %8025 = vmatpush1.bf16.msra.mxu1 %v10215_v43 }
 0x575   :  { %7862 = vmatprep.subr.bf16.mxu0 %v10220_v48  ;;  %8026 = vmatprep.subr.bf16.mxu1 %v10223_v4 }
 0x578   :  { %7863 = vmatpush1.bf16.msra.mxu0 %v10218_v50  ;;  %8027 = vmatpush1.bf16.msra.mxu1 %v10221_v53 }
 0x579   :  { %7864 = vmatprep.subr.bf16.mxu0 %v10226_v51  ;;  %8028 = vmatprep.subr.bf16.mxu1 %v10229_v52 }
 0x57c   :  { %7865 = vmatpush1.bf16.msra.mxu0 %v10224_v10  ;;  %8029 = vmatpush1.bf16.msra.mxu1 %v10227_v55 }
 0x57d   :  { %7866 = vmatprep.subr.bf16.mxu0 %v10232_v57  ;;  %8030 = vmatprep.subr.bf16.mxu1 %v10235_v60 }
 0x580   :  { %7867 = vmatpush1.bf16.msra.mxu0 %v10230_v59  ;;  %8031 = vmatpush1.bf16.msra.mxu1 %v10233_v61 }
 0x581   :  { %7868 = vmatprep.subr.bf16.mxu0 %v10238_v25  ;;  %8032 = vmatprep.subr.bf16.mxu1 %v10241_v3  ;;  %v10275_v3 = vld [vmem:[#allocation13 + $0x8] sm:$0xff]  }
 0x584   :  { %7869 = vmatpush1.bf16.msra.mxu0 %v10236_v0  ;;  %8033 = vmatpush1.bf16.msra.mxu1 %v10239_v44  ;;  %v10276_v0 = vld [vmem:[#allocation13 + $0x10] sm:$0xff]   ;;  %v10277_v44 = vld [vmem:[#allocation13 + $0x18] sm:$0xff]  }
 0x585   :  { %9611 = vmatprep.subr.bf16.mxu0 %v10242_v49  ;;  %9633 = vmatprep.subr.bf16.mxu1 %v10243_v17  ;;  %v10279_v49 = vld [vmem:[#allocation13 + $0x28] sm:$0xff]   ;;  %v10280_v17 = vld [vmem:[#allocation13 + $0x30] sm:$0xff]  }
 0x587   :  { %7871 = vmatmul.mubr.bf16.vlgmr.msra.gmra.mrb[20].mxu0 %v6154_v1  ;;  %8035 = vmatmul.mubr.bf16.vlgmr.msra.gmra.mrb[20].mxu1 %v6154_v1 }
 0x588   :  { %9612 = vmatpush3.bf16.msra.mxu0 %v10244_v7  ;;  %9634 = vmatpush3.bf16.msra.mxu1 %v10245_v8  ;;  %v10281_v7 = vld [vmem:[#allocation13 + $0x38] sm:$0xff]  }
 0x589   :  { %9613 = vmatprep.subr.bf16.mxu0 %v10246_v36  ;;  %9635 = vmatprep.subr.bf16.mxu1 %v10247_v9  ;;  %v8115_v36 = vld [vmem:[#allocation14 + $0x4] ss:$0 sm:$0xff] }
 0x58c   :  { %9614 = vmatpush3.bf16.msra.mxu0 %v10248_v30  ;;  %9636 = vmatpush3.bf16.msra.mxu1 %v10249_v39 }
 0x58d   :  { %9615 = vmatprep.subr.bf16.mxu0 %v10250_v11  ;;  %9637 = vmatprep.subr.bf16.mxu1 %v10251_v5 }
 0x590   :  { %9616 = vmatpush3.bf16.msra.mxu0 %v10252_v12  ;;  %9638 = vmatpush3.bf16.msra.mxu1 %v10253_v14 }
 0x591   :  { %9617 = vmatprep.subr.bf16.mxu0 %v10254_v6  ;;  %9639 = vmatprep.subr.bf16.mxu1 %v10255_v15 }
 0x594   :  { %9618 = vmatpush3.bf16.msra.mxu0 %v10256_v46  ;;  %9640 = vmatpush3.bf16.msra.mxu1 %v10257_v16 }
 0x595   :  { %9619 = vmatprep.subr.bf16.mxu0 %v10258_v18  ;;  %9641 = vmatprep.subr.bf16.mxu1 %v10259_v19  ;;  %v8406_v19 = vld [vmem:[#allocation14 + $0x5] ss:$0 sm:$0xff] }
 0x598   :  { %9620 = vmatpush3.bf16.msra.mxu0 %v10260_v20  ;;  %9642 = vmatpush3.bf16.msra.mxu1 %v10261_v21 }
 0x599   :  { %9621 = vmatprep.subr.bf16.mxu0 %v10262_v22  ;;  %9643 = vmatprep.subr.bf16.mxu1 %v10263_v27 }
 0x59c   :  { %9622 = vmatpush3.bf16.msra.mxu0 %v10264_v2  ;;  %9644 = vmatpush3.bf16.msra.mxu1 %v10265_v23 }
 0x59d   :  { %9623 = vmatprep.subr.bf16.mxu0 %v10266_v24  ;;  %9645 = vmatprep.subr.bf16.mxu1 %v10267_v42 }
 0x5a0   :  { %9624 = vmatpush3.bf16.msra.mxu0 %v10268_v29  ;;  %9646 = vmatpush3.bf16.msra.mxu1 %v10269_v26 }
 0x5a1   :  { %9625 = vmatprep.subr.bf16.mxu0 %v10270_v28  ;;  %9647 = vmatprep.subr.bf16.mxu1 %v10271_v31 }
 0x5a4   :  { %9626 = vmatpush3.bf16.msra.mxu0 %v10272_v32  ;;  %9648 = vmatpush3.bf16.msra.mxu1 %v10273_v33 }
 0x5a5   :  { %9664 = vmatprep.subr.bf16.mxu0 %v10507_v63 }
 0x65a   :  { %v7872_v41 = vpop.f32.mrb[20].mxu0  ;;  %v8036_v43 = vpop.f32.mrb[20].mxu1 }
 0x65b   :  { %v9700_v48 = vadd.f32 %v7872_v41, %v6418_v37  ;;  %v9702_v4 = vadd.f32 %v8036_v43, %v6426_v35  ;;  %v7874_v50 = vpop.f32.mrb[21].mxu0  ;;  %v8038_v53 = vpop.f32.mrb[21].mxu1 }
 0x65c   :  { %v9701_v51 = vadd.f32 %v7874_v50, %v6422_v38  ;;  %v9703_v52 = vadd.f32 %v8038_v53, %v6430_v40  ;;  %v7876_v10 = vpop.f32.mrb[22].mxu0  ;;  %v8040_v55 = vpop.f32.mrb[22].mxu1 }
 0x65d   :  { %v8043_v56 = vmax.f32 %v9700_v48, 0.0  ;;  %v8045_v57 = vmax.f32 %v9702_v4, 0.0  ;;  %v7877_v60 = vpop.f32.mrb[23].mxu0  ;;  %v8041_v45 = vpop.f32.mrb[23].mxu1 }
 0x65e   :  { %v8044_v59 = vmax.f32 %v9701_v51, 0.0  ;;  %v8046_v54 = vmax.f32 %v9703_v52, 0.0 }
 0x65f   :  { %v8047_v62 = vpack.c.bf16 %v8043_v56, %v8043_v56  ;;  %v8049_v25 = vpack.c.bf16 %v8045_v57, %v8045_v57 }
 0x660   :  { %v8048_v61 = vpack.c.bf16 %v8044_v59, %v8044_v59  ;;  %v8050_v47 = vpack.c.bf16 %v8046_v54, %v8046_v54 }
 0x662   :  { %8340 = vmatprep.mubr.bf16.mxu0 %v8048_v61  ;;  %8380 = vmatprep.mubr.bf16.mxu1 %v8050_v47 }
 0x663   :  { %8341 = vmatmul.mubr.bf16.vlgmr.msra.gmra.mrb[24].mxu0 %v8047_v62  ;;  %8381 = vmatmul.mubr.bf16.vlgmr.msra.gmra.mrb[24].mxu1 %v8049_v25 }
 0x664   :  { %9665 = vmatpush3.bf16.msra.mxu0 %v10274_v13  ;;  %9680 = vmatprep.mubr.msk.bf16.mxu0 %vm10508_vm0, %v10507_v63 }
 0x665   :  { %9666 = vmatprep.subr.bf16.mxu0 %v10507_v63 }
 0x668   :  { %9667 = vmatpush3.bf16.msra.mxu0 %v10275_v3 }
 0x669   :  { %9668 = vmatprep.subr.bf16.mxu0 %v10507_v63 }
 0x66c   :  { %9669 = vmatpush3.bf16.msra.mxu0 %v10276_v0 }
 0x66d   :  { %9670 = vmatprep.subr.bf16.mxu0 %v10507_v63 }
 0x670   :  { %9671 = vmatpush3.bf16.msra.mxu0 %v10277_v44 }
 0x671   :  { %9672 = vmatprep.subr.bf16.mxu0 %v10507_v63 }
 0x674   :  { %9673 = vmatpush3.bf16.msra.mxu0 %v10278_v58 }
 0x675   :  { %9674 = vmatprep.subr.bf16.mxu0 %v10507_v63 }
 0x678   :  { %9675 = vmatpush3.bf16.msra.mxu0 %v10279_v49 }
 0x679   :  { %9676 = vmatprep.subr.bf16.mxu0 %v10507_v63 }
 0x67c   :  { %9677 = vmatpush3.bf16.msra.mxu0 %v10280_v17 }
 0x67d   :  { %9678 = vmatprep.subr.bf16.mxu0 %v10507_v63 }
 0x680   :  { %9679 = vmatpush3.bf16.msra.mxu0 %v10281_v7 }
 0x736   :  { %v9627_v8 = vpop.f32.mrb[24].mxu0  ;;  %v9649_v1 = vpop.f32.mrb[24].mxu1 }
 0x737   :  { %v9628_v9 = vpop.f32.mrb[25].mxu0  ;;  %v9650_v30 = vpop.f32.mrb[25].mxu1 }
 0x738   :  { %v9629_v39 = vadd.f32 %v9628_v9, %v9627_v8  ;;  %v9651_v11 = vadd.f32 %v9650_v30, %v9649_v1  ;;  %v9630_v5 = vpop.f32.mrb[26].mxu0  ;;  %v9652_v12 = vpop.f32.mrb[26].mxu1 }
 0x739   :  { %v9631_v14 = vpop.f32.mrb[27].mxu0  ;;  %v9653_v6 = vpop.f32.mrb[27].mxu1 }
 0x73a   :  { %v8343_v15 = vadd.f32 %v9629_v39, %v8115_v36 }
 0x73c   :  { %v8383_v46 = vadd.f32 %v9651_v11, %v8343_v15 }
 0x73e   :  { %v8388_v16 = vmax.f32 %v8383_v46, 0.0 }
 0x740   :  { %v8389_v18 = vpack.c.bf16 %v8388_v16, %v8388_v16 }
 0x742   :  { %9681 = vmatmul.mubr.bf16.vlgmr.msra.gmra.mrb[28].mxu0 %v8389_v18 }
 0x815   :  { %v8489_v20 = vpop.f32.mrb[28].mxu0 }
 0x816   :  { %v8490_v21 = vadd.f32 %v8489_v20, %v8406_v19  ;;  %v9682_v22 = vpop.f32.mrb[29].mxu0 }
 0x817   :  { %v8492_v27 = vpop.f32.mrb[30].mxu0 }
 0x818   :  { %8495 = vst [vmem:[#allocation16] sm:$0xff] %v8490_v21  ;;  %v9683_v2 = vpop.f32.mrb[31].mxu0 }
 0x819   :  { %10469 = shalt.err (!%p10466_p12)
}
 0x81a   :  { %s10470_s2 = scalar_lea.hbm %s10861_s8, 128 }
 0x81b   :  { %p10471_p13 = scmp.ne.s32.totalorder %s10861_s8, %s10470_s2  ;;  %p10474_p0 = scmp.lt.u32.totalorder %s10470_s2, %s10861_s8 }
 0x81d   :  { %p10476_p1 = pnand %p10474_p0, %p10471_p13 }
 0x81f   :  { %10479 = shalt.err (!%p10476_p1)
}
 0x820   :  { %8505 = dma.vmem_to_hbm [thread:$0]  %s8503_s20, 128, %s10861_s8, [#allocation4]  }
 0x821   :  { %10490 = dma.done.wait [#allocation4], 128  }
 0x822   :  { %10491 = vsyncadd [#allocation4], 4294967168 }
 0x823   :  { %8509 = vsyncpa [#allocation3], 1 }
 0x824   :  { %8510 = vsyncpa [#allocation6], 1 }
 0x825   :  { %8511 = vsyncpa [#allocation9], 1 }
 0x826   :  { %8512 = vsyncpa [#allocation12], 1 }
 0x827   :  { %8513 = vsyncpa [#allocation15], 1 }
 0x828   :  { %8514 = vsyncpa [#allocation4], 1 }

</bundles_post_ra>
